<compile_context>
chip_gen: v5e
topology: v5e:2x2
jax: 0.10.0
libtpu: 0.0.40
codegen_flags: <defaults>
</compile_context>

<pallas_src>
import functools

import jax
import jax.numpy as jnp
from jax import lax
from jax.experimental import pallas as pl
from jax.experimental.pallas import tpu as pltpu


def _classifier_kernel(x_ref, w_ref, b_ref, o_ref, *, tap_offsets, th, w_out,
                       c_in, slab_rows, precision):
    """One (batch, row-block) step of out = conv0(x) + conv1(x) + bias.

    x_ref : (1, C, Hp, Wp)       zero-padded NCHW input (whole padded image; the block
                                 index ignores the row axis so it stays resident)
    w_ref : (Cout, T*C)          per-tap weight matrices, tap-major / channel-minor
    b_ref : (Cout, 1)            summed bias of the two convs (f32)
    o_ref : (1, Cout, th*Wo)     lane-dense NCHW-flattened output block (f32)
    """
    hb = pl.program_id(1)
    row0 = pl.multiple_of(hb * th, th)

    # All padded input rows needed for this block of `th` output rows (incl. halo).
    slab = x_ref[0, :, pl.ds(row0, slab_rows), :]             # (C, slab_rows, Wp)

    # im2col: one (C, th, Wo) window per tap (static slices), stacked along the
    # untiled leading axis, flattened ONCE to a lane-dense (T*C, th*Wo) matrix.
    # This replaces the previous 17 per-tap relayouting reshapes with a single
    # relayout, and feeds ONE MXU matmul instead of 68 VPU lane-broadcasts.
    patches = [slab[:, r0:r0 + th, c0:c0 + w_out] for (r0, c0) in tap_offsets]
    stacked = jnp.concatenate(patches, axis=0)                # (T*C, th, Wo)
    stacked = stacked.reshape(len(tap_offsets) * c_in, th * w_out)

    acc = jnp.dot(w_ref[...], stacked, precision=precision,
                  preferred_element_type=jnp.float32)         # (Cout, th*Wo) f32
    o_ref[0] = (acc + b_ref[...]).astype(o_ref.dtype)         # bias broadcast on lanes


def classifier_module_vgg(x_nchw, weights, biases, dilation_series, padding_series,
                          *, compute_dtype=jnp.bfloat16):
    """Forward of Classifier_Module_VGG (PyTorch quirk: returns conv0(x)+conv1(x)).

    x_nchw : (N, C, H, W) float32
    weights: list of (num_classes, C, 3, 3)
    biases : list of (num_classes,)
    Returns (N, num_classes, Ho, Wo) float32.
    """
    assert len(weights) >= 2, "forward() sums conv[0] and conv[1]; need >= 2 convs"
    n, c, h, w = x_nchw.shape
    c_out = weights[0].shape[0]
    compute_dtype = jnp.dtype(compute_dtype)
    # bf16 operands are exact on the MXU; for f32 operands request a full-precision
    # contraction so results match an f32 reference tightly.
    precision = (None if compute_dtype == jnp.dtype(jnp.bfloat16)
                 else lax.Precision.HIGHEST)

    def _osz(sz, k):
        return sz + 2 * padding_series[k] - 2 * dilation_series[k]

    h_out, w_out = _osz(h, 0), _osz(w, 0)
    assert (_osz(h, 1), _osz(w, 1)) == (h_out, w_out), \
        "conv0 and conv1 must produce the same output size to be summed"

    pmax = max(padding_series[0], padding_series[1])
    hp, wp = h + 2 * pmax, w + 2 * pmax

    # ---- host-side fold: one (Cout, C) matrix per tap ------------------------------
    # Tap offset = (row, col) shift into the padded input relative to the output
    # pixel.  Duplicate offsets (shared centre tap) are intentionally NOT merged:
    # the MXU pads the contraction dim to 128 anyway, and unmerged taps keep bf16
    # weight rounding identical to per-conv rounding.
    tap_offsets, tap_mats = [], []
    for k in range(2):                 # forward() only ever uses convs 0 and 1
        d, pd = dilation_series[k], padding_series[k]
        wk = jnp.asarray(weights[k], jnp.float32)             # (Cout, C, 3, 3)
        for ki in range(3):
            for kj in range(3):
                tap_offsets.append((ki * d - pd + pmax, kj * d - pd + pmax))
                tap_mats.append(wk[:, :, ki, kj])             # (Cout, C)
    tap_offsets = tuple(tap_offsets)
    n_taps = len(tap_offsets)
    # (Cout, T*C), tap-major / channel-minor: matches the in-kernel patch stacking.
    w_flat = jnp.stack(tap_mats, axis=1).reshape(c_out, n_taps * c).astype(compute_dtype)
    bias = (jnp.asarray(biases[0], jnp.float32)
            + jnp.asarray(biases[1], jnp.float32)).reshape(c_out, 1)

    max_roff = max(o[0] for o in tap_offsets)
    max_coff = max(o[1] for o in tap_offsets)
    # Defensive: every slab / window slice below must stay inside the padded image.
    assert h_out + max_roff <= hp and w_out + max_coff <= wp, \
        (h_out, max_roff, hp, w_out, max_coff, wp)

    # Zero-pad once by the max padding; per-conv dilation/padding is baked into the
    # static tap offsets above.  Cast to compute_dtype first so the pad writes half
    # the bytes when compute_dtype is bf16.  Input stays NCHW (no transpose).
    x_pad = jnp.pad(x_nchw.astype(compute_dtype),
                    ((0, 0), (0, 0), (pmax, pmax), (pmax, pmax)))

    # ---- VMEM budget & row-block size ----------------------------------------------
    try:
        vmem_cap = int(pltpu.get_tpu_info().vmem_capacity_bytes)
    except Exception:
        vmem_cap = 64 * 1024 * 1024
    vmem_limit = max(32 * 1024 * 1024, min(vmem_cap // 2, 96 * 1024 * 1024))

    bpe = compute_dtype.itemsize

    def _vmem_bytes(cand):
        rows = cand + max_roff
        in_blk = 2 * c * hp * wp * bpe                    # resident padded image (2x buf)
        w_blk = 2 * c_out * n_taps * c * bpe
        out_blk = 2 * c_out * cand * w_out * 4
        work = (c * rows * wp * bpe                       # slab value
                + 2 * n_taps * c * cand * w_out * bpe    # concat + flatten temporaries
                + c_out * cand * w_out * 4)               # f32 accumulator
        return in_blk + w_blk + out_blk + work + (2 << 20)

    # Largest row block wins: each grid step carries ~0.35 us fixed pipeline overhead,
    # so take the biggest divisor of H_out whose lane dim (th*Wo) is a multiple of 128
    # (unmasked vst) and whose footprint fits the VMEM budget.
    divisors = [d for d in range(h_out, 0, -1) if h_out % d == 0]
    th = None
    for cand in divisors:
        if (cand * w_out) % 128 == 0 and _vmem_bytes(cand) <= vmem_limit:
            th = cand
            break
    if th is None:
        # Perf cliff (masked partial stores) but still correct: largest block that fits.
        th = next((cand for cand in divisors if _vmem_bytes(cand) <= vmem_limit), 1)
    n_hb = h_out // th
    slab_rows = th + max_roff

    kernel = functools.partial(
        _classifier_kernel, tap_offsets=tap_offsets, th=th, w_out=w_out,
        c_in=c, slab_rows=slab_rows, precision=precision)

    out_flat = pl.pallas_call(
        kernel,
        out_shape=jax.ShapeDtypeStruct((n, c_out, h_out * w_out), jnp.float32),
        grid_spec=pltpu.PrefetchScalarGridSpec(
            num_scalar_prefetch=0,
            grid=(n, n_hb),
            in_specs=[
                # Whole padded image per batch element; the index ignores the
                # sequential row-block axis so the block stays resident across it.
                # TODO(synk): at realistic C on v7x, switch to per-step row-slab
                #             fetches (pl.Element row dim / manual DMA double-buffer).
                pl.BlockSpec((1, c, hp, wp), lambda b, hb: (b, 0, 0, 0)),
                pl.BlockSpec((c_out, n_taps * c), lambda b, hb: (0, 0)),
                pl.BlockSpec((c_out, 1), lambda b, hb: (0, 0)),
            ],
            out_specs=pl.BlockSpec((1, c_out, th * w_out),
                                   lambda b, hb: (b, 0, hb)),
        ),
        compiler_params=pltpu.CompilerParams(
            # Batch axis is megacore-sharded; row-block axis stays sequential so the
            # constant-index input block is not re-DMAed per core.
            dimension_semantics=("parallel", "arbitrary"),
            vmem_limit_bytes=vmem_limit),
    )(x_pad, w_flat, bias)

    # Free metadata reshape back to NCHW (no transpose, no extra HBM pass).
    return out_flat.reshape(n, c_out, h_out, w_out)


def _reference(x_nchw, weights, biases, dilation_series, padding_series):
    """Pure-JAX reference: conv0(x) + conv1(x) with biases (PyTorch forward quirk)."""
    out = None
    for k in range(2):
        y = lax.conv_general_dilated(
            x_nchw.astype(jnp.float32), jnp.asarray(weights[k], jnp.float32),
            window_strides=(1, 1),
            padding=[(padding_series[k], padding_series[k]),
                     (padding_series[k], padding_series[k])],
            rhs_dilation=(dilation_series[k], dilation_series[k]),
            dimension_numbers=("NCHW", "OIHW", "NCHW"),
            precision=lax.Precision.HIGHEST)
        y = y + jnp.asarray(biases[k], jnp.float32)[None, :, None, None]
        out = y if out is None else out + y
    return out


def init_params(key, dims_in, dilation_series, padding_series, num_classes):
    """Mirror the PyTorch module: one 3x3 conv (with bias) per dilation/padding."""
    weights, biases = [], []
    for i, _ in enumerate(dilation_series):
        kw, kb = jax.random.split(jax.random.fold_in(key, i))
        # m.weight.data.normal_(0, 0.01) in the PyTorch module
        weights.append(0.01 * jax.random.normal(
            kw, (num_classes, dims_in, 3, 3), jnp.float32))
        # nn.Conv2d default bias init: U(-1/sqrt(fan_in), 1/sqrt(fan_in))
        bound = 1.0 / (dims_in * 9) ** 0.5
        biases.append(jax.random.uniform(
            kb, (num_classes,), jnp.float32, minval=-bound, maxval=bound))
    return weights, biases


if __name__ == "__main__":
    key = jax.random.PRNGKey(0)
    k_x, k_p = jax.random.split(key)

    # Small shapes consistent with the module: x is NCHW, ASPP-style dilation series
    # (only the first two convs matter because of the early return in forward()).
    N, C, H, W = 2, 4, 16, 16
    NUM_CLASSES = 8
    DILATION_SERIES = [6, 12, 18, 24]
    PADDING_SERIES = [6, 12, 18, 24]

    x = jax.random.normal(k_x, (N, C, H, W), jnp.float32)
    weights, biases = init_params(k_p, C, DILATION_SERIES, PADDING_SERIES,
                                  NUM_CLASSES)

    # Default perf path: bf16 inputs/weights, f32 accumulation.
    out = classifier_module_vgg(x, weights, biases, DILATION_SERIES, PADDING_SERIES)
    out = jax.block_until_ready(out)
    assert out.shape == (N, NUM_CLASSES, H, W), out.shape

    # Tight check: reference evaluated on the SAME bf16-rounded operands the kernel
    # consumed (MXU products of bf16 are exact, accumulation is f32 on both sides).
    x_r = x.astype(jnp.bfloat16).astype(jnp.float32)
    w_r = [jnp.asarray(wk, jnp.float32).astype(jnp.bfloat16).astype(jnp.float32)
           for wk in weights]
    ref_rounded = jax.block_until_ready(
        _reference(x_r, w_r, biases, DILATION_SERIES, PADDING_SERIES))
    assert jnp.allclose(out, ref_rounded, atol=1e-4, rtol=1e-4), \
        float(jnp.max(jnp.abs(out - ref_rounded)))

    # Sanity check vs. the true f32 module semantics at a bf16-appropriate tolerance.
    ref_f32 = jax.block_until_ready(
        _reference(x, weights, biases, DILATION_SERIES, PADDING_SERIES))
    assert jnp.allclose(out, ref_f32, atol=5e-3, rtol=5e-3), \
        float(jnp.max(jnp.abs(out - ref_f32)))

    print("KERNEL_OK")
</pallas_src>

<mosaic_0001>
module attributes {stable_mosaic.version = 11 : i64} {
  func.func @_classifier_kernel(%arg0: i32, %arg1: i32, %arg2: memref<1x4x40x40xbf16, #tpu.memory_space<vmem>>, %arg3: memref<8x72xbf16, #tpu.memory_space<vmem>>, %arg4: memref<8x1xf32, #tpu.memory_space<vmem>>, %arg5: memref<1x8x256xf32, #tpu.memory_space<vmem>>) attributes {dimension_semantics = [#tpu.dimension_semantics<parallel>, #tpu.dimension_semantics<arbitrary>], iteration_bounds = array<i64: 2, 1>, scalar_prefetch = 0 : i64, scratch_operands = 0 : i64, tpu.core_type = #tpu.core_type<tc>, window_params = [{transform_indices = @transform_0, window_bounds = array<i64: 1, 4, 40, 40>}, {pipeline_mode = #tpu.pipeline_mode<synchronous>, transform_indices = @transform_1, window_bounds = array<i64: 8, 72>}, {pipeline_mode = #tpu.pipeline_mode<synchronous>, transform_indices = @transform_2, window_bounds = array<i64: 8, 1>}, {transform_indices = @transform_3, window_bounds = array<i64: 1, 8, 256>}]} {
    %c16_i32 = arith.constant 16 : i32
    %0 = arith.muli %arg1, %c16_i32 : i32
    %1 = tpu.assume_multiple %0, 16 : i32
    %c0 = arith.constant 0 : index
    %c0_0 = arith.constant 0 : index
    %2 = arith.index_cast %1 : i32 to index
    %c0_1 = arith.constant 0 : index
    %3 = vector.load %arg2[%c0, %c0_0, %2, %c0_1] : memref<1x4x40x40xbf16, #tpu.memory_space<vmem>>, vector<1x4x40x40xbf16>
    %4 = vector.shape_cast %3 : vector<1x4x40x40xbf16> to vector<4x40x40xbf16>
    %5 = vector.extract_strided_slice %4 {offsets = [0, 6, 6], sizes = [4, 16, 16], strides = [1, 1, 1]} : vector<4x40x40xbf16> to vector<4x16x16xbf16>
    %6 = vector.extract_strided_slice %4 {offsets = [0, 6, 12], sizes = [4, 16, 16], strides = [1, 1, 1]} : vector<4x40x40xbf16> to vector<4x16x16xbf16>
    %7 = vector.extract_strided_slice %4 {offsets = [0, 6, 18], sizes = [4, 16, 16], strides = [1, 1, 1]} : vector<4x40x40xbf16> to vector<4x16x16xbf16>
    %8 = vector.extract_strided_slice %4 {offsets = [0, 12, 6], sizes = [4, 16, 16], strides = [1, 1, 1]} : vector<4x40x40xbf16> to vector<4x16x16xbf16>
    %9 = vector.extract_strided_slice %4 {offsets = [0, 12, 12], sizes = [4, 16, 16], strides = [1, 1, 1]} : vector<4x40x40xbf16> to vector<4x16x16xbf16>
    %10 = vector.extract_strided_slice %4 {offsets = [0, 12, 18], sizes = [4, 16, 16], strides = [1, 1, 1]} : vector<4x40x40xbf16> to vector<4x16x16xbf16>
    %11 = vector.extract_strided_slice %4 {offsets = [0, 18, 6], sizes = [4, 16, 16], strides = [1, 1, 1]} : vector<4x40x40xbf16> to vector<4x16x16xbf16>
    %12 = vector.extract_strided_slice %4 {offsets = [0, 18, 12], sizes = [4, 16, 16], strides = [1, 1, 1]} : vector<4x40x40xbf16> to vector<4x16x16xbf16>
    %13 = vector.extract_strided_slice %4 {offsets = [0, 18, 18], sizes = [4, 16, 16], strides = [1, 1, 1]} : vector<4x40x40xbf16> to vector<4x16x16xbf16>
    %14 = vector.extract_strided_slice %4 {offsets = [0, 0, 0], sizes = [4, 16, 16], strides = [1, 1, 1]} : vector<4x40x40xbf16> to vector<4x16x16xbf16>
    %15 = vector.extract_strided_slice %4 {offsets = [0, 0, 12], sizes = [4, 16, 16], strides = [1, 1, 1]} : vector<4x40x40xbf16> to vector<4x16x16xbf16>
    %16 = vector.extract_strided_slice %4 {offsets = [0, 0, 24], sizes = [4, 16, 16], strides = [1, 1, 1]} : vector<4x40x40xbf16> to vector<4x16x16xbf16>
    %17 = vector.extract_strided_slice %4 {offsets = [0, 12, 0], sizes = [4, 16, 16], strides = [1, 1, 1]} : vector<4x40x40xbf16> to vector<4x16x16xbf16>
    %18 = vector.extract_strided_slice %4 {offsets = [0, 12, 12], sizes = [4, 16, 16], strides = [1, 1, 1]} : vector<4x40x40xbf16> to vector<4x16x16xbf16>
    %19 = vector.extract_strided_slice %4 {offsets = [0, 12, 24], sizes = [4, 16, 16], strides = [1, 1, 1]} : vector<4x40x40xbf16> to vector<4x16x16xbf16>
    %20 = vector.extract_strided_slice %4 {offsets = [0, 24, 0], sizes = [4, 16, 16], strides = [1, 1, 1]} : vector<4x40x40xbf16> to vector<4x16x16xbf16>
    %21 = vector.extract_strided_slice %4 {offsets = [0, 24, 12], sizes = [4, 16, 16], strides = [1, 1, 1]} : vector<4x40x40xbf16> to vector<4x16x16xbf16>
    %22 = vector.extract_strided_slice %4 {offsets = [0, 24, 24], sizes = [4, 16, 16], strides = [1, 1, 1]} : vector<4x40x40xbf16> to vector<4x16x16xbf16>
    %23 = tpu.concatenate %5, %6, %7, %8, %9, %10, %11, %12, %13, %14, %15, %16, %17, %18, %19, %20 in 0 : vector<4x16x16xbf16>, vector<4x16x16xbf16>, vector<4x16x16xbf16>, vector<4x16x16xbf16>, vector<4x16x16xbf16>, vector<4x16x16xbf16>, vector<4x16x16xbf16>, vector<4x16x16xbf16>, vector<4x16x16xbf16>, vector<4x16x16xbf16>, vector<4x16x16xbf16>, vector<4x16x16xbf16>, vector<4x16x16xbf16>, vector<4x16x16xbf16>, vector<4x16x16xbf16>, vector<4x16x16xbf16> -> vector<64x16x16xbf16>
    %24 = tpu.concatenate %21, %22 in 0 : vector<4x16x16xbf16>, vector<4x16x16xbf16> -> vector<8x16x16xbf16>
    %25 = tpu.concatenate %23, %24 in 0 : vector<64x16x16xbf16>, vector<8x16x16xbf16> -> vector<72x16x16xbf16>
    %26 = vector.shape_cast %25 : vector<72x16x16xbf16> to vector<72x256xbf16>
    %c0_2 = arith.constant 0 : index
    %c0_3 = arith.constant 0 : index
    %27 = vector.load %arg3[%c0_2, %c0_3] : memref<8x72xbf16, #tpu.memory_space<vmem>>, vector<8x72xbf16>
    %cst = arith.constant dense<0.000000e+00> : vector<8x256xf32>
    %28 = tpu.matmul %27, %26, %cst {dimension_numbers = #tpu.dot_dimension_numbers<[1], [0], [0], [1], [0, 0, 1, 1], [], []>} : vector<8x72xbf16>, vector<72x256xbf16>, vector<8x256xf32> -> vector<8x256xf32>
    %c0_4 = arith.constant 0 : index
    %c0_5 = arith.constant 0 : index
    %29 = vector.load %arg4[%c0_4, %c0_5] : memref<8x1xf32, #tpu.memory_space<vmem>>, vector<8x1xf32>
    %30 = vector.broadcast %29 : vector<8x1xf32> to vector<8x256xf32>
    %31 = arith.addf %28, %30 : vector<8x256xf32>
    %c0_6 = arith.constant 0 : index
    %c0_7 = arith.constant 0 : index
    %c0_8 = arith.constant 0 : index
    %32 = vector.load %arg5[%c0_6, %c0_7, %c0_8] : memref<1x8x256xf32, #tpu.memory_space<vmem>>, vector<1x8x256xf32>
    %33 = vector.shape_cast %32 : vector<1x8x256xf32> to vector<8x256xf32>
    %34 = vector.shape_cast %31 : vector<8x256xf32> to vector<1x8x256xf32>
    tpu.vector_store %arg5[%c0_6, %c0_7, %c0_8], %34 {strides = array<i32>} : memref<1x8x256xf32, #tpu.memory_space<vmem>>, vector<1x8x256xf32>,
    return
  }
  func.func @transform_0(%arg0: i32, %arg1: i32) -> (i32, i32, i32, i32) {
    %c0_i32 = arith.constant 0 : i32
    %c0_i32_0 = arith.constant 0 : i32
    %c0_i32_1 = arith.constant 0 : i32
    %c0_i32_2 = arith.constant 0 : i32
    return %arg0, %c0_i32, %c0_i32_0, %c0_i32_1 : i32, i32, i32, i32
  }
  func.func @transform_1(%arg0: i32, %arg1: i32) -> (i32, i32) {
    %c0_i32 = arith.constant 0 : i32
    %c0_i32_0 = arith.constant 0 : i32
    %c0_i32_1 = arith.constant 0 : i32
    return %c0_i32, %c0_i32_0 : i32, i32
  }
  func.func @transform_2(%arg0: i32, %arg1: i32) -> (i32, i32) {
    %c0_i32 = arith.constant 0 : i32
    %c0_i32_0 = arith.constant 0 : i32
    %c0_i32_1 = arith.constant 0 : i32
    return %c0_i32, %c0_i32_0 : i32, i32
  }
  func.func @transform_3(%arg0: i32, %arg1: i32) -> (i32, i32, i32) {
    %c0_i32 = arith.constant 0 : i32
    %c0_i32_0 = arith.constant 0 : i32
    return %arg0, %c0_i32, %arg1 : i32, i32, i32
  }
}

</mosaic_0001>

<bundles_post_ra>
// kernel: tpu_custom_call.1
= control target key start
LH: loop header
LB: loop body
LE: loop exit
PB: predicated region body
PF: predicated region fallthrough
CT: control target
= control target key end

     0   :  { %8 = vsyncpa [#allocation3], 0  ;;  %s7380_s0 = inlined_call_operand.hbm [shape: bf16[2,4,40,40], index: 0, kind: input, shape index: {}]   ;;  %s7381_s1 = inlined_call_operand.vmem [shape: bf16[8,72], index: 1, kind: input, shape index: {}]   ;;  %s7382_s2 = inlined_call_operand.vmem [shape: f32[8,1], index: 2, kind: input, shape index: {}]   ;;  %s7383_s3 = inlined_call_operand.hbm [shape: f32[2,8,256], index: 3, kind: output, shape index: {}]  }
   0x1   :  { %10 = vsyncpa [#allocation3 + $0x1], 0 }
   0x2   :  { %11 = vsyncpa [#allocation4], 0 }
   0x3   :  { %13 = vsyncpa [#allocation4 + $0x1], 0  ;;  %s4020_s12 = smov 0   ;;  %s4022_s13 = smov 0  }
   0x4   :  { %s4024_s14 = smov 0   ;;  %s4026_s15 = smov 0  }
   0x5   :  { %s4028_s16 = smov 0   ;;  %s4030_s17 = smov 0  }
   0x6 LB: > { %s3705_s18 = sadd.s32 4294967295, %s3982_s17   ;;  %s3706_s19 = sadd.s32 4294967294, %s3982_s17   ;;  %s3982_s17 = sphi %s4030_s17, %s19_s17   ;;  %s3978_s16 = sphi %s4028_s16, %s8045_s16   ;;  %s3974_s15 = sphi %s4026_s15, %s8044_s15   ;;  %s3970_s14 = sphi %s4024_s14, %s8043_s14   ;;  %s3966_s13 = sphi %s4022_s13, %s8042_s13   ;;  %s3962_s12 = sphi %s4020_s12, %s8041_s12  }
   0x7   : > { %s31_s20 = sadd.s32 1, %s3978_s16  ;;  %s38_s21 = sadd.s32 1, %s3970_s14 }
   0x8   : > { %p33_p0 = scmp.ge.s32.totalorder %s31_s20, 2  ;;  %p45_p1 = scmp.ne.s32.totalorder %s3970_s14, %s3966_s13 }
   0x9   : > { %p46_p2 = scmp.eq.s32.totalorder %s3982_s17, 0  ;;  %p51_p3 = scmp.ne.s32.totalorder %s3966_s13, %s3962_s12 }
   0xa   : > { %s8047_s20 = smov (%p33_p0, %s31_s20), 0  ;;  %p52_p5 = scmp.eq.s32.totalorder %s3705_s18, 0 }
   0xb   : > { %p4061_p4 = por %p46_p2, %p45_p1  ;;  %s35_s23 = ssub.s32 %s3978_s16, %s8047_s20 }
   0xc   : > { %p119_p6 = scmp.eq.s32.totalorder %s3705_s18, 1  ;;  %p36_p7 = scmp.eq.s32.totalorder %s35_s23, 0 }
   0xd   : > { %p4067_p8 = por %p52_p5, %p51_p3  ;;  %p125_p10 = scmp.eq.s32.totalorder %s3706_s19, 1 }
   0xe   : > { %p4071_p9 = por %p119_p6, %p45_p1  ;;  %p3708_p12 = scmp.ge.s32.totalorder %s3982_s17, 2 }
   0xf   : > { %s4076_s26 = scalar_select %p36_p7, %s3970_s14, %s38_s21  }
  0x10   : > { %p4078_p11 = por %p125_p10, %p51_p3  ;;  %p3803_p13 = scmp.lt.s32.totalorder %s3982_s17, 2 }
  0x11   : > { %s151_s28 = sand.u32 1, %s3970_s14   ;;  %s3789_s30 = smul.u32 80, %s3978_s16 }
  0x12   : > { %s3788_s29 = smul.u32 80, %s151_s28  ;;  %p3796_p0 = pnand %p3803_p13, %p4061_p4 }
  0x13   : > { %s160_s6 = scalar_lea.hbm %s7380_s0, %s3789_s30  ;;  %p3710_p1 = scmp.ge.s32.totalorder %s3982_s17, 1 }
  0x14   : > { %s155_s7 = scalar_lea.vmem [#allocation2], %s3788_s29  ;;  %s161_s9 = sshll.u32 %s160_s6, 4  ;;  %s162_s9 = int_to_ptr.hbm [resolvable:$true] %s161_s9 }
  0x15   : > { %s163_s8 = sshll.u32 %s155_s7, 4  ;;  %s152_s10 = scalar_lea.sflag [#allocation3], %s151_s28  ;;  %s164_s8 = int_to_ptr.vmem [resolvable:$true] %s163_s8 }
  0x16   : > { %s3984_s11 = smov 64   ;;  %s3985_s18 = smov 4  }
  0x17   : > { %3798 = dma.hbm_to_vmem [thread:$0]  (!%p3796_p0), %s162_s9, 1280, %s164_s8, %s152_s10, %s3984_s11, %s3984_s11, %s3985_s18  }
  0x18   : > { %p171_p2 = scmp.lt.s32.totalorder %s3982_s17, 3 }
  0x1a   : > { %p172_p3 = pnand %p3710_p1, %p171_p2 }
  0x1c   : > { %175 = sbr.rel (%p172_p3) target bundleno = 1464 (0x5b8), region = 32 }
  0x21   : > { %s4094_s19 = sand.u32 1, %s3966_s13  }
  0x22   : > { %s3790_s21 = smul.u32 80, %s4094_s19  ;;  %s178_s22 = scalar_lea.sflag [#allocation3], %s4094_s19 }
  0x24   : > { %s4098_s23 = scalar_lea.vmem [#allocation2], %s3790_s21 }
  0x25   : > { %3953 = dma.done.wait (%p4067_p8), %s178_s22, 1280  }
  0x26   : > { %3955 = vsyncadd (%p4067_p8), %s178_s22, 4294966016  ;;  %v4105_v0 = vld [vmem:[%s4098_s23 + $0x8] sm:$0xf]  ;;  %v4108_v1 = vld [vmem:[%s4098_s23] sm:$0xf]  ;;  %s3986_s28 = smov 122  }
  0x27   : > { %248 = vrot.lane.b32.xlu1 %v4105_v0, %s3986_s28  ;;  %244 = vrot.lane.b32.xlu0 %v4108_v1, %s3986_s28  ;;  %v4115_v2 = vld [vmem:[%s4098_s23 + $0x18] sm:$0xf]  ;;  %v4120_v3 = vld [vmem:[%s4098_s23 + $0x14] sm:$0xf]  ;;  %s3987_s24 = smov 116   ;;  %vm296_vm0 = vcmask 1040384  }
  0x28   : > { %252 = vrot.lane.b32.xlu2 %v4115_v2, %s3986_s28  ;;  %v4123_v4 = vld [vmem:[%s4098_s23 + $0x4] sm:$0xf]  ;;  %v4130_v5 = vld [vmem:[%s4098_s23 + $0x1c] sm:$0xf]  ;;  %v4135_v6 = vld [vmem:[%s4098_s23 + $0x2c] sm:$0xf] }
  0x29   : > { %v4138_v7 = vld [vmem:[%s4098_s23 + $0x28] sm:$0xf]  ;;  %v4145_v8 = vld [vmem:[%s4098_s23 + $0x30] sm:$0xf]  ;;  %v4150_v9 = vld [vmem:[%s4098_s23 + $0x40] sm:$0xf] }
  0x2a   : > { %v4153_v10 = vld [vmem:[%s4098_s23 + $0x3c] sm:$0xf]  ;;  %v4160_v11 = vld [vmem:[%s4098_s23 + $0x44] sm:$0xf]  ;;  %v4183_v12 = vrot.slane %v4123_v4, 7  ;;  %vm297_vm1 = vcmask 1044484  }
  0x2b   : > { %v301_v13 = vrot.slane %v4105_v0, 7  ;;  %vm4191_vm2 = vmor %vm296_vm0, %vm297_vm1  ;;  %v4196_v16 = vld [vmem:[%s4098_s23 + $0xc] sm:$0xf]  ;;  %v4201_v18 = vrot.slane %v4115_v2, 7  ;;  %v308_v21 = vrot.slane %v4130_v5, 7  ;;  %v4224_v25 = vrot.slane %v4135_v6, 7 }
  0x2c   : > { %v300_v14 = vrot.slane %v4183_v12, 4  ;;  %v304_v20 = vrot.slane %v4196_v16, 7  ;;  %v4219_v24 = vld [vmem:[%s4098_s23 + $0x20] sm:$0xf]  ;;  %v315_v29 = vrot.slane %v4145_v8, 7  ;;  %v4247_v33 = vrot.slane %v4150_v9, 7 }
  0x2d   : > { %v303_v17 = vrot.slane %v301_v13, 4  ;;  %v307_v22 = vrot.slane %v4201_v18, 4  ;;  %v310_v26 = vrot.slane %v308_v21, 4  ;;  %v311_v28 = vrot.slane %v4219_v24, 7  ;;  %v4242_v32 = vld [vmem:[%s4098_s23 + $0x34] sm:$0xf] }
  0x2e   : > { %v4205_v19 = vsel %vm4191_vm2, %v300_v14, %v301_v13  ;;  %v314_v30 = vrot.slane %v4224_v25, 4  ;;  %v317_v34 = vrot.slane %v315_v29, 4  ;;  %v318_v36 = vrot.slane %v4242_v32, 7  ;;  %v4265_v40 = vld [vmem:[%s4098_s23 + $0x48] sm:$0xf]  ;;  %s3988_s29 = smov 6  }
  0x2f   : > { %250 = vrot.lane.b32.xlu1 %v4120_v3, %s3986_s28  ;;  %246 = vrot.lane.b32.xlu0 %v4123_v4, %s3986_s28  ;;  %v4216_v23 = vsel %vm4191_vm2, %v303_v17, %v304_v20  ;;  %v4228_v27 = vsel %vm4191_vm2, %v307_v22, %v308_v21  ;;  %v4239_v31 = vsel %vm4191_vm2, %v310_v26, %v311_v28  ;;  %v322_v37 = vrot.slane %v4160_v11, 7  ;;  %v4332_v57 = vld [vmem:[%s4098_s23 + $0x10] sm:$0xf]  ;;  %v4361_v17 = vld [vmem:[%s4098_s23 + $0x24] sm:$0xf]  ;;  %s3989_s30 = smov 110  }
  0x30   : > { %254 = vrot.lane.b32.xlu2 %v4130_v5, %s3986_s28  ;;  %v4251_v35 = vsel %vm4191_vm2, %v314_v30, %v315_v29  ;;  %v321_v38 = vrot.slane %v4247_v33, 4  ;;  %v4262_v39 = vsel %vm4191_vm2, %v317_v34, %v318_v36  ;;  %v325_v43 = vrot.slane %v4265_v40, 7  ;;  %s3992_s4 = smov 16   ;;  %s3993_s5 = smov 32  }
  0x31   : > { %v324_v41 = vrot.slane %v322_v37, 4  ;;  %v4313_v50 = vrot.slane %v4105_v0, 6  ;;  %vm379_vm3 = vcmask 1041408   ;;  %vm380_vm4 = vcmask 1045508   ;;  %s3994_s6 = smov 48   ;;  %s3995_s7 = smov 64  }
  0x32   : > { %v4271_v42 = vsel %vm4191_vm2, %v321_v38, %v322_v37  ;;  %v384_v53 = vrot.slane %v4196_v16, 6  ;;  %vm4327_vm5 = vmor %vm379_vm3, %vm380_vm4  ;;  %v4337_v58 = vrot.slane %v4130_v5, 6  ;;  %v387_v61 = vrot.slane %v4332_v57, 6  ;;  %v4390_v37 = vld [vmem:[%s4098_s23 + $0x38] sm:$0xf]  ;;  %s3996_s8 = smov 80  }
  0x33   : > { %v4280_v44 = vsel %vm4191_vm2, %v324_v41, %v325_v43  ;;  %7499 = vst [vmem:[#allocation8_spill] sm:$0xff] %v4313_v50  ;;  %v383_v52 = vrot.slane %v4313_v50, 4  ;;  %v4366_v20 = vrot.slane %v4145_v8, 6  ;;  %v394_v26 = vrot.slane %v4361_v17, 6  ;;  %s3997_s9 = smov 96   ;;  %s3998_s10 = smov 112  }
  0x34   : > { %7502 = vst [vmem:[#allocation9_spill] sm:$0xff] %v4337_v58  ;;  %v386_v60 = vrot.slane %v384_v53, 4  ;;  %v390_v63 = vrot.slane %v4337_v58, 4  ;;  %v4395_v38 = vrot.slane %v4160_v11, 6  ;;  %vm458_vm6 = vcmask 1042432   ;;  %s3920_s11 = scalar_lea.hbm %s7383_s3, 32 }
  0x35   : > { %v4341_v59 = vsel %vm4327_vm5, %v383_v52, %v384_v53  ;;  %7505 = vst [vmem:[#allocation12_spill] sm:$0xff] %v4366_v20  ;;  %v397_v29 = vrot.slane %v4366_v20, 4  ;;  %v401_v52 = vrot.slane %v4390_v37, 6  ;;  %vm459_vm7 = vcmask 1046532  }
  0x36   : > { %7503 = vst [vmem:[#allocation10_spill] sm:$0xff] %v4341_v59  ;;  %vm4495_vm8 = vmor %vm458_vm6, %vm459_vm7  ;;  %vm1590_vm9 = vcmask 1047556   ;;  %vm3394_vm10 = vcmask 130048   ;;  %vm3410_vm11 = vcmask 261120   ;;  %vm3421_vm12 = vcmask 392192  }
  0x37   : > { %258 = vrot.lane.b32.xlu1 %v4135_v6, %s3986_s28  ;;  %256 = vrot.lane.b32.xlu0 %v4138_v7, %s3986_s28  ;;  %7509 = vst [vmem:[#allocation16_spill] sm:$0xff] %v4395_v38  ;;  %vm3432_vm13 = vcmask 523264   ;;  %vm3443_vm14 = vcmask 654336   ;;  %vm3465_vm15 = vcmask 916480   ;;  %vm3454_vm0 = vcmask 785408  }
  0x38   : > { %260 = vrot.lane.b32.xlu2 %v4145_v8, %s3986_s28  ;;  %vm3570_vm1 = vcmask 1043456  }
  0x3f   : > { %264 = vrot.lane.b32.xlu1 %v4150_v9, %s3986_s28  ;;  %262 = vrot.lane.b32.xlu0 %v4153_v10, %s3986_s28 }
  0x40   : > { %266 = vrot.lane.b32.xlu2 %v4160_v11, %s3986_s28 }
  0x47   : > { %270 = vrot.lane.b32.xlu1 %v4123_v4, %s3987_s24  ;;  %268 = vrot.lane.b32.xlu0 %v4108_v1, %s3987_s24 }
  0x48   : > { %272 = vrot.lane.b32.xlu2 %v4105_v0, %s3987_s24  ;;  %v391_v0 = vrot.slane %v4219_v24, 6 }
  0x4a   : > { %v4370_v21 = vsel %vm4327_vm5, %v390_v63, %v391_v0  ;;  %v393_v22 = vrot.slane %v391_v0, 4 }
  0x4b   : > { %7506 = vst [vmem:[#allocation13_spill] sm:$0xff] %v4370_v21 }
  0x4c   : > { %v4383_v30 = vsel %vm4327_vm5, %v393_v22, %v394_v26  ;;  %v4419_v22 = vld [vmem:[%s4098_s23 + $0x4c] sm:$0xf]  ;;  %s3787_s23 = sshll.u32 %s3974_s15, 4 }
  0x4d   : > { %7508 = vst [vmem:[#allocation15_spill] sm:$0xff] %v4383_v30 }
  0x4f   : > { %276 = vrot.lane.b32.xlu1 %v4115_v2, %s3987_s24  ;;  %274 = vrot.lane.b32.xlu0 %v4120_v3, %s3987_s24 }
  0x50   : > { %278 = vrot.lane.b32.xlu2 %v4130_v5, %s3987_s24  ;;  %v4354_v5 = vsel %vm4327_vm5, %v386_v60, %v387_v61  ;;  %v404_v60 = vrot.slane %v4395_v38, 4 }
  0x51   : > { %7504 = vst [vmem:[#allocation11_spill] sm:$0xff] %v4354_v5 }
  0x57   : > { %282 = vrot.lane.b32.xlu1 %v4135_v6, %s3987_s24  ;;  %280 = vrot.lane.b32.xlu0 %v4138_v7, %s3987_s24 }
  0x58   : > { %284 = vrot.lane.b32.xlu2 %v4145_v8, %s3987_s24  ;;  %v398_v8 = vrot.slane %v4242_v32, 6 }
  0x5a   : > { %v4399_v41 = vsel %vm4327_vm5, %v397_v29, %v398_v8  ;;  %v400_v43 = vrot.slane %v398_v8, 4  ;;  %v408_v8 = vrot.slane %v4419_v22, 6 }
  0x5b   : > { %7510 = vst [vmem:[#allocation17_spill] sm:$0xff] %v4399_v41 }
  0x5c   : > { %v4412_v61 = vsel %vm4327_vm5, %v400_v43, %v401_v52 }
  0x5d   : > { %7512 = vst [vmem:[#allocation19_spill] sm:$0xff] %v4412_v61 }
  0x5f   : > { %288 = vrot.lane.b32.xlu1 %v4150_v9, %s3987_s24  ;;  %286 = vrot.lane.b32.xlu0 %v4153_v10, %s3987_s24 }
  0x60   : > { %290 = vrot.lane.b32.xlu2 %v4160_v11, %s3987_s24  ;;  %v405_v11 = vrot.slane %v4265_v40, 6 }
  0x62   : > { %v4425_v26 = vsel %vm4327_vm5, %v404_v60, %v405_v11  ;;  %v407_v29 = vrot.slane %v405_v11, 4 }
  0x63   : > { %7513 = vst [vmem:[#allocation20_spill] sm:$0xff] %v4425_v26 }
  0x64   : > { %v4436_v43 = vsel %vm4327_vm5, %v407_v29, %v408_v8 }
  0x65   : > { %7515 = vst [vmem:[#allocation22_spill] sm:$0xff] %v4436_v43 }
  0x67   : > { %329 = vrot.lane.b32.xlu1 %v4205_v19, %s3986_s28  ;;  %327 = vrot.lane.b32.xlu0 %v4183_v12, %s3986_s28 }
  0x68   : > { %331 = vrot.lane.b32.xlu2 %v4216_v23, %s3986_s28 }
  0x6f   : > { %335 = vrot.lane.b32.xlu1 %v4228_v27, %s3986_s28  ;;  %333 = vrot.lane.b32.xlu0 %v4201_v18, %s3986_s28 }
  0x70   : > { %337 = vrot.lane.b32.xlu2 %v4239_v31, %s3986_s28 }
  0x77   : > { %341 = vrot.lane.b32.xlu1 %v4251_v35, %s3986_s28  ;;  %339 = vrot.lane.b32.xlu0 %v4224_v25, %s3986_s28 }
  0x78   : > { %343 = vrot.lane.b32.xlu2 %v4262_v39, %s3986_s28 }
  0x7f   : > { %347 = vrot.lane.b32.xlu1 %v4271_v42, %s3986_s28  ;;  %345 = vrot.lane.b32.xlu0 %v4247_v33, %s3986_s28 }
  0x80   : > { %349 = vrot.lane.b32.xlu2 %v4280_v44, %s3986_s28 }
  0x82   : > { %v4284_v45 = vpop.permute.xlu2 %252 }
  0x87   : > { %353 = vrot.lane.b32.xlu1 %v4205_v19, %s3987_s24  ;;  %351 = vrot.lane.b32.xlu0 %v4183_v12, %s3987_s24 }
  0x88   : > { %355 = vrot.lane.b32.xlu2 %v4216_v23, %s3987_s24 }
  0x8a   : > { %v4292_v46 = vpop.permute.xlu2 %254 }
  0x8f   : > { %359 = vrot.lane.b32.xlu1 %v4228_v27, %s3987_s24  ;;  %357 = vrot.lane.b32.xlu0 %v4201_v18, %s3987_s24 }
  0x90   : > { %361 = vrot.lane.b32.xlu2 %v4239_v31, %s3987_s24 }
  0x92   : > { %v4300_v47 = vpop.permute.xlu2 %260 }
  0x97   : > { %365 = vrot.lane.b32.xlu1 %v4251_v35, %s3987_s24  ;;  %363 = vrot.lane.b32.xlu0 %v4224_v25, %s3987_s24 }
  0x98   : > { %367 = vrot.lane.b32.xlu2 %v4262_v39, %s3987_s24 }
  0x99   : > { %v4306_v48 = vpop.permute.xlu1 %248  ;;  %v4308_v49 = vpop.permute.xlu0 %244 }
  0x9a   : > { %v4315_v51 = vpop.permute.xlu2 %266 }
  0x9f   : > { %371 = vrot.lane.b32.xlu1 %v4271_v42, %s3987_s24  ;;  %369 = vrot.lane.b32.xlu0 %v4247_v33, %s3987_s24 }
  0xa0   : > { %373 = vrot.lane.b32.xlu2 %v4280_v44, %s3987_s24 }
  0xa1   : > { %v4323_v54 = vpop.permute.xlu1 %250  ;;  %v4325_v55 = vpop.permute.xlu0 %246 }
  0xa2   : > { %v4344_v62 = vpop.permute.xlu2 %272 }
  0xa7   : > { %412 = vrot.lane.b32.xlu1 %v4341_v59, %s3986_s28  ;;  %410 = vrot.lane.b32.xlu0 %v4313_v50, %s3986_s28 }
  0xa8   : > { %414 = vrot.lane.b32.xlu2 %v4354_v5, %s3986_s28 }
  0xa9   : > { %v4356_v13 = vpop.permute.xlu1 %258  ;;  %v4358_v14 = vpop.permute.xlu0 %256 }
  0xaa   : > { %v4373_v28 = vpop.permute.xlu2 %278 }
  0xab   : > { %7507 = vst [vmem:[#allocation14_spill] sm:$0xff] %v4373_v28 }
  0xaf   : > { %418 = vrot.lane.b32.xlu1 %v4370_v21, %s3986_s28  ;;  %416 = vrot.lane.b32.xlu0 %v4337_v58, %s3986_s28 }
  0xb0   : > { %420 = vrot.lane.b32.xlu2 %v4383_v30, %s3986_s28 }
  0xb1   : > { %v4385_v34 = vpop.permute.xlu1 %264  ;;  %v4387_v36 = vpop.permute.xlu0 %262 }
  0xb2   : > { %v4402_v53 = vpop.permute.xlu2 %284 }
  0xb3   : > { %7511 = vst [vmem:[#allocation18_spill] sm:$0xff] %v4402_v53 }
  0xb7   : > { %424 = vrot.lane.b32.xlu1 %v4399_v41, %s3986_s28  ;;  %422 = vrot.lane.b32.xlu0 %v4366_v20, %s3986_s28 }
  0xb8   : > { %426 = vrot.lane.b32.xlu2 %v4412_v61, %s3986_s28 }
  0xb9   : > { %v4414_v63 = vpop.permute.xlu1 %270  ;;  %v4416_v0 = vpop.permute.xlu0 %268 }
  0xba   : > { %v4428_v53 = vpop.permute.xlu2 %290 }
  0xbb   : > { %7514 = vst [vmem:[#allocation21_spill] sm:$0xff] %v4428_v53 }
  0xbf   : > { %430 = vrot.lane.b32.xlu1 %v4425_v26, %s3986_s28  ;;  %428 = vrot.lane.b32.xlu0 %v4395_v38, %s3986_s28 }
  0xc0   : > { %432 = vrot.lane.b32.xlu2 %v4436_v43, %s3986_s28 }
  0xc1   : > { %v4438_v52 = vpop.permute.xlu1 %276  ;;  %v4440_v28 = vpop.permute.xlu0 %274 }
  0xc2   : > { %v4444_v60 = vpop.permute.xlu2 %331 }
  0xc3   : > { %7516 = vst [vmem:[#allocation23_spill] sm:$0xff] %v4444_v60 }
  0xc7   : > { %436 = vrot.lane.b32.xlu1 %v4341_v59, %s3987_s24  ;;  %434 = vrot.lane.b32.xlu0 %v4313_v50, %s3987_s24 }
  0xc8   : > { %438 = vrot.lane.b32.xlu2 %v4354_v5, %s3987_s24 }
  0xc9   : > { %v4450_v11 = vpop.permute.xlu1 %282  ;;  %v4452_v56 = vpop.permute.xlu0 %280 }
  0xca   : > { %7517 = vst [vmem:[#allocation24_spill] sm:$0xff] %v4452_v56  ;;  %v4456_v29 = vpop.permute.xlu2 %337 }
  0xcb   : > { %7518 = vst [vmem:[#allocation25_spill] sm:$0xff] %v4456_v29 }
  0xcf   : > { %442 = vrot.lane.b32.xlu1 %v4370_v21, %s3987_s24  ;;  %440 = vrot.lane.b32.xlu0 %v4337_v58, %s3987_s24  ;;  %v4481_v58 = vrot.slane %v4108_v1, 5 }
  0xd0   : > { %444 = vrot.lane.b32.xlu2 %v4383_v30, %s3987_s24 }
  0xd1   : > { %v4462_v8 = vpop.permute.xlu1 %288  ;;  %v4464_v59 = vpop.permute.xlu0 %286 }
  0xd2   : > { %7519 = vst [vmem:[#allocation26_spill] sm:$0xff] %v4462_v8  ;;  %v4468_v50 = vpop.permute.xlu2 %343 }
  0xd3   : > { %7520 = vst [vmem:[#allocation27_spill] sm:$0xff] %v4464_v59 }
  0xd4   : > { %7521 = vst [vmem:[#allocation28_spill] sm:$0xff] %v4468_v50  ;;  %v743_v50 = vrot.slane %v4325_v55, 7  ;;  %v750_v55 = vrot.slane %v4284_v45, 7 }
  0xd7   : > { %448 = vrot.lane.b32.xlu1 %v4399_v41, %s3987_s24  ;;  %446 = vrot.lane.b32.xlu0 %v4366_v20, %s3987_s24  ;;  %v462_v20 = vrot.slane %v4481_v58, 4  ;;  %v463_v41 = vrot.slane %v4123_v4, 5 }
  0xd8   : > { %450 = vrot.lane.b32.xlu2 %v4412_v61, %s3987_s24 }
  0xd9   : > { %v4474_v5 = vpop.permute.xlu1 %329  ;;  %v4476_v21 = vpop.permute.xlu0 %327  ;;  %v4514_v4 = vrot.slane %v463_v41, 4 }
  0xda   : > { %7522 = vst [vmem:[#allocation29_spill] sm:$0xff] %v4474_v5  ;;  %v4483_v29 = vpop.permute.xlu2 %349 }
  0xdb   : > { %7523 = vst [vmem:[#allocation30_spill] sm:$0xff] %v4476_v21  ;;  %v4527_v21 = vrot.slane %v4138_v7, 5 }
  0xdc   : > { %7524 = vst [vmem:[#allocation31_spill] sm:$0xff] %v4483_v29 }
  0xdf   : > { %454 = vrot.lane.b32.xlu1 %v4425_v26, %s3987_s24  ;;  %452 = vrot.lane.b32.xlu0 %v4395_v38, %s3987_s24  ;;  %v4503_v26 = vsel %vm4495_vm8, %v462_v20, %v463_v41  ;;  %v4506_v38 = vrot.slane %v4120_v3, 5  ;;  %v472_v41 = vrot.slane %v4527_v21, 4 }
  0xe0   : > { %456 = vrot.lane.b32.xlu2 %v4436_v43, %s3987_s24 }
  0xe1   : > { %v4491_v30 = vpop.permute.xlu1 %335  ;;  %v4493_v61 = vpop.permute.xlu0 %333  ;;  %v467_v43 = vrot.slane %v4506_v38, 4 }
  0xe2   : > { %7525 = vst [vmem:[#allocation32_spill] sm:$0xff] %v4491_v30  ;;  %v4508_v29 = vpop.permute.xlu2 %355 }
  0xe3   : > { %7526 = vst [vmem:[#allocation33_spill] sm:$0xff] %v4493_v61  ;;  %v468_v61 = vrot.slane %v4115_v2, 5 }
  0xe4   : > { %7529 = vst [vmem:[#allocation34_spill] sm:$0xff] %v4508_v29 }
  0xe5   : > { %v469_v29 = vsel %vm4495_vm8, %v467_v43, %v468_v61  ;;  %v470_v2 = vrot.slane %v468_v61, 4 }
  0xe7   : > { %481 = vrot.lane.b32.xlu0 %v4481_v58, %s3988_s29  ;;  %483 = vrot.lane.b32.xlu1 %v4503_v26, %s3988_s29 }
  0xe8   : > { %485 = vrot.lane.b32.xlu2 %v4514_v4, %s3988_s29 }
  0xe9   : > { %v4518_v20 = vpop.permute.xlu1 %341  ;;  %v4520_v30 = vpop.permute.xlu0 %339 }
  0xea   : > { %7530 = vst [vmem:[#allocation35_spill] sm:$0xff] %v4518_v20  ;;  %v4529_v60 = vpop.permute.xlu2 %361 }
  0xeb   : > { %7531 = vst [vmem:[#allocation36_spill] sm:$0xff] %v4520_v30  ;;  %v473_v30 = vrot.slane %v4135_v6, 5 }
  0xec   : > { %7532 = vst [vmem:[#allocation37_spill] sm:$0xff] %v4529_v60  ;;  %v476_v60 = vrot.slane %v4153_v10, 5 }
  0xed   : > { %v474_v43 = vsel %vm4495_vm8, %v472_v41, %v473_v30  ;;  %v475_v61 = vrot.slane %v473_v30, 4 }
  0xee   : > { %v477_v6 = vrot.slane %v476_v60, 4 }
  0xef   : > { %487 = vrot.lane.b32.xlu0 %v4506_v38, %s3988_s29  ;;  %489 = vrot.lane.b32.xlu1 %v469_v29, %s3988_s29 }
  0xf0   : > { %491 = vrot.lane.b32.xlu2 %v470_v2, %s3988_s29 }
  0xf1   : > { %v4536_v20 = vpop.permute.xlu1 %347  ;;  %v4538_v5 = vpop.permute.xlu0 %345 }
  0xf2   : > { %7533 = vst [vmem:[#allocation38_spill] sm:$0xff] %v4536_v20  ;;  %v4544_v53 = vpop.permute.xlu2 %367  ;;  %v478_v20 = vrot.slane %v4150_v9, 5 }
  0xf3   : > { %7534 = vst [vmem:[#allocation39_spill] sm:$0xff] %v4538_v5 }
  0xf4   : > { %7535 = vst [vmem:[#allocation40_spill] sm:$0xff] %v4544_v53  ;;  %v479_v41 = vsel %vm4495_vm8, %v477_v6, %v478_v20  ;;  %v480_v53 = vrot.slane %v478_v20, 4 }
  0xf7   : > { %493 = vrot.lane.b32.xlu0 %v4527_v21, %s3988_s29  ;;  %495 = vrot.lane.b32.xlu1 %v474_v43, %s3988_s29 }
  0xf8   : > { %497 = vrot.lane.b32.xlu2 %v475_v61, %s3988_s29 }
  0xf9   : > { %v4550_v59 = vpop.permute.xlu1 %353  ;;  %v4552_v5 = vpop.permute.xlu0 %351 }
  0xfa   : > { %7536 = vst [vmem:[#allocation41_spill] sm:$0xff] %v4552_v5  ;;  %v4557_v8 = vpop.permute.xlu2 %373 }
  0xfb   : > { %7537 = vst [vmem:[#allocation42_spill] sm:$0xff] %v4557_v8 }
  0xff   : > { %499 = vrot.lane.b32.xlu0 %v476_v60, %s3988_s29  ;;  %501 = vrot.lane.b32.xlu1 %v479_v41, %s3988_s29 }
 0x100   : > { %503 = vrot.lane.b32.xlu2 %v480_v53, %s3988_s29 }
 0x101   : > { %v4561_v30 = vpop.permute.xlu1 %359  ;;  %v4563_v56 = vpop.permute.xlu0 %357 }
 0x102   : > { %7538 = vst [vmem:[#allocation43_spill] sm:$0xff] %v4561_v30  ;;  %v4566_v9 = vpop.permute.xlu2 %414 }
 0x103   : > { %7539 = vst [vmem:[#allocation44_spill] sm:$0xff] %v4563_v56 }
 0x104   : > { %7540 = vst [vmem:[#allocation45_spill] sm:$0xff] %v4566_v9 }
 0x107   : > { %505 = vrot.lane.b32.xlu0 %v4481_v58, %s3986_s28  ;;  %507 = vrot.lane.b32.xlu1 %v4503_v26, %s3986_s28 }
 0x108   : > { %509 = vrot.lane.b32.xlu2 %v4514_v4, %s3986_s28 }
 0x109   : > { %v4572_v6 = vpop.permute.xlu1 %365  ;;  %v4574_v8 = vpop.permute.xlu0 %363 }
 0x10a   : > { %7541 = vst [vmem:[#allocation46_spill] sm:$0xff] %v4572_v6  ;;  %v4578_v20 = vpop.permute.xlu2 %420 }
 0x10b   : > { %7542 = vst [vmem:[#allocation47_spill] sm:$0xff] %v4574_v8 }
 0x10c   : > { %7543 = vst [vmem:[#allocation48_spill] sm:$0xff] %v4578_v20 }
 0x10f   : > { %511 = vrot.lane.b32.xlu0 %v4506_v38, %s3986_s28  ;;  %513 = vrot.lane.b32.xlu1 %v469_v29, %s3986_s28 }
 0x110   : > { %515 = vrot.lane.b32.xlu2 %v470_v2, %s3986_s28 }
 0x111   : > { %v4583_v9 = vpop.permute.xlu1 %371  ;;  %v4585_v56 = vpop.permute.xlu0 %369 }
 0x112   : > { %7544 = vst [vmem:[#allocation49_spill] sm:$0xff] %v4583_v9  ;;  %v4588_v30 = vpop.permute.xlu2 %426 }
 0x113   : > { %7545 = vst [vmem:[#allocation50_spill] sm:$0xff] %v4585_v56 }
 0x114   : > { %7546 = vst [vmem:[#allocation51_spill] sm:$0xff] %v4588_v30 }
 0x117   : > { %517 = vrot.lane.b32.xlu0 %v4527_v21, %s3986_s28  ;;  %519 = vrot.lane.b32.xlu1 %v474_v43, %s3986_s28 }
 0x118   : > { %521 = vrot.lane.b32.xlu2 %v475_v61, %s3986_s28 }
 0x119   : > { %v4593_v8 = vpop.permute.xlu1 %412  ;;  %v4595_v20 = vpop.permute.xlu0 %410 }
 0x11a   : > { %7547 = vst [vmem:[#allocation52_spill] sm:$0xff] %v4593_v8  ;;  %v4598_v6 = vpop.permute.xlu2 %432 }
 0x11b   : > { %7548 = vst [vmem:[#allocation53_spill] sm:$0xff] %v4595_v20 }
 0x11c   : > { %7549 = vst [vmem:[#allocation54_spill] sm:$0xff] %v4598_v6 }
 0x11f   : > { %523 = vrot.lane.b32.xlu0 %v476_v60, %s3986_s28  ;;  %525 = vrot.lane.b32.xlu1 %v479_v41, %s3986_s28 }
 0x120   : > { %527 = vrot.lane.b32.xlu2 %v480_v53, %s3986_s28 }
 0x121   : > { %v4602_v56 = vpop.permute.xlu1 %418  ;;  %v4604_v30 = vpop.permute.xlu0 %416 }
 0x122   : > { %7550 = vst [vmem:[#allocation55_spill] sm:$0xff] %v4602_v56  ;;  %v4607_v9 = vpop.permute.xlu2 %438 }
 0x123   : > { %7551 = vst [vmem:[#allocation56_spill] sm:$0xff] %v4604_v30  ;;  %v618_v30 = vrot.slane %v4419_v22, 5 }
 0x124   : > { %7552 = vst [vmem:[#allocation57_spill] sm:$0xff] %v4607_v9 }
 0x127   : > { %529 = vrot.lane.b32.xlu0 %v4481_v58, %s3989_s30  ;;  %531 = vrot.lane.b32.xlu1 %v4503_v26, %s3989_s30 }
 0x128   : > { %533 = vrot.lane.b32.xlu2 %v4514_v4, %s3989_s30 }
 0x129   : > { %v4613_v6 = vpop.permute.xlu1 %424  ;;  %v4615_v20 = vpop.permute.xlu0 %422 }
 0x12a   : > { %7553 = vst [vmem:[#allocation58_spill] sm:$0xff] %v4613_v6  ;;  %v4619_v56 = vpop.permute.xlu2 %444 }
 0x12b   : > { %7554 = vst [vmem:[#allocation59_spill] sm:$0xff] %v4615_v20  ;;  %v616_v20 = vrot.slane %v4265_v40, 5 }
 0x12c   : > { %7555 = vst [vmem:[#allocation60_spill] sm:$0xff] %v4619_v56 }
 0x12d   : > { %v617_v6 = vrot.slane %v616_v20, 4 }
 0x12f   : > { %535 = vrot.lane.b32.xlu0 %v4506_v38, %s3989_s30  ;;  %537 = vrot.lane.b32.xlu1 %v469_v29, %s3989_s30 }
 0x130   : > { %539 = vrot.lane.b32.xlu2 %v470_v2, %s3989_s30 }
 0x131   : > { %v4624_v9 = vpop.permute.xlu1 %430  ;;  %v4626_v58 = vpop.permute.xlu0 %428 }
 0x132   : > { %7556 = vst [vmem:[#allocation61_spill] sm:$0xff] %v4624_v9  ;;  %v4629_v26 = vpop.permute.xlu2 %450  ;;  %v613_v9 = vrot.slane %v4390_v37, 5 }
 0x133   : > { %7557 = vst [vmem:[#allocation62_spill] sm:$0xff] %v4626_v58 }
 0x134   : > { %7558 = vst [vmem:[#allocation63_spill] sm:$0xff] %v4629_v26 }
 0x137   : > { %541 = vrot.lane.b32.xlu0 %v4527_v21, %s3989_s30  ;;  %543 = vrot.lane.b32.xlu1 %v474_v43, %s3989_s30 }
 0x138   : > { %545 = vrot.lane.b32.xlu2 %v475_v61, %s3989_s30 }
 0x139   : > { %v4634_v4 = vpop.permute.xlu1 %436  ;;  %v4636_v56 = vpop.permute.xlu0 %434 }
 0x13a   : > { %7559 = vst [vmem:[#allocation64_spill] sm:$0xff] %v4634_v4  ;;  %v4639_v38 = vpop.permute.xlu2 %456 }
 0x13b   : > { %7560 = vst [vmem:[#allocation65_spill] sm:$0xff] %v4636_v56 }
 0x13c   : > { %7561 = vst [vmem:[#allocation66_spill] sm:$0xff] %v4639_v38 }
 0x13f   : > { %547 = vrot.lane.b32.xlu0 %v476_v60, %s3989_s30  ;;  %549 = vrot.lane.b32.xlu1 %v479_v41, %s3989_s30 }
 0x140   : > { %551 = vrot.lane.b32.xlu2 %v480_v53, %s3989_s30 }
 0x141   : > { %v4643_v29 = vpop.permute.xlu1 %442  ;;  %v4645_v2 = vpop.permute.xlu0 %440 }
 0x142   : > { %7562 = vst [vmem:[#allocation67_spill] sm:$0xff] %v4643_v29  ;;  %v4648_v21 = vpop.permute.xlu2 %485 }
 0x143   : > { %7563 = vst [vmem:[#allocation68_spill] sm:$0xff] %v4645_v2 }
 0x144   : > { %7564 = vst [vmem:[#allocation69_spill] sm:$0xff] %v4648_v21 }
 0x147   : > { %553 = vrot.lane.b32.xlu0 %v4183_v12, %s3988_s29  ;;  %555 = vrot.lane.b32.xlu1 %v4205_v19, %s3988_s29 }
 0x148   : > { %557 = vrot.lane.b32.xlu2 %v4216_v23, %s3988_s29 }
 0x149   : > { %v4654_v43 = vpop.permute.xlu1 %448  ;;  %v4656_v61 = vpop.permute.xlu0 %446 }
 0x14a   : > { %7565 = vst [vmem:[#allocation70_spill] sm:$0xff] %v4654_v43  ;;  %v4660_v60 = vpop.permute.xlu2 %491  ;;  %v606_v43 = vrot.slane %v4219_v24, 5 }
 0x14b   : > { %7566 = vst [vmem:[#allocation71_spill] sm:$0xff] %v4656_v61 }
 0x14c   : > { %7567 = vst [vmem:[#allocation72_spill] sm:$0xff] %v4660_v60  ;;  %v607_v29 = vrot.slane %v606_v43, 4 }
 0x14f   : > { %559 = vrot.lane.b32.xlu0 %v4201_v18, %s3988_s29  ;;  %561 = vrot.lane.b32.xlu1 %v4228_v27, %s3988_s29 }
 0x150   : > { %563 = vrot.lane.b32.xlu2 %v4239_v31, %s3988_s29 }
 0x151   : > { %v4666_v53 = vpop.permute.xlu1 %454  ;;  %v4668_v41 = vpop.permute.xlu0 %452 }
 0x152   : > { %7568 = vst [vmem:[#allocation73_spill] sm:$0xff] %v4666_v53  ;;  %v4672_v21 = vpop.permute.xlu2 %497 }
 0x153   : > { %7569 = vst [vmem:[#allocation74_spill] sm:$0xff] %v4668_v41 }
 0x154   : > { %7570 = vst [vmem:[#allocation75_spill] sm:$0xff] %v4672_v21 }
 0x157   : > { %565 = vrot.lane.b32.xlu0 %v4224_v25, %s3988_s29  ;;  %567 = vrot.lane.b32.xlu1 %v4251_v35, %s3988_s29 }
 0x158   : > { %569 = vrot.lane.b32.xlu2 %v4262_v39, %s3988_s29 }
 0x159   : > { %v4678_v60 = vpop.permute.xlu0 %481  ;;  %v4680_v38 = vpop.permute.xlu1 %483 }
 0x15a   : > { %7571 = vst [vmem:[#allocation76_spill] sm:$0xff] %v4678_v60  ;;  %v4684_v53 = vpop.permute.xlu2 %503 }
 0x15b   : > { %7572 = vst [vmem:[#allocation77_spill] sm:$0xff] %v4680_v38 }
 0x15c   : > { %7573 = vst [vmem:[#allocation78_spill] sm:$0xff] %v4684_v53 }
 0x15f   : > { %571 = vrot.lane.b32.xlu0 %v4247_v33, %s3988_s29  ;;  %573 = vrot.lane.b32.xlu1 %v4271_v42, %s3988_s29 }
 0x160   : > { %575 = vrot.lane.b32.xlu2 %v4280_v44, %s3988_s29 }
 0x161   : > { %v4690_v21 = vpop.permute.xlu0 %487  ;;  %v4692_v41 = vpop.permute.xlu1 %489 }
 0x162   : > { %7574 = vst [vmem:[#allocation79_spill] sm:$0xff] %v4690_v21  ;;  %v4696_v60 = vpop.permute.xlu2 %509 }
 0x163   : > { %7575 = vst [vmem:[#allocation80_spill] sm:$0xff] %v4692_v41 }
 0x164   : > { %7576 = vst [vmem:[#allocation81_spill] sm:$0xff] %v4696_v60 }
 0x167   : > { %577 = vrot.lane.b32.xlu0 %v4183_v12, %s3989_s30  ;;  %579 = vrot.lane.b32.xlu1 %v4205_v19, %s3989_s30 }
 0x168   : > { %581 = vrot.lane.b32.xlu2 %v4216_v23, %s3989_s30 }
 0x169   : > { %v4702_v53 = vpop.permute.xlu0 %493  ;;  %v4704_v38 = vpop.permute.xlu1 %495 }
 0x16a   : > { %7577 = vst [vmem:[#allocation82_spill] sm:$0xff] %v4702_v53  ;;  %v4708_v21 = vpop.permute.xlu2 %515 }
 0x16b   : > { %7578 = vst [vmem:[#allocation83_spill] sm:$0xff] %v4704_v38 }
 0x16c   : > { %7579 = vst [vmem:[#allocation84_spill] sm:$0xff] %v4708_v21 }
 0x16f   : > { %583 = vrot.lane.b32.xlu0 %v4201_v18, %s3989_s30  ;;  %585 = vrot.lane.b32.xlu1 %v4228_v27, %s3989_s30 }
 0x170   : > { %587 = vrot.lane.b32.xlu2 %v4239_v31, %s3989_s30 }
 0x171   : > { %v4714_v60 = vpop.permute.xlu0 %499  ;;  %v4716_v41 = vpop.permute.xlu1 %501 }
 0x172   : > { %7580 = vst [vmem:[#allocation85_spill] sm:$0xff] %v4714_v60  ;;  %v4720_v53 = vpop.permute.xlu2 %521 }
 0x173   : > { %7581 = vst [vmem:[#allocation86_spill] sm:$0xff] %v4716_v41  ;;  %v4733_v41 = vrot.slane %v4196_v16, 5 }
 0x174   : > { %7582 = vst [vmem:[#allocation87_spill] sm:$0xff] %v4720_v53 }
 0x175   : > { %v602_v53 = vrot.slane %v4733_v41, 4 }
 0x177   : > { %589 = vrot.lane.b32.xlu0 %v4224_v25, %s3989_s30  ;;  %591 = vrot.lane.b32.xlu1 %v4251_v35, %s3989_s30 }
 0x178   : > { %593 = vrot.lane.b32.xlu2 %v4262_v39, %s3989_s30 }
 0x179   : > { %v4726_v21 = vpop.permute.xlu0 %505  ;;  %v4728_v38 = vpop.permute.xlu1 %507 }
 0x17a   : > { %7583 = vst [vmem:[#allocation88_spill] sm:$0xff] %v4726_v21  ;;  %v4735_v60 = vpop.permute.xlu2 %527  ;;  %v603_v21 = vrot.slane %v4332_v57, 5 }
 0x17b   : > { %7584 = vst [vmem:[#allocation89_spill] sm:$0xff] %v4728_v38 }
 0x17c   : > { %7585 = vst [vmem:[#allocation90_spill] sm:$0xff] %v4735_v60  ;;  %v604_v60 = vsel %vm4495_vm8, %v602_v53, %v603_v21  ;;  %v605_v2 = vrot.slane %v603_v21, 4 }
 0x17f   : > { %595 = vrot.lane.b32.xlu0 %v4247_v33, %s3989_s30  ;;  %597 = vrot.lane.b32.xlu1 %v4271_v42, %s3989_s30 }
 0x180   : > { %599 = vrot.lane.b32.xlu2 %v4280_v44, %s3989_s30  ;;  %s3617_s30 = scalar_lea.hbm %s7383_s3, %s3787_s23 }
 0x181   : > { %v4743_v61 = vpop.permute.xlu0 %511  ;;  %v4745_v38 = vpop.permute.xlu1 %513 }
 0x182   : > { %7586 = vst [vmem:[#allocation91_spill] sm:$0xff] %v4743_v61  ;;  %v4752_v26 = vpop.permute.xlu2 %533  ;;  %v608_v61 = vrot.slane %v4361_v17, 5 }
 0x183   : > { %7587 = vst [vmem:[#allocation92_spill] sm:$0xff] %v4745_v38 }
 0x184   : > { %7588 = vst [vmem:[#allocation93_spill] sm:$0xff] %v4752_v26  ;;  %v609_v53 = vsel %vm4495_vm8, %v607_v29, %v608_v61  ;;  %v611_v26 = vrot.slane %v4242_v32, 5  ;;  %v610_v21 = vrot.slane %v608_v61, 4  ;;  %v615_v61 = vrot.slane %v613_v9, 4 }
 0x186   : > { %v612_v58 = vrot.slane %v611_v26, 4 }
 0x187   : > { %621 = vrot.lane.b32.xlu0 %v4733_v41, %s3988_s29  ;;  %623 = vrot.lane.b32.xlu1 %v604_v60, %s3988_s29 }
 0x188   : > { %625 = vrot.lane.b32.xlu2 %v605_v2, %s3988_s29  ;;  %v614_v29 = vsel %vm4495_vm8, %v612_v58, %v613_v9  ;;  %v619_v58 = vsel %vm4495_vm8, %v617_v6, %v618_v30 }
 0x189   : > { %v4758_v38 = vpop.permute.xlu0 %517  ;;  %v4760_v56 = vpop.permute.xlu1 %519 }
 0x18a   : > { %7589 = vst [vmem:[#allocation94_spill] sm:$0xff] %v4758_v38  ;;  %v4766_v4 = vpop.permute.xlu2 %539 }
 0x18b   : > { %7590 = vst [vmem:[#allocation95_spill] sm:$0xff] %v4760_v56 }
 0x18c   : > { %7591 = vst [vmem:[#allocation96_spill] sm:$0xff] %v4766_v4 }
 0x18f   : > { %627 = vrot.lane.b32.xlu0 %v606_v43, %s3988_s29  ;;  %629 = vrot.lane.b32.xlu1 %v609_v53, %s3988_s29 }
 0x190   : > { %631 = vrot.lane.b32.xlu2 %v610_v21, %s3988_s29 }
 0x191   : > { %v4771_v38 = vpop.permute.xlu0 %523  ;;  %v4773_v56 = vpop.permute.xlu1 %525 }
 0x192   : > { %7592 = vst [vmem:[#allocation97_spill] sm:$0xff] %v4771_v38  ;;  %v4779_v4 = vpop.permute.xlu2 %545 }
 0x193   : > { %7593 = vst [vmem:[#allocation98_spill] sm:$0xff] %v4773_v56 }
 0x194   : > { %7594 = vst [vmem:[#allocation99_spill] sm:$0xff] %v4779_v4  ;;  %v620_v4 = vrot.slane %v618_v30, 4 }
 0x197   : > { %633 = vrot.lane.b32.xlu0 %v611_v26, %s3988_s29  ;;  %635 = vrot.lane.b32.xlu1 %v614_v29, %s3988_s29 }
 0x198   : > { %637 = vrot.lane.b32.xlu2 %v615_v61, %s3988_s29 }
 0x199   : > { %v4784_v38 = vpop.permute.xlu0 %529  ;;  %v4786_v56 = vpop.permute.xlu1 %531 }
 0x19a   : > { %7595 = vst [vmem:[#allocation100_spill] sm:$0xff] %v4784_v38  ;;  %v4791_v8 = vpop.permute.xlu2 %551 }
 0x19b   : > { %7596 = vst [vmem:[#allocation101_spill] sm:$0xff] %v4791_v8 }
 0x19f   : > { %639 = vrot.lane.b32.xlu0 %v616_v20, %s3988_s29  ;;  %641 = vrot.lane.b32.xlu1 %v619_v58, %s3988_s29 }
 0x1a0   : > { %643 = vrot.lane.b32.xlu2 %v620_v4, %s3988_s29 }
 0x1a1   : > { %v4795_v9 = vpop.permute.xlu0 %535  ;;  %v4797_v5 = vpop.permute.xlu1 %537 }
 0x1a2   : > { %v4800_v38 = vpop.permute.xlu2 %557 }
 0x1a3   : > { %7597 = vst [vmem:[#allocation102_spill] sm:$0xff] %v4800_v38 }
 0x1a7   : > { %645 = vrot.lane.b32.xlu0 %v4196_v16, %s3987_s24  ;;  %647 = vrot.lane.b32.xlu1 %v4332_v57, %s3987_s24 }
 0x1a8   : > { %649 = vrot.lane.b32.xlu2 %v4219_v24, %s3987_s24 }
 0x1a9   : > { %v4806_v6 = vpop.permute.xlu0 %541  ;;  %v4808_v8 = vpop.permute.xlu1 %543 }
 0x1aa   : > { %v4812_v30 = vpop.permute.xlu2 %563 }
 0x1af   : > { %651 = vrot.lane.b32.xlu0 %v4361_v17, %s3987_s24  ;;  %653 = vrot.lane.b32.xlu1 %v4242_v32, %s3987_s24 }
 0x1b0   : > { %655 = vrot.lane.b32.xlu2 %v4390_v37, %s3987_s24 }
 0x1b1   : > { %v4818_v38 = vpop.permute.xlu0 %547  ;;  %v4820_v16 = vpop.permute.xlu1 %549 }
 0x1b2   : > { %v4824_v57 = vpop.permute.xlu2 %569 }
 0x1b3   : > { %7598 = vst [vmem:[#allocation103_spill] sm:$0xff] %v4824_v57 }
 0x1b7   : > { %657 = vrot.lane.b32.xlu0 %v4265_v40, %s3987_s24  ;;  %659 = vrot.lane.b32.xlu1 %v4419_v22, %s3987_s24 }
 0x1b8   : > { %681 = vrot.lane.b32.xlu2 %v4733_v41, %s3986_s28 }
 0x1b9   : > { %v4830_v24 = vpop.permute.xlu0 %553  ;;  %v4832_v17 = vpop.permute.xlu1 %555 }
 0x1ba   : > { %v4838_v32 = vpop.permute.xlu2 %575 }
 0x1bb   : > { %7599 = vst [vmem:[#allocation104_spill] sm:$0xff] %v4838_v32 }
 0x1bf   : > { %683 = vrot.lane.b32.xlu0 %v604_v60, %s3986_s28  ;;  %685 = vrot.lane.b32.xlu1 %v605_v2, %s3986_s28 }
 0x1c0   : > { %687 = vrot.lane.b32.xlu2 %v606_v43, %s3986_s28 }
 0x1c1   : > { %v4840_v37 = vpop.permute.xlu0 %559  ;;  %v4842_v57 = vpop.permute.xlu1 %561 }
 0x1c2   : > { %v4851_v41 = vpop.permute.xlu2 %581 }
 0x1c3   : > { %7602 = vst [vmem:[#allocation107_spill] sm:$0xff] %v4851_v41 }
 0x1c7   : > { %689 = vrot.lane.b32.xlu0 %v609_v53, %s3986_s28  ;;  %691 = vrot.lane.b32.xlu1 %v610_v21, %s3986_s28 }
 0x1c8   : > { %693 = vrot.lane.b32.xlu2 %v611_v26, %s3986_s28 }
 0x1c9   : > { %v4847_v40 = vpop.permute.xlu0 %565  ;;  %v4849_v22 = vpop.permute.xlu1 %567 }
 0x1ca   : > { %7600 = vst [vmem:[#allocation105_spill] sm:$0xff] %v4847_v40  ;;  %v4861_v43 = vpop.permute.xlu2 %587 }
 0x1cb   : > { %7601 = vst [vmem:[#allocation106_spill] sm:$0xff] %v4849_v22 }
 0x1cc   : > { %7605 = vst [vmem:[#allocation110_spill] sm:$0xff] %v4861_v43 }
 0x1cf   : > { %695 = vrot.lane.b32.xlu0 %v614_v29, %s3986_s28  ;;  %697 = vrot.lane.b32.xlu1 %v615_v61, %s3986_s28 }
 0x1d0   : > { %699 = vrot.lane.b32.xlu2 %v616_v20, %s3986_s28 }
 0x1d1   : > { %v4856_v2 = vpop.permute.xlu0 %571  ;;  %v4858_v60 = vpop.permute.xlu1 %573 }
 0x1d2   : > { %7603 = vst [vmem:[#allocation108_spill] sm:$0xff] %v4856_v2  ;;  %v4869_v26 = vpop.permute.xlu2 %593 }
 0x1d3   : > { %7604 = vst [vmem:[#allocation109_spill] sm:$0xff] %v4858_v60 }
 0x1d4   : > { %7608 = vst [vmem:[#allocation113_spill] sm:$0xff] %v4869_v26 }
 0x1d7   : > { %701 = vrot.lane.b32.xlu0 %v619_v58, %s3986_s28  ;;  %703 = vrot.lane.b32.xlu1 %v620_v4, %s3986_s28 }
 0x1d9   : > { %v4865_v53 = vpop.permute.xlu0 %577  ;;  %v4867_v21 = vpop.permute.xlu1 %579 }
 0x1da   : > { %7606 = vst [vmem:[#allocation111_spill] sm:$0xff] %v4865_v53  ;;  %v4875_v41 = vpop.permute.xlu2 %599 }
 0x1db   : > { %7607 = vst [vmem:[#allocation112_spill] sm:$0xff] %v4867_v21 }
 0x1dc   : > { %7611 = vst [vmem:[#allocation116_spill] sm:$0xff] %v4875_v41 }
 0x1e1   : > { %v4871_v29 = vpop.permute.xlu0 %583  ;;  %v4873_v61 = vpop.permute.xlu1 %585 }
 0x1e2   : > { %7609 = vst [vmem:[#allocation114_spill] sm:$0xff] %v4871_v29  ;;  %v4885_v4 = vpop.permute.xlu2 %625 }
 0x1e3   : > { %7610 = vst [vmem:[#allocation115_spill] sm:$0xff] %v4873_v61 }
 0x1e4   : > { %7616 = vst [vmem:[#allocation121_spill] sm:$0xff] %v4885_v4 }
 0x1e9   : > { %v4877_v32 = vpop.permute.xlu0 %589  ;;  %v4879_v20 = vpop.permute.xlu1 %591 }
 0x1ea   : > { %7612 = vst [vmem:[#allocation117_spill] sm:$0xff] %v4877_v32  ;;  %v4891_v26 = vpop.permute.xlu2 %631 }
 0x1eb   : > { %7613 = vst [vmem:[#allocation118_spill] sm:$0xff] %v4879_v20 }
 0x1ec   : > { %7619 = vst [vmem:[#allocation124_spill] sm:$0xff] %v4891_v26 }
 0x1f1   : > { %v4881_v43 = vpop.permute.xlu0 %595  ;;  %v4883_v58 = vpop.permute.xlu1 %597 }
 0x1f2   : > { %7614 = vst [vmem:[#allocation119_spill] sm:$0xff] %v4881_v43  ;;  %v4897_v41 = vpop.permute.xlu2 %637 }
 0x1f3   : > { %7615 = vst [vmem:[#allocation120_spill] sm:$0xff] %v4883_v58 }
 0x1f4   : > { %7622 = vst [vmem:[#allocation127_spill] sm:$0xff] %v4897_v41 }
 0x1f9   : > { %v4887_v53 = vpop.permute.xlu0 %621  ;;  %v4889_v21 = vpop.permute.xlu1 %623 }
 0x1fa   : > { %7617 = vst [vmem:[#allocation122_spill] sm:$0xff] %v4887_v53  ;;  %v4903_v43 = vpop.permute.xlu2 %643 }
 0x1fb   : > { %7618 = vst [vmem:[#allocation123_spill] sm:$0xff] %v4889_v21 }
 0x1fc   : > { %7625 = vst [vmem:[#allocation130_spill] sm:$0xff] %v4903_v43 }
 0x201   : > { %v4893_v29 = vpop.permute.xlu0 %627  ;;  %v4895_v61 = vpop.permute.xlu1 %629 }
 0x202   : > { %7620 = vst [vmem:[#allocation125_spill] sm:$0xff] %v4893_v29  ;;  %v650_v53 = vpop.permute.xlu2 %649 }
 0x203   : > { %7621 = vst [vmem:[#allocation126_spill] sm:$0xff] %v4895_v61  ;;  %v666_v61 = vrot.slane %v650_v53, 5 }
 0x209   : > { %v4899_v32 = vpop.permute.xlu0 %633  ;;  %v4901_v20 = vpop.permute.xlu1 %635 }
 0x20a   : > { %7623 = vst [vmem:[#allocation128_spill] sm:$0xff] %v4899_v32  ;;  %v656_v41 = vpop.permute.xlu2 %655 }
 0x20b   : > { %7624 = vst [vmem:[#allocation129_spill] sm:$0xff] %v4901_v20 }
 0x211   : > { %v4905_v58 = vpop.permute.xlu0 %639  ;;  %v4907_v4 = vpop.permute.xlu1 %641 }
 0x212   : > { %7626 = vst [vmem:[#allocation131_spill] sm:$0xff] %v4905_v58  ;;  %v667_v58 = vrot.slane %v666_v61, 4 }
 0x213   : > { %7627 = vst [vmem:[#allocation132_spill] sm:$0xff] %v4907_v4 }
 0x219   : > { %v646_v21 = vpop.permute.xlu0 %645  ;;  %v648_v60 = vpop.permute.xlu1 %647 }
 0x21a   : > { %v661_v26 = vrot.slane %v646_v21, 5  ;;  %v663_v2 = vrot.slane %v648_v60, 5 }
 0x21c   : > { %v662_v29 = vrot.slane %v661_v26, 4  ;;  %v665_v22 = vrot.slane %v663_v2, 4  ;;  %705 = vrot.lane.b32.xlu2 %v661_v26, %s3986_s28 }
 0x21e   : > { %709 = vrot.lane.b32.xlu1 %v665_v22, %s3986_s28  ;;  %v664_v20 = vsel %vm4495_vm8, %v662_v29, %v663_v2  ;;  %v673_v22 = vrot.slane %v656_v41, 5 }
 0x21f   : > { %707 = vrot.lane.b32.xlu0 %v664_v20, %s3986_s28 }
 0x220   : > { %v675_v26 = vrot.slane %v673_v22, 4 }
 0x221   : > { %v652_v32 = vpop.permute.xlu0 %651  ;;  %v654_v4 = vpop.permute.xlu1 %653 }
 0x222   : > { %v668_v43 = vrot.slane %v652_v32, 5  ;;  %v671_v21 = vrot.slane %v654_v4, 5  ;;  %v3714_v4 = vrot.slane %v4138_v7, 11  ;;  %v3715_v7 = vrot.slane %v4153_v10, 11 }
 0x224   : > { %v670_v40 = vrot.slane %v668_v43, 4  ;;  %711 = vrot.lane.b32.xlu2 %v666_v61, %s3986_s28  ;;  %v669_v60 = vsel %vm4495_vm8, %v667_v58, %v668_v43  ;;  %v672_v2 = vrot.slane %v671_v21, 4  ;;  %v3712_v58 = vrot.slane %v4108_v1, 11 }
 0x226   : > { %715 = vrot.lane.b32.xlu1 %v670_v40, %s3986_s28  ;;  %v674_v32 = vsel %vm4495_vm8, %v672_v2, %v673_v22  ;;  %v737_v22 = vsel %vm4191_vm2, %v3714_v4, %v4224_v25  ;;  %v740_v2 = vsel %vm4191_vm2, %v3715_v7, %v4247_v33  ;;  %v3719_v4 = vrot.slane %v4387_v36, 11 }
 0x227   : > { %713 = vrot.lane.b32.xlu0 %v669_v60, %s3986_s28  ;;  %v3713_v60 = vrot.slane %v4120_v3, 11  ;;  %v745_v3 = vrot.slane %v743_v50, 4  ;;  %v778_v36 = vrot.slane %v4438_v52, 7  ;;  %v7628_v52 = vld [vmem:[#allocation14_spill] sm:$0xff] }
 0x229   : > { %v658_v53 = vpop.permute.xlu0 %657  ;;  %v660_v29 = vpop.permute.xlu1 %659  ;;  %v734_v1 = vsel %vm4191_vm2, %v3713_v60, %v4201_v18 }
 0x22a   : > { %v676_v20 = vrot.slane %v658_v53, 5  ;;  %v678_v61 = vrot.slane %v660_v29, 5  ;;  %v746_v53 = vrot.slane %v4306_v48, 7  ;;  %v757_v48 = vrot.slane %v4356_v13, 7 }
 0x22c   : > { %717 = vrot.lane.b32.xlu2 %v671_v21, %s3986_s28  ;;  %v677_v43 = vrot.slane %v676_v20, 4  ;;  %v680_v40 = vrot.slane %v678_v61, 4  ;;  %v731_v21 = vsel %vm4191_vm2, %v3712_v58, %v4183_v12  ;;  %v747_v10 = vsel %vm4191_vm2, %v745_v3, %v746_v53 }
 0x22d   : > { %v759_v13 = vrot.slane %v757_v48, 4  ;;  %v767_v58 = vrot.slane %v4315_v51, 7  ;;  %v781_v53 = vrot.slane %v7628_v52, 7  ;;  %v820_v52 = vrot.slane %v4271_v42, 7 }
 0x22e   : > { %721 = vrot.lane.b32.xlu1 %v675_v26, %s3986_s28  ;;  %v679_v41 = vsel %vm4495_vm8, %v677_v43, %v678_v61  ;;  %v3716_v26 = vrot.slane %v4308_v49, 11  ;;  %v3718_v49 = vrot.slane %v4358_v14, 11  ;;  %v753_v61 = vrot.slane %v4292_v46, 7 }
 0x22f   : > { %719 = vrot.lane.b32.xlu0 %v674_v32, %s3986_s28  ;;  %v3717_v32 = vrot.slane %v4323_v54, 11  ;;  %v760_v14 = vrot.slane %v4300_v47, 7  ;;  %v764_v46 = vrot.slane %v4385_v34, 7  ;;  %v771_v34 = vrot.slane %v4414_v63, 7 }
 0x230   : > { %v744_v29 = vsel %vm4191_vm2, %v3716_v26, %v743_v50  ;;  %v758_v45 = vsel %vm4191_vm2, %v3718_v49, %v757_v48  ;;  %v774_v50 = vrot.slane %v4344_v62, 7  ;;  %v7629_v26 = vld [vmem:[#allocation18_spill] sm:$0xff] }
 0x231   : > { %v751_v43 = vsel %vm4191_vm2, %v3717_v32, %v750_v55  ;;  %v761_v60 = vsel %vm4191_vm2, %v759_v13, %v760_v14  ;;  %v765_v47 = vsel %vm4191_vm2, %v3719_v4, %v764_v46  ;;  %v773_v7 = vrot.slane %v771_v34, 4  ;;  %v5022_v14 = vpop.permute.xlu1 %685  ;;  %v5025_v4 = vpop.permute.xlu0 %683 }
 0x232   : > { %v799_v13 = vrot.slane %v4205_v19, 7  ;;  %7634 = vst [vmem:[#allocation18_spill] sm:$0xff] %v5022_v14  ;;  %v7745_v14 = vld [vmem:[#allocation81_spill] sm:$0xff] }
 0x234   : > { %723 = vrot.lane.b32.xlu2 %v676_v20, %s3986_s28  ;;  %v752_v20 = vrot.slane %v750_v55, 4  ;;  %v7630_v55 = vld [vmem:[#allocation24_spill] sm:$0xff]  ;;  %v801_v19 = vrot.slane %v799_v13, 4 }
 0x235   : > { %7636 = vst [vmem:[#allocation24_spill] sm:$0xff] %v5025_v4  ;;  %v7749_v4 = vld [vmem:[#allocation88_spill] sm:$0xff] }
 0x236   : > { %727 = vrot.lane.b32.xlu1 %v680_v40, %s3986_s28  ;;  %v754_v54 = vsel %vm4191_vm2, %v752_v20, %v753_v61  ;;  %v4971_v40 = vpop.permute.xlu2 %681  ;;  %v7632_v20 = vld [vmem:[#allocation26_spill] sm:$0xff] }
 0x237   : > { %725 = vrot.lane.b32.xlu0 %v679_v41, %s3986_s28  ;;  %v766_v41 = vrot.slane %v764_v46, 4  ;;  %v792_v61 = vrot.slane %v7632_v20, 7 }
 0x239   : > { %v794_v46 = vrot.slane %v792_v61, 4 }
 0x23c   : > { %1189 = vrot.lane.b32.xlu2 %v731_v21, %s3986_s28  ;;  %v768_v21 = vsel %vm4191_vm2, %v766_v41, %v767_v58  ;;  %v7635_v41 = vld [vmem:[#allocation21_spill] sm:$0xff] }
 0x23d   : > { %v795_v58 = vrot.slane %v7635_v41, 7 }
 0x23e   : > { %1193 = vrot.lane.b32.xlu1 %v737_v22, %s3986_s28  ;;  %v3720_v22 = vrot.slane %v4416_v0, 11  ;;  %v4989_v51 = vpop.permute.xlu2 %687  ;;  %v775_v0 = vsel %vm4191_vm2, %v773_v7, %v774_v50  ;;  %v3725_v7 = vrot.slane %v4201_v18, 11  ;;  %v5044_v50 = vpop.permute.xlu1 %691 }
 0x23f   : > { %1191 = vrot.lane.b32.xlu0 %v734_v1, %s3986_s28  ;;  %v3721_v1 = vrot.slane %v4440_v28, 11  ;;  %v785_v28 = vrot.slane %v4450_v11, 7 }
 0x240   : > { %v772_v3 = vsel %vm4191_vm2, %v3720_v22, %v771_v34  ;;  %v802_v34 = vrot.slane %v4216_v23, 7  ;;  %v796_v22 = vsel %vm4191_vm2, %v794_v46, %v795_v58  ;;  %v7649_v46 = vld [vmem:[#allocation32_spill] sm:$0xff]  ;;  %v7650_v58 = vld [vmem:[#allocation33_spill] sm:$0xff] }
 0x241   : > { %v779_v63 = vsel %vm4191_vm2, %v3721_v1, %v778_v36  ;;  %v787_v62 = vrot.slane %v785_v28, 4  ;;  %v809_v1 = vrot.slane %v4239_v31, 7  ;;  %v3726_v31 = vrot.slane %v4224_v25, 11 }
 0x242   : > { %v834_v41 = vrot.slane %v7649_v46, 7 }
 0x244   : > { %1195 = vrot.lane.b32.xlu2 %v740_v2, %s3986_s28  ;;  %v780_v2 = vrot.slane %v778_v36, 4 }
 0x246   : > { %1199 = vrot.lane.b32.xlu1 %v747_v10, %s3986_s28  ;;  %v788_v10 = vrot.slane %v7629_v26, 7  ;;  %v5007_v32 = vpop.permute.xlu2 %693  ;;  %v782_v48 = vsel %vm4191_vm2, %v780_v2, %v781_v53  ;;  %v3727_v2 = vrot.slane %v4247_v33, 11  ;;  %v5069_v26 = vpop.permute.xlu1 %697  ;;  %v823_v33 = vrot.slane %v4280_v44, 7 }
 0x247   : > { %1197 = vrot.lane.b32.xlu0 %v744_v29, %s3986_s28  ;;  %v3722_v29 = vrot.slane %v7630_v55, 11  ;;  %7631 = vst [vmem:[#allocation14_spill] sm:$0xff] %v5007_v32 }
 0x248   : > { %v789_v49 = vsel %vm4191_vm2, %v787_v62, %v788_v10  ;;  %v821_v62 = vsel %vm4191_vm2, %v3727_v2, %v820_v52  ;;  %7641 = vst [vmem:[#allocation134_spill] sm:$0xff] %v5069_v26  ;;  %v822_v10 = vrot.slane %v820_v52, 4 }
 0x249   : > { %v786_v11 = vsel %vm4191_vm2, %v3722_v29, %v785_v28  ;;  %v816_v28 = vrot.slane %v4262_v39, 7  ;;  %v7643_v39 = vld [vmem:[#allocation29_spill] sm:$0xff] }
 0x24a   : > { %v827_v55 = vrot.slane %v7643_v39, 7  ;;  %v824_v20 = vsel %vm4191_vm2, %v822_v10, %v823_v33 }
 0x24c   : > { %1201 = vrot.lane.b32.xlu2 %v751_v43, %s3986_s28  ;;  %v7633_v43 = vld [vmem:[#allocation27_spill] sm:$0xff] }
 0x24d   : > { %7638 = vst [vmem:[#allocation27_spill] sm:$0xff] %v5044_v50 }
 0x24e   : > { %1205 = vrot.lane.b32.xlu1 %v758_v45, %s3986_s28  ;;  %v3723_v45 = vrot.slane %v7633_v43, 11 }
 0x24f   : > { %1203 = vrot.lane.b32.xlu0 %v754_v54, %s3986_s28  ;;  %v3724_v54 = vrot.slane %v4183_v12, 11  ;;  %v5033_v12 = vpop.permute.xlu2 %699 }
 0x250   : > { %7637 = vst [vmem:[#allocation26_spill] sm:$0xff] %v5033_v12  ;;  %v998_v12 = vrot.slane %v7745_v14, 7  ;;  %v3752_v14 = vrot.slane %v7749_v4, 11 }
 0x254   : > { %1207 = vrot.lane.b32.xlu2 %v761_v60, %s3986_s28  ;;  %v793_v60 = vsel %vm4191_vm2, %v3723_v45, %v792_v61  ;;  %v7646_v61 = vld [vmem:[#allocation30_spill] sm:$0xff] }
 0x255   : > { %v3728_v43 = vrot.slane %v7646_v61, 11 }
 0x256   : > { %1211 = vrot.lane.b32.xlu1 %v768_v21, %s3986_s28  ;;  %v800_v21 = vsel %vm4191_vm2, %v3724_v54, %v799_v13  ;;  %v5091_v13 = vpop.permute.xlu1 %703 }
 0x257   : > { %1209 = vrot.lane.b32.xlu0 %v765_v47, %s3986_s28  ;;  %v806_v47 = vrot.slane %v4228_v27, 7  ;;  %v803_v27 = vsel %vm4191_vm2, %v801_v19, %v802_v34  ;;  %v828_v54 = vsel %vm4191_vm2, %v3728_v43, %v827_v55  ;;  %7648 = vst [vmem:[#allocation30_spill] sm:$0xff] %v5091_v13  ;;  %v7652_v19 = vld [vmem:[#allocation36_spill] sm:$0xff] }
 0x258   : > { %v3730_v34 = vrot.slane %v7652_v19, 11 }
 0x259   : > { %v808_v36 = vrot.slane %v806_v47, 4 }
 0x25b   : > { %v810_v23 = vsel %vm4191_vm2, %v808_v36, %v809_v1  ;;  %v836_v36 = vrot.slane %v834_v41, 4  ;;  %v7654_v1 = vld [vmem:[#allocation25_spill] sm:$0xff] }
 0x25c   : > { %1213 = vrot.lane.b32.xlu2 %v772_v3, %s3986_s28  ;;  %v807_v3 = vsel %vm4191_vm2, %v3725_v7, %v806_v47  ;;  %v837_v7 = vrot.slane %v7654_v1, 7 }
 0x25e   : > { %1217 = vrot.lane.b32.xlu1 %v779_v63, %s3986_s28  ;;  %v813_v63 = vrot.slane %v4251_v35, 7 }
 0x25f   : > { %1215 = vrot.lane.b32.xlu0 %v775_v0, %s3986_s28  ;;  %v5052_v0 = vpop.permute.xlu0 %689 }
 0x260   : > { %7639 = vst [vmem:[#allocation21_spill] sm:$0xff] %v5052_v0  ;;  %v815_v53 = vrot.slane %v813_v63, 4  ;;  %v814_v35 = vsel %vm4191_vm2, %v3726_v31, %v813_v63  ;;  %v7656_v31 = vld [vmem:[#allocation13_spill] sm:$0xff]  ;;  %v7734_v0 = vld [vmem:[#allocation79_spill] sm:$0xff] }
 0x261   : > { %v7406_v2 = vrot.slane %v7656_v31, 7 }
 0x262   : > { %v817_v25 = vsel %vm4191_vm2, %v815_v53, %v816_v28  ;;  %v838_v53 = vsel %vm4191_vm2, %v836_v36, %v837_v7 }
 0x264   : > { %1219 = vrot.lane.b32.xlu2 %v782_v48, %s3986_s28  ;;  %v829_v48 = vrot.slane %v827_v55, 4  ;;  %v7660_v55 = vld [vmem:[#allocation11_spill] sm:$0xff] }
 0x266   : > { %1223 = vrot.lane.b32.xlu1 %v789_v49, %s3986_s28  ;;  %v7645_v49 = vld [vmem:[#allocation23_spill] sm:$0xff] }
 0x267   : > { %1221 = vrot.lane.b32.xlu0 %v786_v11, %s3986_s28  ;;  %v5076_v29 = vpop.permute.xlu0 %695  ;;  %v830_v11 = vrot.slane %v7645_v49, 7 }
 0x268   : > { %7644 = vst [vmem:[#allocation29_spill] sm:$0xff] %v5076_v29 }
 0x269   : > { %v831_v44 = vsel %vm4191_vm2, %v829_v48, %v830_v11  ;;  %v886_v48 = vrot.slane %v7660_v55, 7 }
 0x26c   : > { %1225 = vrot.lane.b32.xlu2 %v793_v60, %s3986_s28  ;;  %v3729_v60 = vrot.slane %v7650_v58, 11  ;;  %v7665_v58 = vld [vmem:[#allocation39_spill] sm:$0xff] }
 0x26e   : > { %1229 = vrot.lane.b32.xlu1 %v800_v21, %s3986_s28  ;;  %v7651_v21 = vld [vmem:[#allocation35_spill] sm:$0xff] }
 0x26f   : > { %1227 = vrot.lane.b32.xlu0 %v796_v22, %s3986_s28  ;;  %v841_v47 = vrot.slane %v7651_v21, 7  ;;  %v5098_v22 = vpop.permute.xlu0 %701 }
 0x270   : > { %7653 = vst [vmem:[#allocation32_spill] sm:$0xff] %v5098_v22 }
 0x271   : > { %v843_v28 = vrot.slane %v841_v47, 4 }
 0x274   : > { %1231 = vrot.lane.b32.xlu2 %v803_v27, %s3986_s28  ;;  %v835_v27 = vsel %vm4191_vm2, %v3729_v60, %v834_v41  ;;  %v3731_v60 = vrot.slane %v7665_v58, 11 }
 0x276   : > { %v5055_v18 = vpop.permute.xlu2 %705  ;;  %1235 = vrot.lane.b32.xlu1 %v810_v23, %s3986_s28  ;;  %v842_v23 = vsel %vm4191_vm2, %v3730_v34, %v841_v47 }
 0x277   : > { %7640 = vst [vmem:[#allocation133_spill] sm:$0xff] %v5055_v18  ;;  %1233 = vrot.lane.b32.xlu0 %v807_v3, %s3986_s28  ;;  %v7655_v3 = vld [vmem:[#allocation10_spill] sm:$0xff] }
 0x278   : > { %v7407_v63 = vrot.slane %v7655_v3, 7 }
 0x27a   : > { %v885_v33 = vrot.slane %v7407_v63, 4 }
 0x27c   : > { %1237 = vrot.lane.b32.xlu2 %v814_v35, %s3986_s28  ;;  %v7658_v35 = vld [vmem:[#allocation28_spill] sm:$0xff]  ;;  %v887_v19 = vsel %vm4191_vm2, %v885_v33, %v886_v48  ;;  %v7669_v33 = vld [vmem:[#allocation43_spill] sm:$0xff] }
 0x27d   : > { %v862_v55 = vrot.slane %v7669_v33, 7  ;;  %v7670_v48 = vld [vmem:[#allocation44_spill] sm:$0xff] }
 0x27e   : > { %v5072_v42 = vpop.permute.xlu2 %711  ;;  %1241 = vrot.lane.b32.xlu1 %v821_v62, %s3986_s28  ;;  %v844_v62 = vrot.slane %v7658_v35, 7 }
 0x27f   : > { %7642 = vst [vmem:[#allocation135_spill] sm:$0xff] %v5072_v42  ;;  %1239 = vrot.lane.b32.xlu0 %v817_v25, %s3986_s28  ;;  %v7659_v25 = vld [vmem:[#allocation38_spill] sm:$0xff]  ;;  %v864_v33 = vrot.slane %v862_v55, 4 }
 0x280   : > { %v848_v10 = vrot.slane %v7659_v25, 7  ;;  %v845_v47 = vsel %vm4191_vm2, %v843_v28, %v844_v62  ;;  %v7667_v28 = vld [vmem:[#allocation41_spill] sm:$0xff] }
 0x281   : > { %v3732_v35 = vrot.slane %v7667_v28, 11 }
 0x282   : > { %v850_v11 = vrot.slane %v848_v10, 4  ;;  %v849_v1 = vsel %vm4191_vm2, %v3731_v60, %v848_v10 }
 0x284   : > { %1243 = vrot.lane.b32.xlu2 %v824_v20, %s3986_s28  ;;  %v7662_v20 = vld [vmem:[#allocation31_spill] sm:$0xff] }
 0x285   : > { %v851_v61 = vrot.slane %v7662_v20, 7 }
 0x286   : > { %v5086_v45 = vpop.permute.xlu2 %717  ;;  %1247 = vrot.lane.b32.xlu1 %v831_v44, %s3986_s28  ;;  %v892_v44 = vrot.slane %v7406_v2, 4 }
 0x287   : > { %7647 = vst [vmem:[#allocation23_spill] sm:$0xff] %v5086_v45  ;;  %1245 = vrot.lane.b32.xlu0 %v828_v54, %s3986_s28  ;;  %v7664_v54 = vld [vmem:[#allocation15_spill] sm:$0xff]  ;;  %v852_v34 = vsel %vm4191_vm2, %v850_v11, %v851_v61  ;;  %v3733_v11 = vrot.slane %v7670_v48, 11  ;;  %v7672_v61 = vld [vmem:[#allocation34_spill] sm:$0xff]  ;;  %v7675_v48 = vld [vmem:[#allocation37_spill] sm:$0xff] }
 0x288   : > { %v893_v41 = vrot.slane %v7664_v54, 7  ;;  %v858_v54 = vrot.slane %v7672_v61, 7  ;;  %v865_v61 = vrot.slane %v7675_v48, 7 }
 0x289   : > { %v863_v60 = vsel %vm4191_vm2, %v3733_v11, %v862_v55  ;;  %v7677_v11 = vld [vmem:[#allocation22_spill] sm:$0xff]  ;;  %v7681_v55 = vld [vmem:[#allocation47_spill] sm:$0xff] }
 0x28a   : > { %v894_v7 = vsel %vm4191_vm2, %v892_v44, %v893_v41  ;;  %v7673_v41 = vld [vmem:[#allocation19_spill] sm:$0xff] }
 0x28c   : > { %1249 = vrot.lane.b32.xlu2 %v835_v27, %s3986_s28  ;;  %v7666_v27 = vld [vmem:[#allocation17_spill] sm:$0xff] }
 0x28e   : > { %v5108_v52 = vpop.permute.xlu2 %723  ;;  %1253 = vrot.lane.b32.xlu1 %v842_v23, %s3986_s28  ;;  %v7405_v23 = vrot.slane %v7666_v27, 7 }
 0x28f   : > { %7657 = vst [vmem:[#allocation33_spill] sm:$0xff] %v5108_v52  ;;  %1251 = vrot.lane.b32.xlu0 %v838_v53, %s3986_s28  ;;  %v855_v53 = vrot.slane %v4550_v59, 7  ;;  %v900_v59 = vrot.slane %v7673_v41, 7  ;;  %v7676_v41 = vld [vmem:[#allocation46_spill] sm:$0xff] }
 0x290   : > { %v5119_v49 = vpop.permute.xlu1 %709  ;;  %v899_v44 = vrot.slane %v7405_v23, 4  ;;  %v869_v23 = vrot.slane %v7676_v41, 7  ;;  %v7682_v41 = vld [vmem:[#allocation49_spill] sm:$0xff] }
 0x291   : > { %7661 = vst [vmem:[#allocation35_spill] sm:$0xff] %v5119_v49  ;;  %v5122_v43 = vpop.permute.xlu0 %707  ;;  %v857_v10 = vrot.slane %v855_v53, 4  ;;  %v856_v58 = vsel %vm4191_vm2, %v3732_v35, %v855_v53  ;;  %v7701_v49 = vld [vmem:[#allocation48_spill] sm:$0xff] }
 0x292   : > { %7663 = vst [vmem:[#allocation36_spill] sm:$0xff] %v5122_v43  ;;  %v901_v53 = vsel %vm4191_vm2, %v899_v44, %v900_v59  ;;  %v871_v2 = vrot.slane %v869_v23, 4 }
 0x293   : > { %v859_v28 = vsel %vm4191_vm2, %v857_v10, %v858_v54  ;;  %v3734_v10 = vrot.slane %v7681_v55, 11  ;;  %v866_v54 = vsel %vm4191_vm2, %v864_v33, %v865_v61  ;;  %v7684_v33 = vld [vmem:[#allocation8_spill] sm:$0xff] }
 0x294   : > { %1255 = vrot.lane.b32.xlu2 %v845_v47, %s3986_s28  ;;  %v7674_v47 = vld [vmem:[#allocation20_spill] sm:$0xff]  ;;  %v3736_v61 = vrot.slane %v7684_v33, 11  ;;  %v7689_v33 = vld [vmem:[#allocation9_spill] sm:$0xff] }
 0x295   : > { %v870_v48 = vsel %vm4191_vm2, %v3734_v10, %v869_v23  ;;  %v7688_v23 = vrot.slane %v7655_v3, 7  ;;  %v7690_v3 = vrot.slane %v7656_v31, 7 }
 0x296   : > { %v5135_v36 = vpop.permute.xlu2 %1189  ;;  %1259 = vrot.lane.b32.xlu1 %v852_v34, %s3986_s28  ;;  %v904_v34 = vrot.slane %v7674_v47, 7 }
 0x297   : > { %1257 = vrot.lane.b32.xlu0 %v849_v1, %s3986_s28  ;;  %v884_v10 = vsel %vm4191_vm2, %v3736_v61, %v7688_v23  ;;  %v7691_v61 = vld [vmem:[#allocation12_spill] sm:$0xff] }
 0x298   : > { %v5146_v62 = vpop.permute.xlu1 %715  ;;  %v906_v35 = vrot.slane %v904_v34, 4 }
 0x299   : > { %7668 = vst [vmem:[#allocation25_spill] sm:$0xff] %v5146_v62  ;;  %v5150_v20 = vpop.permute.xlu0 %713 }
 0x29a   : > { %7671 = vst [vmem:[#allocation10_spill] sm:$0xff] %v5150_v20 }
 0x29c   : > { %1261 = vrot.lane.b32.xlu2 %v856_v58, %s3986_s28  ;;  %v907_v58 = vrot.slane %v7677_v11, 7  ;;  %v876_v11 = vrot.slane %v7682_v41, 7 }
 0x29e   : > { %v5162_v1 = vpop.permute.xlu2 %1195  ;;  %1265 = vrot.lane.b32.xlu1 %v863_v60, %s3986_s28  ;;  %v7679_v60 = vld [vmem:[#allocation40_spill] sm:$0xff]  ;;  %v908_v44 = vsel %vm4191_vm2, %v906_v35, %v907_v58  ;;  %v878_v58 = vrot.slane %v876_v11, 4 }
 0x29f   : > { %1263 = vrot.lane.b32.xlu0 %v859_v28, %s3986_s28  ;;  %v872_v63 = vrot.slane %v7679_v60, 7  ;;  %v7683_v60 = vld [vmem:[#allocation50_spill] sm:$0xff] }
 0x2a0   : > { %v5173_v47 = vpop.permute.xlu1 %721  ;;  %v3735_v55 = vrot.slane %v7683_v60, 11 }
 0x2a1   : > { %7678 = vst [vmem:[#allocation13_spill] sm:$0xff] %v5173_v47  ;;  %v5176_v62 = vpop.permute.xlu0 %719  ;;  %v873_v59 = vsel %vm4191_vm2, %v871_v2, %v872_v63  ;;  %v7687_v63 = vld [vmem:[#allocation42_spill] sm:$0xff] }
 0x2a2   : > { %7680 = vst [vmem:[#allocation28_spill] sm:$0xff] %v5176_v62  ;;  %v879_v2 = vrot.slane %v7687_v63, 7  ;;  %v3737_v63 = vrot.slane %v7689_v33, 11  ;;  %v3990_v33 = vmov 1983009808  }
 0x2a4   : > { %1267 = vrot.lane.b32.xlu2 %v866_v54, %s3986_s28  ;;  %v880_v41 = vsel %vm4191_vm2, %v878_v58, %v879_v2  ;;  %v7692_v58 = vld [vmem:[#allocation16_spill] sm:$0xff] }
 0x2a5   : > { %v3739_v2 = vrot.slane %v7692_v58, 11 }
 0x2a6   : > { %v1202_v28 = vpop.permute.xlu2 %1201  ;;  %1271 = vrot.lane.b32.xlu1 %v873_v59, %s3986_s28  ;;  %v877_v59 = vsel %vm4191_vm2, %v3735_v55, %v876_v11  ;;  %v891_v55 = vsel %vm4191_vm2, %v3737_v63, %v7690_v3  ;;  %v1593_v63 = vunpack.c.l.s4 %v3990_v33 }
 0x2a7   : > { %1269 = vrot.lane.b32.xlu0 %v870_v48, %s3986_s28  ;;  %v1618_v42 = vrot.slane %v1202_v28, 4  ;;  %v7697_v28 = vld [vmem:[#allocation55_spill] sm:$0xff] }
 0x2a8   : > { %v5193_v54 = vpop.permute.xlu1 %727 }
 0x2a9   : > { %7685 = vst [vmem:[#allocation38_spill] sm:$0xff] %v5193_v54  ;;  %v5195_v35 = vpop.permute.xlu0 %725 }
 0x2aa   : > { %7686 = vst [vmem:[#allocation11_spill] sm:$0xff] %v5195_v35 }
 0x2ac   : > { %1273 = vrot.lane.b32.xlu2 %v877_v59, %s3986_s28  ;;  %v3738_v59 = vrot.slane %v7691_v61, 11  ;;  %v905_v61 = vsel %vm4191_vm2, %v3739_v2, %v904_v34  ;;  %v7695_v2 = vld [vmem:[#allocation45_spill] sm:$0xff] }
 0x2ad   : > { %v914_v33 = vrot.slane %v7695_v2, 7  ;;  %v918_v2 = vrot.slane %v7697_v28, 7 }
 0x2ae   : > { %v5205_v48 = vpop.permute.xlu2 %1207  ;;  %1277 = vrot.lane.b32.xlu1 %v884_v10, %s3986_s28 }
 0x2af   : > { %1275 = vrot.lane.b32.xlu0 %v880_v41, %s3986_s28  ;;  %v920_v18 = vrot.slane %v918_v2, 4 }
 0x2b0   : > { %v1194_v60 = vpop.permute.xlu1 %1193 }
 0x2b1   : > { %v1192_v11 = vpop.permute.xlu0 %1191 }
 0x2b4   : > { %1279 = vrot.lane.b32.xlu2 %v887_v19, %s3986_s28  ;;  %v7693_v19 = vrot.slane %v7666_v27, 7  ;;  %v7694_v27 = vld [vmem:[#allocation52_spill] sm:$0xff] }
 0x2b6   : > { %v5218_v23 = vpop.permute.xlu2 %1213  ;;  %1283 = vrot.lane.b32.xlu1 %v894_v7, %s3986_s28  ;;  %v898_v31 = vsel %vm4191_vm2, %v3738_v59, %v7693_v19  ;;  %v911_v59 = vrot.slane %v7694_v27, 7 }
 0x2b7   : > { %1281 = vrot.lane.b32.xlu0 %v891_v55, %s3986_s28  ;;  %v5234_v55 = vunpack.c.0.s8 %v1593_v63 }
 0x2b8   : > { %v5223_v10 = vpop.permute.xlu1 %1199  ;;  %v913_v34 = vrot.slane %v911_v59, 4 }
 0x2b9   : > { %v1198_v41 = vpop.permute.xlu0 %1197 }
 0x2ba   : > { %v1589_v3 = vrot.slane %v1198_v41, 4 }
 0x2bc   : > { %1285 = vrot.lane.b32.xlu2 %v898_v31, %s3986_s28  ;;  %v1591_v7 = vsel %vm1590_vm9, %v1589_v3, %v5135_v36  ;;  %v7696_v36 = vld [vmem:[#allocation53_spill] sm:$0xff] }
 0x2bd   : > { %v1595_v41 = vperm.slane %v1591_v7, %v5234_v55  ;;  %v3740_v63 = vrot.slane %v7696_v36, 11  ;;  %v1619_v7 = vsel %vm1590_vm9, %v1618_v42, %v1192_v11 }
 0x2be   : > { %v5236_v58 = vpop.permute.xlu2 %1219  ;;  %1289 = vrot.lane.b32.xlu1 %v905_v61, %s3986_s28 }
 0x2bf   : > { %1287 = vrot.lane.b32.xlu0 %v901_v53, %s3986_s28  ;;  %v1604_v20 = vrot.slane %v1595_v41, 4  ;;  %v915_v53 = vsel %vm4191_vm2, %v913_v34, %v914_v33  ;;  %v7700_v33 = vld [vmem:[#allocation59_spill] sm:$0xff] }
 0x2c0   : > { %v1206_v19 = vpop.permute.xlu1 %1205  ;;  %v3742_v42 = vrot.slane %v7700_v33, 11 }
 0x2c1   : > { %v1596_v31 = vrot.slane %v1206_v19, 4  ;;  %v5243_v50 = vpop.permute.xlu0 %1203 }
 0x2c3   : > { %v1597_v3 = vsel %vm1590_vm9, %v1596_v31, %v1194_v60  ;;  %v912_v60 = vsel %vm4191_vm2, %v3740_v63, %v911_v59  ;;  %v7698_v31 = vld [vmem:[#allocation56_spill] sm:$0xff]  ;;  %v3991_v63 = vmov 1934713408  }
 0x2c4   : > { %v1601_v61 = vperm.slane %v1597_v3, %v5234_v55  ;;  %1291 = vrot.lane.b32.xlu2 %v908_v44, %s3986_s28  ;;  %v3741_v36 = vrot.slane %v7698_v31, 11  ;;  %v7699_v3 = vld [vmem:[#allocation58_spill] sm:$0xff]  ;;  %v1607_v28 = vunpack.c.l.s4 %v3991_v63 }
 0x2c5   : > { %v925_v34 = vrot.slane %v7699_v3, 7 }
 0x2c6   : > { %v1605_v27 = vsel %vm1590_vm9, %v1601_v61, %v1604_v20  ;;  %v5253_v19 = vpop.permute.xlu2 %1225  ;;  %1295 = vrot.lane.b32.xlu1 %v915_v53, %s3986_s28  ;;  %v1623_v20 = vperm.slane %v1619_v7, %v5234_v55  ;;  %v921_v53 = vrot.slane %v7701_v49, 7  ;;  %v1602_v43 = vrot.slane %v1601_v61, 4  ;;  %v7702_v49 = vld [vmem:[#allocation51_spill] sm:$0xff] }
 0x2c7   : > { %1293 = vrot.lane.b32.xlu0 %v912_v60, %s3986_s28  ;;  %v919_v59 = vsel %vm4191_vm2, %v3741_v36, %v918_v2  ;;  %v926_v7 = vsel %vm4191_vm2, %v3742_v42, %v925_v34  ;;  %v927_v33 = vrot.slane %v925_v34, 4  ;;  %v7703_v36 = vld [vmem:[#allocation61_spill] sm:$0xff]  ;;  %v5283_v42 = vunpack.c.0.s8 %v1607_v28 }
 0x2c8   : > { %v1212_v44 = vpop.permute.xlu1 %1211  ;;  %v1632_v31 = vrot.slane %v1623_v20, 4  ;;  %v922_v2 = vsel %vm4191_vm2, %v920_v18, %v921_v53  ;;  %v7705_v18 = vld [vmem:[#allocation62_spill] sm:$0xff] }
 0x2c9   : > { %v1210_v11 = vpop.permute.xlu0 %1209  ;;  %v3743_v53 = vrot.slane %v7705_v18, 11  ;;  %v7710_v18 = vld [vmem:[#allocation57_spill] sm:$0xff] }
 0x2ca   : > { %v1624_v13 = vrot.slane %v1210_v11, 4  ;;  %v928_v11 = vrot.slane %v7702_v49, 7  ;;  %v7704_v49 = vld [vmem:[#allocation54_spill] sm:$0xff] }
 0x2cb   : > { %v935_v26 = vrot.slane %v7704_v49, 7 }
 0x2cc   : > { %v1625_v60 = vsel %vm1590_vm9, %v1624_v13, %v5162_v1  ;;  %1297 = vrot.lane.b32.xlu2 %v919_v59, %s3986_s28  ;;  %v932_v13 = vrot.slane %v7703_v36, 7  ;;  %v1603_v1 = vsel %vm1590_vm9, %v1602_v43, %v1595_v41  ;;  %v2128_v41 = vrot.slane %v1212_v44, 4 }
 0x2cd   : > { %v1629_v3 = vperm.slane %v1625_v60, %v5234_v55  ;;  %v5293_v43 = vperm.slane %v1603_v1, %v5283_v42  ;;  %v929_v28 = vsel %vm4191_vm2, %v927_v33, %v928_v11  ;;  %v2094_v44 = vrot.slane %v5223_v10, 4  ;;  %v7709_v11 = vld [vmem:[#allocation65_spill] sm:$0xff] }
 0x2ce   : > { %v5274_v61 = vpop.permute.xlu2 %1231  ;;  %1301 = vrot.lane.b32.xlu1 %v926_v7, %s3986_s28  ;;  %v934_v60 = vrot.slane %v932_v13, 4  ;;  %v5319_v10 = vperm.slane %v1605_v27, %v5283_v42 }
 0x2cf   : > { %v1630_v59 = vrot.slane %v1629_v3, 4  ;;  %v1633_v63 = vsel %vm1590_vm9, %v1629_v3, %v1632_v31  ;;  %1299 = vrot.lane.b32.xlu0 %v922_v2, %s3986_s28  ;;  %7706 = vst [vmem:[#allocation31_spill] sm:$0xff] %v5293_v43  ;;  %v2100_v3 = vrot.slane %v5205_v48, 4  ;;  %v7708_v2 = vld [vmem:[#allocation64_spill] sm:$0xff]  ;;  %v933_v48 = vsel %vm4191_vm2, %v3743_v53, %v932_v13 }
 0x2d0   : > { %v5285_v34 = vpop.permute.xlu1 %1217  ;;  %v939_v36 = vrot.slane %v7708_v2, 7  ;;  %v936_v1 = vsel %vm4191_vm2, %v934_v60, %v935_v26  ;;  %v7712_v13 = vld [vmem:[#allocation68_spill] sm:$0xff]  ;;  %v5334_v27 = vperm.slane %v1633_v63, %v5283_v42  ;;  %v1616_v63 = vrot.slane %v5319_v10, 4 }
 0x2d1   : > { %v1631_v7 = vsel %vm1590_vm9, %v1630_v59, %v1623_v20  ;;  %v5289_v22 = vpop.permute.xlu0 %1215  ;;  %v2129_v59 = vsel %vm1590_vm9, %v2128_v41, %v7659_v25  ;;  %v2101_v26 = vsel %vm1590_vm9, %v2100_v3, %v7651_v21  ;;  %v2122_v25 = vrot.slane %v5243_v50, 4  ;;  %v7711_v41 = vld [vmem:[#allocation67_spill] sm:$0xff] }
 0x2d2   : > { %v5296_v31 = vperm.slane %v1631_v7, %v5283_v42  ;;  %v941_v33 = vrot.slane %v939_v36, 4  ;;  %v3744_v7 = vrot.slane %v7709_v11, 11  ;;  %v946_v2 = vrot.slane %v7711_v41, 7  ;;  %v7715_v20 = vld [vmem:[#allocation63_spill] sm:$0xff] }
 0x2d3   : > { %v3745_v53 = vrot.slane %v7712_v13, 11  ;;  %v956_v54 = vrot.slane %v7715_v20, 7  ;;  %v2095_v21 = vsel %vm1590_vm9, %v2094_v44, %v7643_v39  ;;  %v5337_v50 = vperm.slane %v2101_v26, %v5234_v55  ;;  %v7717_v44 = vld [vmem:[#allocation70_spill] sm:$0xff] }
 0x2d4   : > { %7707 = vst [vmem:[#allocation15_spill] sm:$0xff] %v5296_v31  ;;  %1303 = vrot.lane.b32.xlu2 %v929_v28, %s3986_s28  ;;  %v942_v28 = vrot.slane %v7710_v18, 7  ;;  %v7714_v18 = vld [vmem:[#allocation60_spill] sm:$0xff]  ;;  %v940_v3 = vsel %vm4191_vm2, %v3744_v7, %v939_v36  ;;  %v1614_v41 = vrot.slane %v5293_v43, 4  ;;  %v948_v13 = vrot.slane %v946_v2, 4 }
 0x2d5   : > { %7716 = vst [vmem:[#allocation17_spill] sm:$0xff] %v5337_v50  ;;  %v2123_v20 = vsel %vm1590_vm9, %v2122_v25, %v7649_v46  ;;  %v1642_v39 = vrot.slane %v5296_v31, 4  ;;  %v953_v26 = vrot.slane %v7717_v44, 7  ;;  %v2614_v25 = vshrl.u32 %v5334_v27, 16 }
 0x2d6   : > { %v1238_v49 = vpop.permute.xlu2 %1237  ;;  %1307 = vrot.lane.b32.xlu1 %v936_v1, %s3986_s28  ;;  %v5327_v1 = vperm.slane %v2129_v59, %v5234_v55  ;;  %v943_v59 = vsel %vm4191_vm2, %v941_v33, %v942_v28  ;;  %v947_v33 = vsel %vm4191_vm2, %v3745_v53, %v946_v2  ;;  %v2613_v28 = vshrl.u32 %v5319_v10, 16 }
 0x2d7   : > { %1305 = vrot.lane.b32.xlu0 %v933_v48, %s3986_s28  ;;  %v949_v48 = vrot.slane %v7714_v18, 7  ;;  %v5351_v18 = vperm.slane %v2095_v21, %v5234_v55  ;;  %v2106_v21 = vrot.slane %v5337_v50, 4  ;;  %v5366_v44 = vperm.slane %v2123_v20, %v5234_v55 }
 0x2d8   : > { %v5322_v60 = vpop.permute.xlu1 %1223  ;;  %7713 = vst [vmem:[#allocation39_spill] sm:$0xff] %v5327_v1  ;;  %v2134_v36 = vrot.slane %v5327_v1, 4  ;;  %v1652_v1 = vrot.slane %v1238_v49, 4  ;;  %v5370_v2 = vsel %vm1590_vm9, 0, %v1614_v41  ;;  %v5375_v46 = vpack.i.b16 %v2614_v25, %v2613_v28 }
 0x2d9   : > { %v1222_v11 = vpop.permute.xlu0 %1221  ;;  %7718 = vst [vmem:[#allocation41_spill] sm:$0xff] %v5351_v18  ;;  %v5378_v52 = vsel %vm1590_vm9, 0, %v1616_v63  ;;  %v955_v20 = vrot.slane %v953_v26, 4  ;;  %v2107_v28 = vsel %vm1590_vm9, %v2106_v21, %v5351_v18  ;;  %v950_v63 = vsel %vm4191_vm2, %v948_v13, %v949_v48  ;;  %v7729_v18 = vld [vmem:[#allocation66_spill] sm:$0xff] }
 0x2da   : > { %7719 = vst [vmem:[#allocation43_spill] sm:$0xff] %v5366_v44  ;;  %v2135_v49 = vsel %vm1590_vm9, %v2134_v36, %v5366_v44  ;;  %v1653_v25 = vsel %vm1590_vm9, %v1652_v1, %v1222_v11  ;;  %v2607_v36 = vshrl.u32 %v5370_v2, 16  ;;  %v5409_v1 = vperm.slane %v2107_v28, %v5283_v42 }
 0x2db   : > { %7720 = vst [vmem:[#allocation44_spill] sm:$0xff] %v5370_v2  ;;  %v5400_v44 = vperm.slane %v2135_v49, %v5283_v42  ;;  %v957_v21 = vsel %vm4191_vm2, %v955_v20, %v956_v54  ;;  %v2619_v54 = vshrl.u32 %v5378_v52, 16 }
 0x2dc   : > { %1309 = vrot.lane.b32.xlu2 %v940_v3, %s3986_s28  ;;  %v1644_v3 = vrot.slane %v5334_v27, 4  ;;  %7724 = vst [vmem:[#allocation20_spill] sm:$0xff] %v5409_v1 }
 0x2dd   : > { %7723 = vst [vmem:[#allocation19_spill] sm:$0xff] %v5400_v44 }
 0x2de   : > { %v5356_v7 = vpop.permute.xlu2 %1243  ;;  %1313 = vrot.lane.b32.xlu1 %v947_v33, %s3986_s28  ;;  %v5373_v33 = vsel %vm1590_vm9, 0, %v1642_v39  ;;  %v5381_v50 = vsel %vm1590_vm9, 0, %v1644_v3  ;;  %v7722_v39 = vld [vmem:[#allocation71_spill] sm:$0xff] }
 0x2df   : > { %1311 = vrot.lane.b32.xlu0 %v943_v59, %s3986_s28  ;;  %7721 = vst [vmem:[#allocation34_spill] sm:$0xff] %v5373_v33  ;;  %v3746_v35 = vrot.slane %v7722_v39, 11  ;;  %v2620_v20 = vshrl.u32 %v5381_v50, 16 }
 0x2e0   : > { %v1230_v53 = vpop.permute.xlu1 %1229 }
 0x2e1   : > { %v1646_v59 = vrot.slane %v1230_v53, 4  ;;  %v5385_v29 = vpop.permute.xlu0 %1227  ;;  %v2608_v53 = vshrl.u32 %v5373_v33, 16  ;;  %v954_v49 = vsel %vm4191_vm2, %v3746_v35, %v953_v26  ;;  %v7728_v26 = vld [vmem:[#allocation77_spill] sm:$0xff]  ;;  %v963_v33 = vrot.slane %v7729_v18, 7 }
 0x2e3   : > { %v1647_v3 = vsel %vm1590_vm9, %v1646_v59, %v5218_v23  ;;  %v5406_v48 = vpack.i.b16 %v2608_v53, %v2607_v36  ;;  %v1657_v23 = vperm.slane %v1653_v25, %v5234_v55  ;;  %v7725_v59 = vld [vmem:[#allocation73_spill] sm:$0xff]  ;;  %v7727_v53 = vld [vmem:[#allocation76_spill] sm:$0xff] }
 0x2e4   : > { %v1651_v39 = vperm.slane %v1647_v3, %v5234_v55  ;;  %1315 = vrot.lane.b32.xlu2 %v950_v63, %s3986_s28  ;;  %v960_v63 = vrot.slane %v7725_v59, 7  ;;  %v7726_v3 = vld [vmem:[#allocation74_spill] sm:$0xff]  ;;  %v3748_v35 = vrot.slane %v7727_v53, 11 }
 0x2e5   : > { %v3747_v41 = vrot.slane %v7726_v3, 11  ;;  %v5431_v3 = vpack.i.b16 %v2620_v20, %v2619_v54  ;;  %v7731_v20 = vld [vmem:[#allocation69_spill] sm:$0xff] }
 0x2e6   : > { %v1660_v11 = vrot.slane %v1651_v39, 4  ;;  %v5412_v13 = vpop.permute.xlu2 %1249  ;;  %1319 = vrot.lane.b32.xlu1 %v957_v21, %s3986_s28  ;;  %v967_v21 = vrot.slane %v7728_v26, 7  ;;  %v970_v26 = vrot.slane %v7731_v20, 7 }
 0x2e7   : > { %1317 = vrot.lane.b32.xlu0 %v954_v49, %s3986_s28  ;;  %v962_v49 = vrot.slane %v960_v63, 4 }
 0x2e8   : > { %v5423_v28 = vsel %vm1590_vm9, %v1657_v23, %v1660_v11  ;;  %v5425_v25 = vpop.permute.xlu1 %1235  ;;  %v961_v11 = vsel %vm4191_vm2, %v3747_v41, %v960_v63  ;;  %v968_v53 = vsel %vm4191_vm2, %v3748_v35, %v967_v21  ;;  %v969_v18 = vrot.slane %v967_v21, 4 }
 0x2e9   : > { %v1234_v59 = vpop.permute.xlu0 %1233  ;;  %v964_v54 = vsel %vm4191_vm2, %v962_v49, %v963_v33  ;;  %v1658_v49 = vrot.slane %v1657_v23, 4  ;;  %v2178_v4 = vrot.slane %v5425_v25, 4 }
 0x2ea   : > { %v1674_v2 = vrot.slane %v1234_v59, 4  ;;  %v7732_v59 = vld [vmem:[#allocation80_spill] sm:$0xff]  ;;  %v971_v21 = vsel %vm4191_vm2, %v969_v18, %v970_v26  ;;  %v7736_v18 = vld [vmem:[#allocation83_spill] sm:$0xff] }
 0x2eb   : > { %v974_v41 = vrot.slane %v7732_v59, 7  ;;  %v1659_v59 = vsel %vm1590_vm9, %v1658_v49, %v1651_v39  ;;  %v981_v26 = vrot.slane %v7736_v18, 7 }
 0x2ec   : > { %1321 = vrot.lane.b32.xlu2 %v961_v11, %s3986_s28  ;;  %v1675_v45 = vsel %vm1590_vm9, %v1674_v2, %v5285_v34  ;;  %v7733_v11 = vld [vmem:[#allocation72_spill] sm:$0xff] }
 0x2ed   : > { %v1679_v63 = vperm.slane %v1675_v45, %v5234_v55  ;;  %v976_v2 = vrot.slane %v974_v41, 4  ;;  %v977_v35 = vrot.slane %v7733_v11, 7 }
 0x2ee   : > { %v5441_v36 = vpop.permute.xlu2 %1255  ;;  %1325 = vrot.lane.b32.xlu1 %v968_v53, %s3986_s28  ;;  %v3749_v53 = vrot.slane %v7734_v0, 11 }
 0x2ef   : > { %7730 = vst [vmem:[#allocation37_spill] sm:$0xff] %v5441_v36  ;;  %1323 = vrot.lane.b32.xlu0 %v964_v54, %s3986_s28  ;;  %v1688_v20 = vrot.slane %v1679_v63, 4  ;;  %v978_v45 = vsel %vm4191_vm2, %v976_v2, %v977_v35 }
 0x2f0   : > { %v1242_v34 = vpop.permute.xlu1 %1241 }
 0x2f1   : > { %v1680_v47 = vrot.slane %v1242_v34, 4  ;;  %v1240_v62 = vpop.permute.xlu0 %1239 }
 0x2f3   : > { %v1681_v33 = vsel %vm1590_vm9, %v1680_v47, %v5253_v19  ;;  %v975_v47 = vsel %vm4191_vm2, %v3749_v53, %v974_v41  ;;  %v7735_v19 = vld [vmem:[#allocation82_spill] sm:$0xff]  ;;  %v2156_v41 = vrot.slane %v1240_v62, 4 }
 0x2f4   : > { %v1685_v54 = vperm.slane %v1681_v33, %v5234_v55  ;;  %1327 = vrot.lane.b32.xlu2 %v971_v21, %s3986_s28  ;;  %v3750_v23 = vrot.slane %v7735_v19, 11  ;;  %v7737_v33 = vld [vmem:[#allocation85_spill] sm:$0xff]  ;;  %v7739_v21 = vld [vmem:[#allocation86_spill] sm:$0xff]  ;;  %v7742_v19 = vld [vmem:[#allocation75_spill] sm:$0xff] }
 0x2f5   : > { %v3751_v2 = vrot.slane %v7737_v33, 11  ;;  %v988_v49 = vrot.slane %v7739_v21, 7  ;;  %v7744_v21 = vld [vmem:[#allocation89_spill] sm:$0xff]  ;;  %v2157_v62 = vsel %vm1590_vm9, %v2156_v41, %v5322_v60 }
 0x2f6   : > { %v1686_v34 = vrot.slane %v1685_v54, 4  ;;  %v1689_v0 = vsel %vm1590_vm9, %v1685_v54, %v1688_v20  ;;  %v5462_v11 = vpop.permute.xlu2 %1261  ;;  %1331 = vrot.lane.b32.xlu1 %v978_v45, %s3986_s28  ;;  %v5476_v20 = vperm.slane %v1659_v59, %v5283_v42  ;;  %v983_v45 = vrot.slane %v981_v26, 4 }
 0x2f7   : > { %1329 = vrot.lane.b32.xlu0 %v975_v47, %s3986_s28  ;;  %v984_v47 = vrot.slane %v7742_v19, 7  ;;  %v982_v18 = vsel %vm4191_vm2, %v3750_v23, %v981_v26  ;;  %v995_v59 = vrot.slane %v7744_v21, 7  ;;  %v989_v19 = vsel %vm4191_vm2, %v3751_v2, %v988_v49 }
 0x2f8   : > { %v1687_v39 = vsel %vm1590_vm9, %v1686_v34, %v1679_v63  ;;  %v5472_v35 = vpop.permute.xlu1 %1247  ;;  %7740 = vst [vmem:[#allocation22_spill] sm:$0xff] %v5476_v20  ;;  %v7743_v34 = vld [vmem:[#allocation78_spill] sm:$0xff]  ;;  %v7746_v23 = vpack.i.b16 %v5296_v31, %v5293_v43  ;;  %v990_v21 = vrot.slane %v988_v49, 4  ;;  %v2150_v2 = vrot.slane %v5274_v61, 4 }
 0x2f9   : > { %7738 = vst [vmem:[#allocation46_spill] sm:$0xff] %v5472_v35  ;;  %v5479_v54 = vperm.slane %v1687_v39, %v5283_v42  ;;  %v5481_v53 = vpop.permute.xlu0 %1245  ;;  %v991_v33 = vrot.slane %v7743_v34, 7  ;;  %v2184_v39 = vrot.slane %v5356_v7, 4  ;;  %v997_v32 = vrot.slane %v995_v59, 4 }
 0x2fa   : > { %7741 = vst [vmem:[#allocation40_spill] sm:$0xff] %v5481_v53  ;;  %v5500_v26 = vunpack.c.l.b16 %v7746_v23  ;;  %v985_v60 = vsel %vm4191_vm2, %v983_v45, %v984_v47  ;;  %v1669_v45 = vperm.slane %v5423_v28, %v5283_v42  ;;  %v7752_v47 = vld [vmem:[#allocation92_spill] sm:$0xff] }
 0x2fb   : > { %v2648_v63 = vpack.i.b16 %v5479_v54, %v5476_v20  ;;  %v2185_v49 = vsel %vm1590_vm9, %v2184_v39, %v5385_v29  ;;  %v1002_v61 = vrot.slane %v7752_v47, 7  ;;  %v992_v25 = vsel %vm4191_vm2, %v990_v21, %v991_v33 }
 0x2fc   : > { %1333 = vrot.lane.b32.xlu2 %v982_v18, %s3986_s28  ;;  %7747 = vst [vmem:[#allocation47_spill] sm:$0xff] %v5500_v26  ;;  %v5518_v18 = vperm.slane %v2157_v62, %v5234_v55  ;;  %v7755_v26 = vld [vmem:[#allocation91_spill] sm:$0xff]  ;;  %v999_v39 = vsel %vm4191_vm2, %v997_v32, %v998_v12  ;;  %v996_v62 = vsel %vm4191_vm2, %v3752_v14, %v995_v59  ;;  %v1698_v32 = vrot.slane %v5479_v54, 4 }
 0x2fd   : > { %v5502_v34 = vunpack.c.l.b16 %v2648_v63  ;;  %v3753_v29 = vrot.slane %v7755_v26, 11  ;;  %v1004_v28 = vrot.slane %v1002_v61, 4  ;;  %v2151_v47 = vsel %vm1590_vm9, %v2150_v2, %v5289_v22  ;;  %v7757_v22 = vld [vmem:[#allocation94_spill] sm:$0xff] }
 0x2fe   : > { %v5505_v7 = vpop.permute.xlu2 %1267  ;;  %1337 = vrot.lane.b32.xlu1 %v989_v19, %s3986_s28  ;;  %7750 = vst [vmem:[#allocation50_spill] sm:$0xff] %v5518_v18  ;;  %v7753_v19 = vld [vmem:[#allocation84_spill] sm:$0xff]  ;;  %v2179_v26 = vsel %vm1590_vm9, %v2178_v4, %v5236_v58  ;;  %v2162_v33 = vrot.slane %v5518_v18, 4  ;;  %v1672_v12 = vrot.slane %v1669_v45, 4  ;;  %v2661_v21 = vshrl.u32 %v1669_v45, 16 }
 0x2ff   : > { %7748 = vst [vmem:[#allocation49_spill] sm:$0xff] %v5502_v34  ;;  %1335 = vrot.lane.b32.xlu0 %v985_v60, %s3986_s28  ;;  %v1005_v23 = vrot.slane %v7753_v19, 7  ;;  %v1697_v60 = vperm.slane %v1689_v0, %v5283_v42  ;;  %v5539_v19 = vperm.slane %v2185_v49, %v5234_v55  ;;  %v1670_v0 = vrot.slane %v5476_v20, 4  ;;  %v7758_v49 = vld [vmem:[#allocation95_spill] sm:$0xff] }
 0x300   : > { %v5520_v63 = vpop.permute.xlu1 %1253  ;;  %v3754_v2 = vrot.slane %v7757_v22, 11  ;;  %v1009_v43 = vrot.slane %v7758_v49, 7  ;;  %v5550_v20 = vperm.slane %v2151_v47, %v5234_v55  ;;  %v7760_v58 = vpack.i.b16 %v5334_v27, %v5319_v10 }
 0x301   : > { %7751 = vst [vmem:[#allocation8_spill] sm:$0xff] %v5520_v63  ;;  %v5527_v41 = vpop.permute.xlu0 %1251  ;;  %v2660_v59 = vpack.i.b16 %v1697_v60, %v1669_v45  ;;  %v2662_v14 = vshrl.u32 %v1697_v60, 16  ;;  %v1700_v34 = vrot.slane %v1697_v60, 4  ;;  %v2190_v47 = vrot.slane %v5539_v19, 4 }
 0x302   : > { %7754 = vst [vmem:[#allocation42_spill] sm:$0xff] %v5527_v41  ;;  %v5556_v4 = vunpack.c.l.b16 %v7760_v58  ;;  %v5572_v10 = vsel %vm1590_vm9, 0, %v1698_v32  ;;  %v1673_v27 = vsel %vm1590_vm9, 0, %v1672_v12  ;;  %v1003_v32 = vsel %vm4191_vm2, %v3753_v29, %v1002_v61 }
 0x303   : > { %7756 = vst [vmem:[#allocation9_spill] sm:$0xff] %v5539_v19  ;;  %v5562_v45 = vunpack.c.l.b16 %v2660_v59  ;;  %v2663_v60 = vpack.i.b16 %v2662_v14, %v2661_v21  ;;  %v1701_v22 = vsel %vm1590_vm9, 0, %v1700_v34  ;;  %v3140_v14 = vunpack.c.l.b16 %v5375_v46  ;;  %v7769_v46 = vld [vmem:[#allocation90_spill] sm:$0xff] }
 0x304   : > { %1339 = vrot.lane.b32.xlu2 %v992_v25, %s3986_s28  ;;  %7759 = vst [vmem:[#allocation12_spill] sm:$0xff] %v5550_v20  ;;  %v5559_v25 = vperm.slane %v2179_v26, %v5234_v55  ;;  %v2666_v21 = vpack.i.b16 %v1701_v22, %v1673_v27  ;;  %v2656_v58 = vshrl.u32 %v5572_v10, 16  ;;  %v1019_v34 = vrot.slane %v7769_v46, 7 }
 0x305   : > { %7761 = vst [vmem:[#allocation16_spill] sm:$0xff] %v5556_v4  ;;  %v3141_v59 = vunpack.c.l.b16 %v2663_v60  ;;  %v1006_v61 = vsel %vm4191_vm2, %v1004_v28, %v1005_v23  ;;  %v1011_v4 = vrot.slane %v1009_v43, 4 }
 0x306   : > { %v1274_v31 = vpop.permute.xlu2 %1273  ;;  %1343 = vrot.lane.b32.xlu1 %v999_v39, %s3986_s28  ;;  %7762 = vst [vmem:[#allocation52_spill] sm:$0xff] %v5559_v25  ;;  %v5569_v39 = vsel %vm1590_vm9, 0, %v1670_v0  ;;  %v2191_v0 = vsel %vm1590_vm9, %v2190_v47, %v5559_v25  ;;  %v1010_v47 = vsel %vm4191_vm2, %v3754_v2, %v1009_v43  ;;  %v7774_v2 = vld [vmem:[#allocation98_spill] sm:$0xff]  ;;  %v3092_v43 = vunpack.c.l.b16 %v5406_v48 }
 0x307   : > { %1341 = vrot.lane.b32.xlu0 %v996_v62, %s3986_s28  ;;  %7763 = vst [vmem:[#allocation45_spill] sm:$0xff] %v5562_v45  ;;  %v2163_v62 = vsel %vm1590_vm9, %v2162_v33, %v5550_v20  ;;  %v2655_v12 = vshrl.u32 %v5569_v39, 16  ;;  %v7766_v33 = vld [vmem:[#allocation87_spill] sm:$0xff]  ;;  %v5593_v60 = vpack.c.b16 %v3141_v59, %v3140_v14  ;;  %v5601_v45 = vperm.slane %v2191_v0, %v5283_v42 }
 0x308   : > { %v5566_v49 = vpop.permute.xlu1 %1259  ;;  %v1012_v19 = vrot.slane %v7766_v33, 7  ;;  %v5590_v18 = vperm.slane %v2163_v62, %v5283_v42  ;;  %v7771_v62 = vpack.i.b16 %v5381_v50, %v5378_v52  ;;  %v5611_v14 = vunpack.c.l.b16 %v2666_v21  ;;  %v7775_v50 = vld [vmem:[#allocation97_spill] sm:$0xff] }
 0x309   : > { %7764 = vst [vmem:[#allocation53_spill] sm:$0xff] %v5566_v49  ;;  %v5577_v26 = vpop.permute.xlu0 %1257  ;;  %v2657_v29 = vpack.i.b16 %v2656_v58, %v2655_v12  ;;  %v1736_v46 = vrot.slane %v1274_v31, 4  ;;  %v2667_v12 = vshrl.u32 %v1673_v27, 16  ;;  %v2668_v58 = vshrl.u32 %v1701_v22, 16 }
 0x30a   : > { %7765 = vst [vmem:[#allocation55_spill] sm:$0xff] %v5577_v26  ;;  %v5609_v59 = vunpack.c.l.b16 %v7771_v62  ;;  %v2672_v52 = vpack.i.b16 %v5601_v45, %v5590_v18  ;;  %v3755_v21 = vrot.slane %v7775_v50, 11  ;;  %v1702_v48 = vrot.slane %v5462_v11, 4 }
 0x30b   : > { %7767 = vst [vmem:[#allocation56_spill] sm:$0xff] %v5590_v18  ;;  %v3093_v23 = vunpack.c.l.b16 %v2657_v29  ;;  %v1737_v27 = vsel %vm1590_vm9, %v1736_v46, %v5577_v26  ;;  %v1013_v50 = vsel %vm4191_vm2, %v1011_v4, %v1012_v19  ;;  %v3188_v11 = vunpack.c.l.b16 %v5431_v3  ;;  %v7783_v19 = vld [vmem:[#allocation96_spill] sm:$0xff]  ;;  %v7800_v18 = vld [vmem:[#allocation111_spill] sm:$0xff] }
 0x30c   : > { %1345 = vrot.lane.b32.xlu2 %v1003_v32, %s3986_s28  ;;  %7768 = vst [vmem:[#allocation58_spill] sm:$0xff] %v5593_v60  ;;  %v1016_v32 = vrot.slane %v7774_v2, 7  ;;  %v5626_v29 = vunpack.c.l.b16 %v2672_v52  ;;  %v1703_v4 = vsel %vm1590_vm9, %v1702_v48, %v5481_v53  ;;  %v3757_v48 = vrot.slane %v4795_v9, 11  ;;  %v7793_v60 = vld [vmem:[#allocation105_spill] sm:$0xff] }
 0x30d   : > { %7770 = vst [vmem:[#allocation59_spill] sm:$0xff] %v5601_v45  ;;  %v5623_v31 = vpack.c.b16 %v3093_v23, %v3092_v43 }
 0x30e   : > { %v5603_v33 = vpop.permute.xlu2 %1279  ;;  %1349 = vrot.lane.b32.xlu1 %v1010_v47, %s3986_s28  ;;  %7772 = vst [vmem:[#allocation48_spill] sm:$0xff] %v5609_v59  ;;  %v1018_v47 = vrot.slane %v1016_v32, 4 }
 0x30f   : > { %7773 = vst [vmem:[#allocation51_spill] sm:$0xff] %v5611_v14  ;;  %1347 = vrot.lane.b32.xlu0 %v1006_v61, %s3986_s28  ;;  %v2669_v61 = vpack.i.b16 %v2668_v58, %v2667_v12  ;;  %v1017_v12 = vsel %vm4191_vm2, %v3755_v21, %v1016_v32  ;;  %v1741_v58 = vperm.slane %v1737_v27, %v5234_v55  ;;  %v1030_v27 = vrot.slane %v4797_v5, 7 }
 0x310   : > { %v1266_v28 = vpop.permute.xlu1 %1265  ;;  %7776 = vst [vmem:[#allocation61_spill] sm:$0xff] %v5623_v31  ;;  %v1020_v46 = vsel %vm4191_vm2, %v1018_v47, %v1019_v34  ;;  %v1023_v47 = vrot.slane %v4786_v56, 7  ;;  %v3762_v31 = vrot.slane %v7793_v60, 11 }
 0x311   : > { %v1730_v62 = vrot.slane %v1266_v28, 4  ;;  %v5621_v2 = vpop.permute.xlu0 %1263  ;;  %7777 = vst [vmem:[#allocation54_spill] sm:$0xff] %v5626_v29  ;;  %v7778_v28 = vpack.i.b16 %v5400_v44, %v5409_v1  ;;  %v3189_v23 = vunpack.c.l.b16 %v2669_v61  ;;  %v7781_v61 = vld [vmem:[#allocation100_spill] sm:$0xff]  ;;  %v1031_v5 = vsel %vm4191_vm2, %v3757_v48, %v1030_v27 }
 0x312   : > { %v3756_v34 = vrot.slane %v7781_v61, 11  ;;  %v3758_v29 = vrot.slane %v4806_v6, 11  ;;  %v1044_v6 = vrot.slane %v4820_v16, 7  ;;  %v2234_v16 = vrot.slane %v5505_v7, 4 }
 0x313   : > { %v1731_v22 = vsel %vm1590_vm9, %v1730_v62, %v5412_v13  ;;  %v5637_v0 = vunpack.c.l.b16 %v7778_v28  ;;  %v5654_v3 = vpack.c.b16 %v3189_v23, %v3188_v11  ;;  %v1025_v28 = vrot.slane %v1023_v47, 4 }
 0x314   : > { %v1735_v43 = vperm.slane %v1731_v22, %v5234_v55  ;;  %1351 = vrot.lane.b32.xlu2 %v1013_v50, %s3986_s28  ;;  %v1707_v22 = vperm.slane %v1703_v4, %v5234_v55  ;;  %v1024_v61 = vsel %vm4191_vm2, %v3756_v34, %v1023_v47  ;;  %v1032_v4 = vrot.slane %v1030_v27, 4 }
 0x315   : > { %7779 = vst [vmem:[#allocation62_spill] sm:$0xff] %v5637_v0  ;;  %v1033_v0 = vrot.slane %v7783_v19, 7  ;;  %v1037_v47 = vrot.slane %v4808_v8, 7  ;;  %v7784_v19 = vld [vmem:[#allocation99_spill] sm:$0xff]  ;;  %v2206_v7 = vrot.slane %v5621_v2, 4  ;;  %v2235_v2 = vsel %vm1590_vm9, %v2234_v16, %v5527_v41 }
 0x316   : > { %v1744_v52 = vrot.slane %v1735_v43, 4  ;;  %v5651_v62 = vpop.permute.xlu2 %1285  ;;  %1355 = vrot.lane.b32.xlu1 %v1020_v46, %s3986_s28  ;;  %7780 = vst [vmem:[#allocation64_spill] sm:$0xff] %v5654_v3  ;;  %v7782_v46 = vld [vmem:[#allocation93_spill] sm:$0xff] }
 0x317   : > { %1353 = vrot.lane.b32.xlu0 %v1017_v12, %s3986_s28  ;;  %v1026_v11 = vrot.slane %v7782_v46, 7  ;;  %v1716_v12 = vrot.slane %v1707_v22, 4  ;;  %v1039_v27 = vrot.slane %v1037_v47, 4 }
 0x318   : > { %v1745_v32 = vsel %vm1590_vm9, %v1741_v58, %v1744_v52  ;;  %v1272_v21 = vpop.permute.xlu1 %1271  ;;  %v1742_v52 = vrot.slane %v1741_v58, 4 }
 0x319   : > { %v1270_v50 = vpop.permute.xlu0 %1269  ;;  %v1027_v34 = vsel %vm4191_vm2, %v1025_v28, %v1026_v11  ;;  %v1034_v11 = vsel %vm4191_vm2, %v1032_v4, %v1033_v0  ;;  %v1038_v0 = vsel %vm4191_vm2, %v3758_v29, %v1037_v47  ;;  %v7785_v4 = vld [vmem:[#allocation101_spill] sm:$0xff]  ;;  %v3760_v29 = vrot.slane %v4830_v24, 11 }
 0x31a   : > { %v1708_v23 = vrot.slane %v1270_v50, 4  ;;  %v1743_v50 = vsel %vm1590_vm9, %v1742_v52, %v1735_v43 }
 0x31b   : > { %v5688_v28 = vperm.slane %v1743_v50, %v5283_v42  ;;  %v1047_v50 = vrot.slane %v7785_v4, 7 }
 0x31c   : > { %v1709_v56 = vsel %vm1590_vm9, %v1708_v23, %v5520_v63  ;;  %1357 = vrot.lane.b32.xlu2 %v1024_v61, %s3986_s28  ;;  %v1040_v61 = vrot.slane %v7784_v19, 7  ;;  %v7810_v63 = vld [vmem:[#allocation120_spill] sm:$0xff] }
 0x31d   : > { %v1713_v9 = vperm.slane %v1709_v56, %v5234_v55 }
 0x31e   : > { %v5673_v46 = vpop.permute.xlu2 %1291  ;;  %1361 = vrot.lane.b32.xlu1 %v1031_v5, %s3986_s28 }
 0x31f   : > { %v1714_v58 = vrot.slane %v1713_v9, 4  ;;  %v1717_v23 = vsel %vm1590_vm9, %v1713_v9, %v1716_v12  ;;  %1359 = vrot.lane.b32.xlu0 %v1027_v34, %s3986_s28  ;;  %v2212_v12 = vrot.slane %v1272_v21, 4  ;;  %v3759_v21 = vrot.slane %v4818_v38, 11 }
 0x320   : > { %v5682_v48 = vpop.permute.xlu1 %1277  ;;  %v1051_v38 = vrot.slane %v4832_v17, 7 }
 0x321   : > { %v1715_v56 = vsel %vm1590_vm9, %v1714_v58, %v1707_v22  ;;  %v1276_v5 = vpop.permute.xlu0 %1275  ;;  %v1041_v22 = vsel %vm4191_vm2, %v1039_v27, %v1040_v61  ;;  %v1754_v58 = vrot.slane %v5688_v28, 4  ;;  %v1046_v27 = vrot.slane %v1044_v6, 4 }
 0x322   : > { %v5691_v8 = vperm.slane %v1715_v56, %v5283_v42  ;;  %v2240_v43 = vrot.slane %v1276_v5, 4  ;;  %v2213_v19 = vsel %vm1590_vm9, %v2212_v12, %v5441_v36  ;;  %v5718_v56 = vperm.slane %v1745_v32, %v5283_v42 }
 0x323   : > { %v5733_v12 = vperm.slane %v2213_v19, %v5234_v55  ;;  %v1045_v24 = vsel %vm4191_vm2, %v3759_v21, %v1044_v6  ;;  %v5741_v32 = vsel %vm1590_vm9, 0, %v1754_v58  ;;  %v1053_v4 = vrot.slane %v1051_v38, 4 }
 0x324   : > { %1363 = vrot.lane.b32.xlu2 %v1034_v11, %s3986_s28  ;;  %v2241_v9 = vsel %vm1590_vm9, %v2240_v43, %v5566_v49  ;;  %v1726_v43 = vrot.slane %v5691_v8, 4  ;;  %v5730_v11 = vperm.slane %v1717_v23, %v5283_v42  ;;  %v1052_v21 = vsel %vm4191_vm2, %v3760_v29, %v1051_v38 }
 0x325   : > { %v5723_v47 = vperm.slane %v2241_v9, %v5234_v55  ;;  %7787 = vst [vmem:[#allocation57_spill] sm:$0xff] %v5733_v12  ;;  %v1048_v58 = vsel %vm4191_vm2, %v1046_v27, %v1047_v50  ;;  %v2207_v19 = vsel %vm1590_vm9, %v2206_v7, %v5472_v35  ;;  %v1058_v23 = vrot.slane %v4842_v57, 7 }
 0x326   : > { %v5703_v34 = vpop.permute.xlu2 %1297  ;;  %1367 = vrot.lane.b32.xlu1 %v1041_v22, %s3986_s28  ;;  %v5738_v17 = vsel %vm1590_vm9, 0, %v1726_v43  ;;  %v7788_v22 = vld [vmem:[#allocation102_spill] sm:$0xff]  ;;  %v5766_v29 = vperm.slane %v2235_v2, %v5234_v55  ;;  %v2218_v50 = vrot.slane %v5733_v12, 4  ;;  %v1728_v27 = vrot.slane %v5730_v11, 4 }
 0x327   : > { %1365 = vrot.lane.b32.xlu0 %v1038_v0, %s3986_s28  ;;  %7786 = vst [vmem:[#allocation65_spill] sm:$0xff] %v5723_v47  ;;  %v1054_v9 = vrot.slane %v7788_v22, 7  ;;  %v1756_v0 = vrot.slane %v5718_v56, 4  ;;  %v2246_v6 = vrot.slane %v5723_v47, 4  ;;  %v2710_v22 = vshrl.u32 %v5718_v56, 16 }
 0x328   : > { %v5715_v61 = vpop.permute.xlu1 %1283  ;;  %7789 = vst [vmem:[#allocation67_spill] sm:$0xff] %v5766_v29  ;;  %v1061_v38 = vrot.slane %v4812_v30, 7  ;;  %v1060_v52 = vrot.slane %v1058_v23, 4  ;;  %v5780_v57 = vperm.slane %v2207_v19, %v5234_v55  ;;  %v3761_v30 = vrot.slane %v4840_v37, 11 }
 0x329   : > { %v5725_v5 = vpop.permute.xlu0 %1281  ;;  %v5777_v43 = vsel %vm1590_vm9, 0, %v1756_v0  ;;  %v2247_v2 = vsel %vm1590_vm9, %v2246_v6, %v5766_v29  ;;  %v2703_v0 = vshrl.u32 %v5738_v17, 16  ;;  %v3764_v12 = vrot.slane %v7800_v18, 11 }
 0x32a   : > { %7790 = vst [vmem:[#allocation68_spill] sm:$0xff] %v5780_v57  ;;  %v2219_v19 = vsel %vm1590_vm9, %v2218_v50, %v5780_v57  ;;  %v5801_v14 = vperm.slane %v2247_v2, %v5283_v42  ;;  %v1059_v2 = vsel %vm4191_vm2, %v3761_v30, %v1058_v23  ;;  %v7798_v23 = vld [vmem:[#allocation112_spill] sm:$0xff]  ;;  %v7803_v57 = vld [vmem:[#allocation115_spill] sm:$0xff] }
 0x32b   : > { %v5811_v50 = vperm.slane %v2219_v19, %v5283_v42  ;;  %v7796_v19 = vld [vmem:[#allocation109_spill] sm:$0xff]  ;;  %v1079_v30 = vrot.slane %v7798_v23, 7 }
 0x32c   : > { %1369 = vrot.lane.b32.xlu2 %v1045_v24, %s3986_s28  ;;  %v2709_v24 = vshrl.u32 %v5730_v11, 16  ;;  %7791 = vst [vmem:[#allocation60_spill] sm:$0xff] %v5801_v14 }
 0x32d   : > { %7792 = vst [vmem:[#allocation63_spill] sm:$0xff] %v5811_v50 }
 0x32e   : > { %v5757_v16 = vpop.permute.xlu2 %1303  ;;  %1373 = vrot.lane.b32.xlu1 %v1052_v21, %s3986_s28  ;;  %v5774_v21 = vpack.i.b16 %v2710_v22, %v2709_v24  ;;  %v1055_v24 = vsel %vm4191_vm2, %v1053_v4, %v1054_v9  ;;  %v2704_v22 = vshrl.u32 %v5741_v32, 16  ;;  %v1062_v9 = vsel %vm4191_vm2, %v1060_v52, %v1061_v38  ;;  %v7795_v52 = vld [vmem:[#allocation108_spill] sm:$0xff] }
 0x32f   : > { %1371 = vrot.lane.b32.xlu0 %v1048_v58, %s3986_s28  ;;  %v5787_v58 = vsel %vm1590_vm9, 0, %v1728_v27  ;;  %v2716_v27 = vshrl.u32 %v5777_v43, 16  ;;  %v3763_v38 = vrot.slane %v7795_v52, 11  ;;  %v1081_v52 = vrot.slane %v1079_v30, 4 }
 0x330   : > { %v5772_v7 = vpop.permute.xlu1 %1289  ;;  %v2715_v59 = vshrl.u32 %v5787_v58, 16  ;;  %v5804_v37 = vpack.i.b16 %v2704_v22, %v2703_v0 }
 0x331   : > { %v5784_v3 = vpop.permute.xlu0 %1287 }
 0x332   : > { %v5808_v4 = vpack.i.b16 %v2716_v27, %v2715_v59  ;;  %v1072_v27 = vrot.slane %v7796_v19, 7  ;;  %v7801_v59 = vld [vmem:[#allocation107_spill] sm:$0xff] }
 0x333   : > { %v1082_v19 = vrot.slane %v7801_v59, 7  ;;  %v7805_v59 = vld [vmem:[#allocation113_spill] sm:$0xff] }
 0x334   : > { %1375 = vrot.lane.b32.xlu2 %v1055_v24, %s3986_s28  ;;  %v7794_v24 = vld [vmem:[#allocation106_spill] sm:$0xff]  ;;  %v1096_v29 = vrot.slane %v7805_v59, 7 }
 0x335   : > { %v1065_v0 = vrot.slane %v7794_v24, 7  ;;  %v1074_v24 = vrot.slane %v1072_v27, 4 }
 0x336   : > { %v5813_v6 = vpop.permute.xlu2 %1309  ;;  %1379 = vrot.lane.b32.xlu1 %v1062_v9, %s3986_s28  ;;  %v7797_v9 = vld [vmem:[#allocation103_spill] sm:$0xff] }
 0x337   : > { %1377 = vrot.lane.b32.xlu0 %v1059_v2, %s3986_s28  ;;  %v1067_v25 = vrot.slane %v1065_v0, 4  ;;  %v1068_v1 = vrot.slane %v7797_v9, 7  ;;  %v1066_v60 = vsel %vm4191_vm2, %v3762_v31, %v1065_v0  ;;  %v7799_v2 = vld [vmem:[#allocation104_spill] sm:$0xff]  ;;  %v7802_v9 = vld [vmem:[#allocation114_spill] sm:$0xff]  ;;  %v1086_v31 = vrot.slane %v7803_v57, 7 }
 0x338   : > { %v1296_v22 = vpop.permute.xlu1 %1295  ;;  %v1075_v44 = vrot.slane %v7799_v2, 7  ;;  %v3765_v23 = vrot.slane %v7802_v9, 11 }
 0x339   : > { %v1294_v20 = vpop.permute.xlu0 %1293  ;;  %v1069_v18 = vsel %vm4191_vm2, %v1067_v25, %v1068_v1  ;;  %v1080_v1 = vsel %vm4191_vm2, %v3764_v12, %v1079_v30  ;;  %v1088_v25 = vrot.slane %v1086_v31, 4  ;;  %v2262_v9 = vrot.slane %v1296_v22, 4 }
 0x33a   : > { %v1758_v45 = vrot.slane %v1294_v20, 4  ;;  %v1073_v20 = vsel %vm4191_vm2, %v3763_v38, %v1072_v27  ;;  %v1087_v41 = vsel %vm4191_vm2, %v3765_v23, %v1086_v31  ;;  %v1100_v12 = vrot.slane %v7810_v63, 7  ;;  %v7812_v31 = vld [vmem:[#allocation123_spill] sm:$0xff] }
 0x33b   : > { %v2263_v63 = vsel %vm1590_vm9, %v2262_v9, %v5603_v33  ;;  %v7814_v33 = vld [vmem:[#allocation124_spill] sm:$0xff] }
 0x33c   : > { %1381 = vrot.lane.b32.xlu2 %v1066_v60, %s3986_s28  ;;  %v1759_v47 = vsel %vm1590_vm9, %v1758_v45, %v5682_v48  ;;  %v7804_v60 = vld [vmem:[#allocation110_spill] sm:$0xff]  ;;  %v2268_v45 = vrot.slane %v5757_v16, 4  ;;  %v7806_v48 = vld [vmem:[#allocation116_spill] sm:$0xff]  ;;  %v1083_v16 = vsel %vm4191_vm2, %v1081_v52, %v1082_v19  ;;  %v7811_v19 = vld [vmem:[#allocation119_spill] sm:$0xff]  ;;  %v1102_v23 = vrot.slane %v1100_v12, 4 }
 0x33d   : > { %v1089_v2 = vrot.slane %v7804_v60, 7  ;;  %v1103_v38 = vrot.slane %v7806_v48, 7  ;;  %v5850_v27 = vperm.slane %v1759_v47, %v5234_v55  ;;  %v7808_v48 = vld [vmem:[#allocation121_spill] sm:$0xff]  ;;  %v1786_v47 = vrot.slane %v5703_v34, 4 }
 0x33e   : > { %v5839_v0 = vpop.permute.xlu2 %1315  ;;  %1385 = vrot.lane.b32.xlu1 %v1073_v20, %s3986_s28  ;;  %v1076_v20 = vsel %vm4191_vm2, %v1074_v24, %v1075_v44  ;;  %v1110_v49 = vrot.slane %v7808_v48, 7  ;;  %v7809_v44 = vld [vmem:[#allocation117_spill] sm:$0xff]  ;;  %v2269_v22 = vsel %vm1590_vm9, %v2268_v45, %v5784_v3  ;;  %v1107_v48 = vrot.slane %v7812_v31, 7  ;;  %v7813_v45 = vld [vmem:[#allocation122_spill] sm:$0xff] }
 0x33f   : > { %1383 = vrot.lane.b32.xlu0 %v1069_v18, %s3986_s28  ;;  %v7807_v18 = vld [vmem:[#allocation118_spill] sm:$0xff]  ;;  %v3766_v24 = vrot.slane %v7809_v44, 11  ;;  %v1090_v3 = vsel %vm4191_vm2, %v1088_v25, %v1089_v2  ;;  %v5882_v44 = vperm.slane %v2269_v22, %v5234_v55  ;;  %v1117_v9 = vrot.slane %v7814_v33, 7 }
 0x340   : > { %v1302_v57 = vpop.permute.xlu1 %1301  ;;  %v1093_v26 = vrot.slane %v7807_v18, 7  ;;  %v1772_v18 = vrot.slane %v5850_v27, 4 }
 0x341   : > { %v1764_v60 = vrot.slane %v1302_v57, 4  ;;  %v1300_v59 = vpop.permute.xlu0 %1299  ;;  %v3767_v57 = vrot.slane %v7811_v19, 11  ;;  %v1109_v19 = vrot.slane %v1107_v48, 4 }
 0x342   : > { %v1095_v52 = vrot.slane %v1093_v26, 4  ;;  %v2290_v31 = vrot.slane %v1300_v59, 4  ;;  %v1094_v2 = vsel %vm4191_vm2, %v3766_v24, %v1093_v26  ;;  %v1104_v26 = vsel %vm4191_vm2, %v1102_v23, %v1103_v38  ;;  %v7816_v24 = vld [vmem:[#allocation130_spill] sm:$0xff]  ;;  %v7818_v23 = vld [vmem:[#allocation125_spill] sm:$0xff] }
 0x343   : > { %v1765_v30 = vsel %vm1590_vm9, %v1764_v60, %v5651_v62  ;;  %v3768_v62 = vrot.slane %v7813_v45, 11  ;;  %v1787_v60 = vsel %vm1590_vm9, %v1786_v47, %v5725_v5  ;;  %v7815_v5 = vld [vmem:[#allocation127_spill] sm:$0xff]  ;;  %v2267_v47 = vperm.slane %v2263_v63, %v5234_v55 }
 0x344   : > { %v1769_v34 = vperm.slane %v1765_v30, %v5234_v55  ;;  %1387 = vrot.lane.b32.xlu2 %v1076_v20, %s3986_s28  ;;  %v1791_v45 = vperm.slane %v1787_v60, %v5234_v55  ;;  %v2274_v63 = vrot.slane %v5882_v44, 4  ;;  %v5918_v38 = vsel %vm4191_vm2, %v1109_v19, %v1110_v49  ;;  %v7819_v49 = vld [vmem:[#allocation128_spill] sm:$0xff] }
 0x345   : > { %v3769_v60 = vrot.slane %v7818_v23, 11  ;;  %v3770_v19 = vrot.slane %v7819_v49, 11 }
 0x346   : > { %v5885_v30 = vsel %vm1590_vm9, %v1769_v34, %v1772_v18  ;;  %v5887_v20 = vpop.permute.xlu2 %1321  ;;  %1391 = vrot.lane.b32.xlu1 %v1083_v16, %s3986_s28  ;;  %v1097_v18 = vsel %vm4191_vm2, %v1095_v52, %v1096_v29  ;;  %v5900_v16 = vsel %vm4191_vm2, %v3767_v57, %v1100_v12  ;;  %v1770_v59 = vrot.slane %v1769_v34, 4  ;;  %v7817_v52 = vld [vmem:[#allocation126_spill] sm:$0xff] }
 0x347   : > { %1389 = vrot.lane.b32.xlu0 %v1080_v1, %s3986_s28  ;;  %v5909_v29 = vsel %vm4191_vm2, %v3768_v62, %v1107_v48  ;;  %v1114_v12 = vrot.slane %v7817_v52, 7  ;;  %v2291_v57 = vsel %vm1590_vm9, %v2290_v31, %v5715_v61  ;;  %v1800_v61 = vrot.slane %v1791_v45, 4 }
 0x348   : > { %v1308_v22 = vpop.permute.xlu1 %1307 }
 0x349   : > { %v2296_v33 = vrot.slane %v1308_v22, 4  ;;  %v1306_v1 = vpop.permute.xlu0 %1305  ;;  %v2275_v22 = vsel %vm1590_vm9, %v2274_v63, %v2267_v47  ;;  %v1116_v62 = vrot.slane %v1114_v12, 4  ;;  %v2295_v63 = vperm.slane %v2291_v57, %v5234_v55 }
 0x34a   : > { %v1792_v53 = vrot.slane %v1306_v1, 4  ;;  %v1115_v57 = vsel %vm4191_vm2, %v3769_v60, %v1114_v12 }
 0x34b   : > { %v2297_v34 = vsel %vm1590_vm9, %v2296_v33, %v5673_v46  ;;  %v1771_v46 = vsel %vm1590_vm9, %v1770_v59, %v5850_v27  ;;  %v7820_v33 = vld [vmem:[#allocation129_spill] sm:$0xff] }
 0x34c   : > { %v2301_v1 = vperm.slane %v2297_v34, %v5234_v55  ;;  %v1793_v48 = vsel %vm1590_vm9, %v1792_v53, %v5772_v7  ;;  %1393 = vrot.lane.b32.xlu2 %v1087_v41, %s3986_s28  ;;  %v1121_v52 = vrot.slane %v7820_v33, 7  ;;  %v5934_v53 = vperm.slane %v2275_v22, %v5283_v42 }
 0x34d   : > { %v1797_v31 = vperm.slane %v1793_v48, %v5234_v55  ;;  %v1777_v59 = vperm.slane %v1771_v46, %v5283_v42  ;;  %v2276_v22 = vrot.slane %v2267_v47, 4  ;;  %v7822_v47 = vld [vmem:[#allocation131_spill] sm:$0xff] }
 0x34e   : > { %v2302_v23 = vrot.slane %v2301_v1, 4  ;;  %v1328_v34 = vpop.permute.xlu2 %1327  ;;  %1397 = vrot.lane.b32.xlu1 %v1094_v2, %s3986_s28  ;;  %v1123_v27 = vrot.slane %v1121_v52, 4  ;;  %v7821_v2 = vld [vmem:[#allocation132_spill] sm:$0xff]  ;;  %v5959_v12 = vsel %vm4191_vm2, %v3770_v19, %v1121_v52  ;;  %v3771_v60 = vrot.slane %v7822_v47, 11 }
 0x34f   : > { %v1798_v41 = vrot.slane %v1797_v31, 4  ;;  %v1801_v7 = vsel %vm1590_vm9, %v1797_v31, %v1800_v61  ;;  %v2318_v25 = vrot.slane %v1328_v34, 4  ;;  %1395 = vrot.lane.b32.xlu0 %v1090_v3, %s3986_s28  ;;  %v1128_v33 = vrot.slane %v7821_v2, 7 }
 0x350   : > { %v2303_v48 = vsel %vm1590_vm9, %v2302_v23, %v2295_v63  ;;  %v5940_v49 = vpop.permute.xlu1 %1313  ;;  %v5955_v23 = vsel %vm4191_vm2, %v1116_v62, %v1117_v9  ;;  %v2277_v9 = vsel %vm1590_vm9, %v5882_v44, %v2276_v22  ;;  %v7823_v62 = vrot.slane %v7815_v5, 7 }
 0x351   : > { %v5946_v35 = vperm.slane %v2303_v48, %v5283_v42  ;;  %v1799_v61 = vsel %vm1590_vm9, %v1798_v41, %v1791_v45  ;;  %v1312_v31 = vpop.permute.xlu0 %1311  ;;  %v1130_v34 = vrot.slane %v1128_v33, 4  ;;  %v2304_v48 = vrot.slane %v2295_v63, 4 }
 0x352   : > { %v1805_v3 = vperm.slane %v1799_v61, %v5283_v42  ;;  %v5951_v46 = vsel %vm1590_vm9, %v2318_v25, %v1312_v31  ;;  %v2769_v45 = vshrl.u32 %v5934_v53, 16  ;;  %v2745_v41 = vshrl.u32 %v1777_v59, 16 }
 0x353   : > { %v2770_v61 = vshrl.u32 %v5946_v35, 16  ;;  %v5971_v19 = vsel %vm4191_vm2, %v1123_v27, %v7823_v62  ;;  %v7824_v52 = vpack.i.b16 %v5688_v28, %v5691_v8  ;;  %v2305_v31 = vsel %vm1590_vm9, %v2301_v1, %v2304_v48 }
 0x354   : > { %1399 = vrot.lane.b32.xlu2 %v1097_v18, %s3986_s28  ;;  %v2746_v2 = vshrl.u32 %v1805_v3, 16  ;;  %v2744_v25 = vpack.i.b16 %v1805_v3, %v1777_v59  ;;  %v2286_v18 = vrot.slane %v5934_v53, 4  ;;  %v5992_v22 = vsel %vm4191_vm2, %v3771_v60, %v1128_v33 }
 0x355   : > { %v5976_v63 = vunpack.c.l.b16 %v7824_v52  ;;  %v5985_v5 = vpack.i.b16 %v2770_v61, %v2769_v45  ;;  %v7829_v1 = vrot.slane %v7816_v24, 7  ;;  %v1782_v48 = vrot.slane %v1777_v59, 4  ;;  %v7833_v61 = vld [vmem:[#allocation14_spill] sm:$0xff]  ;;  %v7834_v52 = vld [vmem:[#allocation24_spill] sm:$0xff] }
 0x356   : > { %v1334_v47 = vpop.permute.xlu2 %1333  ;;  %1403 = vrot.lane.b32.xlu1 %v1104_v26, %s3986_s28  ;;  %v5981_v36 = vpack.i.b16 %v2746_v2, %v2745_v41  ;;  %v5983_v44 = vunpack.c.l.b16 %v2744_v25  ;;  %v1781_v33 = vperm.slane %v5885_v30, %v5283_v42  ;;  %v6011_v24 = vperm.slane %v2305_v31, %v5283_v42 }
 0x357   : > { %7825 = vst [vmem:[#allocation70_spill] sm:$0xff] %v5976_v63  ;;  %1401 = vrot.lane.b32.xlu0 %v5900_v16, %s3986_s28  ;;  %v5998_v26 = vsel %vm4191_vm2, %v1130_v34, %v7829_v1  ;;  %v1820_v45 = vrot.slane %v1334_v47, 4  ;;  %v6006_v16 = vperm.slane %v2277_v9, %v5283_v42  ;;  %v1810_v34 = vrot.slane %v1805_v3, 4 }
 0x358   : > { %7826 = vst [vmem:[#allocation71_spill] sm:$0xff] %v5981_v36  ;;  %v6001_v2 = vpop.permute.xlu1 %1319  ;;  %v6014_v59 = vsel %vm1590_vm9, 0, %v2286_v18  ;;  %v1809_v1 = vperm.slane %v1801_v7, %v5283_v42  ;;  %v7835_v9 = vpack.i.b16 %v5741_v32, %v5738_v17  ;;  %v1783_v30 = vsel %vm1590_vm9, 0, %v1782_v48 }
 0x359   : > { %7827 = vst [vmem:[#allocation73_spill] sm:$0xff] %v5983_v44  ;;  %v1318_v60 = vpop.permute.xlu0 %1317  ;;  %v1811_v31 = vsel %vm1590_vm9, 0, %v1810_v34  ;;  %v7837_v3 = vpack.i.b16 %v5718_v56, %v5730_v11  ;;  %v3142_v62 = vunpack.c.l.b16 %v5774_v21  ;;  %v2775_v17 = vshrl.u32 %v6014_v59, 16 }
 0x35a   : > { %7828 = vst [vmem:[#allocation74_spill] sm:$0xff] %v5985_v5  ;;  %v6022_v25 = vunpack.c.l.b16 %v7835_v9  ;;  %v1821_v41 = vsel %vm1590_vm9, %v1820_v45, %v1318_v60  ;;  %v2750_v7 = vpack.i.b16 %v1811_v31, %v1783_v30  ;;  %v2781_v32 = vshrl.u32 %v6006_v16, 16 }
 0x35b   : > { %7830 = vst [vmem:[#allocation76_spill] sm:$0xff] %v6006_v16  ;;  %v6029_v18 = vunpack.c.l.b16 %v7837_v3  ;;  %v2757_v34 = vshrl.u32 %v1781_v33, 16  ;;  %v2782_v56 = vshrl.u32 %v6011_v24, 16  ;;  %v2288_v11 = vrot.slane %v6006_v16, 4 }
 0x35c   : > { %7831 = vst [vmem:[#allocation77_spill] sm:$0xff] %v6011_v24  ;;  %1405 = vrot.lane.b32.xlu2 %v5909_v29, %s3986_s28  ;;  %v6042_v21 = vunpack.c.l.b16 %v2750_v7  ;;  %v2314_v29 = vrot.slane %v5946_v35, 4  ;;  %v2756_v45 = vpack.i.b16 %v1809_v1, %v1781_v33  ;;  %v2758_v60 = vshrl.u32 %v1809_v1, 16 }
 0x35d   : > { %7832 = vst [vmem:[#allocation66_spill] sm:$0xff] %v6014_v59  ;;  %v1825_v3 = vperm.slane %v1821_v41, %v5234_v55  ;;  %v6048_v48 = vpack.i.b16 %v2782_v56, %v2781_v32  ;;  %v1784_v47 = vrot.slane %v1781_v33, 4  ;;  %v2752_v33 = vshrl.u32 %v1811_v31, 16 }
 0x35e   : > { %7836 = vst [vmem:[#allocation69_spill] sm:$0xff] %v6022_v25  ;;  %v1340_v9 = vpop.permute.xlu2 %1339  ;;  %1409 = vrot.lane.b32.xlu1 %v1115_v57, %s3986_s28  ;;  %v6053_v57 = vsel %vm1590_vm9, 0, %v2314_v29  ;;  %v6055_v7 = vunpack.c.l.b16 %v2756_v45  ;;  %v2759_v16 = vpack.i.b16 %v2758_v60, %v2757_v34  ;;  %v2316_v34 = vrot.slane %v6011_v24, 4 }
 0x35f   : > { %7838 = vst [vmem:[#allocation80_spill] sm:$0xff] %v6029_v18  ;;  %v2352_v27 = vrot.slane %v1340_v9, 4  ;;  %1407 = vrot.lane.b32.xlu0 %v5918_v38, %s3986_s28  ;;  %v2751_v9 = vshrl.u32 %v1783_v30, 16  ;;  %v1812_v38 = vrot.slane %v1809_v1, 4  ;;  %v2776_v56 = vshrl.u32 %v6053_v57, 16 }
 0x360   : > { %7839 = vst [vmem:[#allocation72_spill] sm:$0xff] %v6042_v21  ;;  %v1326_v63 = vpop.permute.xlu1 %1325  ;;  %v3143_v45 = vunpack.c.l.b16 %v2759_v16  ;;  %v1826_v60 = vrot.slane %v1825_v3, 4  ;;  %v7844_v1 = vrot.slane %v7834_v52, 7  ;;  %v3094_v44 = vunpack.c.l.b16 %v5804_v37 }
 0x361   : > { %7840 = vst [vmem:[#allocation79_spill] sm:$0xff] %v6048_v48  ;;  %v1814_v5 = vrot.slane %v1326_v63, 4  ;;  %v1324_v36 = vpop.permute.xlu0 %1323  ;;  %v1785_v63 = vsel %vm1590_vm9, 0, %v1784_v47 }
 0x362   : > { %7841 = vst [vmem:[#allocation82_spill] sm:$0xff] %v6053_v57  ;;  %v2353_v32 = vsel %vm1590_vm9, %v2352_v27, %v1324_v36  ;;  %v2753_v36 = vpack.i.b16 %v2752_v33, %v2751_v9  ;;  %v6070_v27 = vpack.i.b16 %v2776_v56, %v2775_v17  ;;  %v1137_v31 = vrot.slane %v7844_v1, 4  ;;  %v7889_v57 = vld [vmem:[#allocation25_spill] sm:$0xff] }
 0x363   : > { %7842 = vst [vmem:[#allocation83_spill] sm:$0xff] %v6055_v7  ;;  %v1815_v29 = vsel %vm1590_vm9, %v1814_v5, %v5813_v6  ;;  %v6075_v6 = vpack.c.b16 %v3143_v45, %v3142_v62  ;;  %v1813_v5 = vsel %vm1590_vm9, 0, %v1812_v38  ;;  %v6084_v17 = vsel %vm1590_vm9, 0, %v2288_v11  ;;  %v7849_v45 = vld [vmem:[#allocation26_spill] sm:$0xff] }
 0x364   : > { %v1819_v30 = vperm.slane %v1815_v29, %v5234_v55  ;;  %1411 = vrot.lane.b32.xlu2 %v5955_v23, %s3986_s28  ;;  %7843 = vst [vmem:[#allocation85_spill] sm:$0xff] %v6070_v27  ;;  %v3095_v23 = vunpack.c.l.b16 %v2753_v36  ;;  %v2762_v37 = vpack.i.b16 %v1813_v5, %v1785_v63  ;;  %v6089_v62 = vsel %vm1590_vm9, 0, %v2316_v34  ;;  %v7851_v36 = vld [vmem:[#allocation21_spill] sm:$0xff] }
 0x365   : > { %7845 = vst [vmem:[#allocation86_spill] sm:$0xff] %v6075_v6  ;;  %v2763_v9 = vshrl.u32 %v1785_v63, 16  ;;  %v2764_v38 = vshrl.u32 %v1813_v5, 16  ;;  %v2357_v56 = vperm.slane %v2353_v32, %v5234_v55  ;;  %v7460_v34 = vrot.slane %v7851_v36, 7  ;;  %v7882_v27 = vld [vmem:[#allocation133_spill] sm:$0xff] }
 0x366   : > { %v1827_v16 = vsel %vm1590_vm9, %v1826_v60, %v1819_v30  ;;  %v1828_v47 = vrot.slane %v1819_v30, 4  ;;  %v6079_v41 = vpop.permute.xlu2 %1345  ;;  %1415 = vrot.lane.b32.xlu1 %v5971_v19, %s3986_s28  ;;  %7846 = vst [vmem:[#allocation75_spill] sm:$0xff] %v6084_v17  ;;  %v6095_v19 = vpack.c.b16 %v3095_v23, %v3094_v44  ;;  %v6107_v32 = vunpack.c.l.b16 %v2762_v37  ;;  %v7855_v23 = vld [vmem:[#allocation28_spill] sm:$0xff] }
 0x367   : > { %1413 = vrot.lane.b32.xlu0 %v5959_v12, %s3986_s28  ;;  %7847 = vst [vmem:[#allocation78_spill] sm:$0xff] %v6089_v62  ;;  %v7850_v12 = vld [vmem:[#allocation18_spill] sm:$0xff]  ;;  %v2765_v44 = vpack.i.b16 %v2764_v38, %v2763_v9  ;;  %v1177_v48 = vrot.slane %v7855_v23, 7  ;;  %v2788_v60 = vshrl.u32 %v6089_v62, 16  ;;  %v3190_v38 = vunpack.c.l.b16 %v5808_v4 }
 0x368   : > { %v6092_v33 = vsel %vm1590_vm9, %v1825_v3, %v1828_v47  ;;  %v1332_v29 = vpop.permute.xlu1 %1331  ;;  %7848 = vst [vmem:[#allocation89_spill] sm:$0xff] %v6095_v19  ;;  %v1138_v30 = vrot.slane %v7850_v12, 7  ;;  %v7852_v3 = vpack.i.b16 %v5777_v43, %v5787_v58  ;;  %v2787_v12 = vshrl.u32 %v6084_v17, 16 }
 0x369   : > { %v2346_v1 = vrot.slane %v1332_v29, 4  ;;  %v1330_v63 = vpop.permute.xlu0 %1329  ;;  %7854 = vst [vmem:[#allocation88_spill] sm:$0xff] %v6107_v32  ;;  %v2358_v29 = vrot.slane %v2357_v56, 4  ;;  %v7856_v43 = vrot.slane %v7834_v52, 7  ;;  %v7857_v58 = vrot.slane %v4971_v40, 11  ;;  %v7873_v32 = vld [vmem:[#allocation134_spill] sm:$0xff] }
 0x36a   : > { %v1842_v5 = vrot.slane %v1330_v63, 4  ;;  %v6105_v47 = vunpack.c.l.b16 %v7852_v3  ;;  %v7859_v40 = vrot.slane %v4989_v51, 11  ;;  %v2768_v4 = vpack.i.b16 %v5946_v35, %v5934_v53 }
 0x36b   : > { %v2347_v11 = vsel %vm1590_vm9, %v2346_v1, %v5839_v0  ;;  %v1136_v37 = vsel %vm4191_vm2, %v7857_v58, %v7856_v43  ;;  %v3191_v1 = vunpack.c.l.b16 %v2765_v44  ;;  %v1139_v44 = vsel %vm4191_vm2, %v1137_v31, %v1138_v30  ;;  %v7865_v58 = vld [vmem:[#allocation23_spill] sm:$0xff] }
 0x36c   : > { %7853 = vst [vmem:[#allocation81_spill] sm:$0xff] %v6105_v47  ;;  %v2351_v63 = vperm.slane %v2347_v11, %v5234_v55  ;;  %1417 = vrot.lane.b32.xlu2 %v5992_v22, %s3986_s28  ;;  %v1843_v9 = vsel %vm1590_vm9, %v1842_v5, %v5940_v49  ;;  %v6128_v11 = vpack.i.b16 %v2788_v60, %v2787_v12  ;;  %v7860_v49 = vld [vmem:[#allocation13_spill] sm:$0xff]  ;;  %v1179_v5 = vrot.slane %v1177_v48, 4 }
 0x36d   : > { %v1143_v23 = vsel %vm4191_vm2, %v7859_v40, %v7460_v34  ;;  %v1180_v60 = vrot.slane %v7860_v49, 7  ;;  %v6147_v12 = vpack.c.b16 %v3191_v1, %v3190_v38  ;;  %v1847_v51 = vperm.slane %v1843_v9, %v5234_v55 }
 0x36e   : > { %7858 = vst [vmem:[#allocation92_spill] sm:$0xff] %v6128_v11  ;;  %v2359_v22 = vsel %vm1590_vm9, %v2358_v29, %v2351_v63  ;;  %v2360_v3 = vrot.slane %v2351_v63, 4  ;;  %v6131_v52 = vpop.permute.xlu2 %1351  ;;  %1421 = vrot.lane.b32.xlu1 %v1136_v37, %s3986_s28  ;;  %v7862_v43 = vpack.i.b16 %v5801_v14, %v5811_v50  ;;  %v6156_v53 = vunpack.c.l.b16 %v2768_v4  ;;  %v7868_v4 = vld [vmem:[#allocation33_spill] sm:$0xff]  ;;  %v7890_v14 = vld [vmem:[#allocation22_spill] sm:$0xff] }
 0x36f   : > { %1419 = vrot.lane.b32.xlu0 %v5998_v26, %s3986_s28  ;;  %7861 = vst [vmem:[#allocation84_spill] sm:$0xff] %v6147_v12  ;;  %v3778_v37 = vrot.slane %v7865_v58, 11  ;;  %v7866_v26 = vld [vmem:[#allocation11_spill] sm:$0xff]  ;;  %v2323_v31 = vperm.slane %v5951_v46, %v5234_v55  ;;  %v6164_v9 = vperm.slane %v1827_v16, %v5283_v42  ;;  %v1181_v46 = vsel %vm4191_vm2, %v1179_v5, %v1180_v60 }
 0x370   : > { %v2361_v29 = vsel %vm1590_vm9, %v2357_v56, %v2360_v3  ;;  %v1338_v63 = vpop.permute.xlu1 %1337  ;;  %v6154_v35 = vunpack.c.l.b16 %v7862_v43  ;;  %7864 = vst [vmem:[#allocation94_spill] sm:$0xff] %v6156_v53  ;;  %v1184_v40 = vrot.slane %v7866_v26, 7  ;;  %v7867_v56 = vld [vmem:[#allocation29_spill] sm:$0xff]  ;;  %v3779_v43 = vrot.slane %v7868_v4, 11  ;;  %v7869_v4 = vld [vmem:[#allocation38_spill] sm:$0xff] }
 0x371   : > { %v1848_v30 = vrot.slane %v1338_v63, 4  ;;  %v1336_v38 = vpop.permute.xlu0 %1335  ;;  %v1178_v26 = vsel %vm4191_vm2, %v3778_v37, %v1177_v48  ;;  %v6176_v63 = vperm.slane %v2359_v22, %v5283_v42  ;;  %v1856_v16 = vrot.slane %v1847_v51, 4 }
 0x372   : > { %7863 = vst [vmem:[#allocation91_spill] sm:$0xff] %v6154_v35  ;;  %v2324_v3 = vrot.slane %v1336_v38, 4  ;;  %v1187_v0 = vrot.slane %v7869_v4, 7  ;;  %v1185_v22 = vsel %vm4191_vm2, %v3779_v43, %v1184_v40  ;;  %v7872_v47 = vrot.slane %v7867_v56, 7 }
 0x373   : > { %v1849_v58 = vsel %vm1590_vm9, %v1848_v30, %v5887_v20  ;;  %v1186_v20 = vrot.slane %v1184_v40, 4  ;;  %v2332_v30 = vrot.slane %v2323_v31, 4  ;;  %v1152_v6 = vrot.slane %v7873_v32, 7 }
 0x374   : > { %v1853_v38 = vperm.slane %v1849_v58, %v5234_v55  ;;  %v2325_v49 = vsel %vm1590_vm9, %v2324_v3, %v6001_v2  ;;  %1423 = vrot.lane.b32.xlu2 %v1139_v44, %s3986_s28  ;;  %v1838_v2 = vrot.slane %v6164_v9, 4  ;;  %v6193_v44 = vperm.slane %v6092_v33, %v5283_v42 }
 0x375   : > { %v2329_v48 = vperm.slane %v2325_v49, %v5234_v55  ;;  %v2370_v33 = vrot.slane %v6176_v63, 4  ;;  %v7877_v24 = vrot.slane %v7849_v45, 11  ;;  %v3776_v19 = vrot.slane %v7882_v27, 11 }
 0x376   : > { %v1854_v37 = vrot.slane %v1853_v38, 4  ;;  %v1857_v60 = vsel %vm1590_vm9, %v1853_v38, %v1856_v16  ;;  %v6185_v5 = vpop.permute.xlu2 %1357  ;;  %1445 = vrot.lane.b32.xlu1 %v1178_v26, %s3986_s28  ;;  %v6201_v16 = vperm.slane %v2361_v29, %v5283_v42  ;;  %v2805_v34 = vshrl.u32 %v6193_v44, 16 }
 0x377   : > { %v6196_v3 = vperm.slane %v1857_v60, %v5283_v42  ;;  %v2330_v49 = vrot.slane %v2329_v48, 4  ;;  %v2333_v58 = vsel %vm1590_vm9, %v2329_v48, %v2332_v30  ;;  %1425 = vrot.lane.b32.xlu0 %v1143_v23, %s3986_s28  ;;  %v1188_v23 = vsel %vm4191_vm2, %v1186_v20, %v1187_v0 }
 0x378   : > { %v1855_v26 = vsel %vm1590_vm9, %v1854_v37, %v1847_v51  ;;  %v6205_v40 = vperm.slane %v2333_v58, %v5283_v42  ;;  %v6207_v43 = vpop.permute.xlu1 %1343  ;;  %v2793_v48 = vshrl.u32 %v6164_v9, 16  ;;  %v6225_v37 = vsel %vm1590_vm9, 0, %v1838_v2 }
 0x379   : > { %v6211_v38 = vperm.slane %v1855_v26, %v5283_v42  ;;  %v2331_v4 = vsel %vm1590_vm9, %v2330_v49, %v2323_v31  ;;  %v6214_v30 = vpop.permute.xlu0 %1341  ;;  %v2818_v0 = vshrl.u32 %v6176_v63, 16  ;;  %v6238_v2 = vsel %vm1590_vm9, 0, %v2370_v33 }
 0x37a   : > { %v6221_v51 = vperm.slane %v2331_v4, %v5283_v42  ;;  %v2806_v4 = vshrl.u32 %v6196_v3, 16  ;;  %v2799_v49 = vshrl.u32 %v6225_v37, 16  ;;  %v1840_v12 = vrot.slane %v6193_v44, 4 }
 0x37b   : > { %v2794_v31 = vshrl.u32 %v6211_v38, 16  ;;  %v1866_v20 = vrot.slane %v6211_v38, 4  ;;  %v1868_v62 = vrot.slane %v6196_v3, 4  ;;  %v2344_v56 = vrot.slane %v6205_v40, 4 }
 0x37c   : > { %7870 = vst [vmem:[#allocation95_spill] sm:$0xff] %v6221_v51  ;;  %1447 = vrot.lane.b32.xlu2 %v1181_v46, %s3986_s28  ;;  %v2817_v58 = vshrl.u32 %v6221_v51, 16  ;;  %v2342_v26 = vrot.slane %v6221_v51, 4  ;;  %v1173_v50 = vrot.slane %v7889_v57, 7 }
 0x37d   : > { %v6241_v60 = vpack.i.b16 %v2794_v31, %v2793_v48  ;;  %v6244_v29 = vsel %vm1590_vm9, 0, %v1866_v20  ;;  %v2830_v20 = vshrl.u32 %v6201_v16, 16  ;;  %v6295_v32 = vsel %vm1590_vm9, 0, %v1868_v62 }
 0x37e   : > { %v1364_v1 = vpop.permute.xlu2 %1363  ;;  %1451 = vrot.lane.b32.xlu1 %v1188_v23, %s3986_s28  ;;  %v6249_v46 = vpack.i.b16 %v2818_v0, %v2817_v58  ;;  %v6254_v35 = vsel %vm1590_vm9, 0, %v2342_v26  ;;  %v2800_v48 = vshrl.u32 %v6244_v29, 16  ;;  %v2824_v23 = vshrl.u32 %v6238_v2, 16  ;;  %v7871_v0 = vld [vmem:[#allocation32_spill] sm:$0xff] }
 0x37f   : > { %v2402_v31 = vrot.slane %v1364_v1, 4  ;;  %1449 = vrot.lane.b32.xlu0 %v1185_v22, %s3986_s28  ;;  %v2823_v53 = vshrl.u32 %v6254_v35, 16  ;;  %v1156_v58 = vrot.slane %v7871_v0, 7  ;;  %v6267_v26 = vpack.i.b16 %v2806_v4, %v2805_v34 }
 0x380   : > { %v6263_v11 = vpop.permute.xlu1 %1349  ;;  %v6265_v33 = vpack.i.b16 %v2800_v48, %v2799_v49  ;;  %v2829_v22 = vshrl.u32 %v6205_v40, 16  ;;  %v1151_v0 = vrot.slane %v7872_v47, 4  ;;  %v2372_v34 = vrot.slane %v6201_v16, 4 }
 0x381   : > { %v1348_v1 = vpop.permute.xlu0 %1347  ;;  %v6270_v17 = vpack.i.b16 %v2824_v23, %v2823_v53  ;;  %v7874_v4 = vmov %v7872_v47  ;;  %v7875_v53 = vrot.slane %v7833_v61, 11  ;;  %v6292_v47 = vsel %vm1590_vm9, 0, %v1840_v12 }
 0x382   : > { %v6279_v49 = vsel %vm1590_vm9, %v2402_v31, %v1348_v1  ;;  %v6288_v23 = vpack.i.b16 %v2830_v20, %v2829_v22  ;;  %v7876_v31 = vld [vmem:[#allocation36_spill] sm:$0xff]  ;;  %v1157_v61 = vsel %vm4191_vm2, %v7877_v24, %v1156_v58  ;;  %v7878_v20 = vld [vmem:[#allocation30_spill] sm:$0xff]  ;;  %v1153_v12 = vsel %vm4191_vm2, %v1151_v0, %v1152_v6 }
 0x383   : > { %v1150_v48 = vsel %vm4191_vm2, %v7875_v53, %v7874_v4  ;;  %v1163_v1 = vrot.slane %v7876_v31, 7  ;;  %v1158_v4 = vrot.slane %v1156_v58, 4  ;;  %v1159_v22 = vrot.slane %v7878_v20, 7  ;;  %v7879_v31 = vld [vmem:[#allocation35_spill] sm:$0xff]  ;;  %v7883_v6 = vld [vmem:[#allocation10_spill] sm:$0xff] }
 0x384   : > { %1429 = vrot.lane.b32.xlu2 %v1150_v48, %s3986_s28  ;;  %v6308_v62 = vsel %vm1590_vm9, 0, %v2372_v34  ;;  %v6314_v24 = vsel %vm1590_vm9, 0, %v2344_v56  ;;  %v2811_v58 = vshrl.u32 %v6292_v47, 16  ;;  %v2812_v48 = vshrl.u32 %v6295_v32, 16 }
 0x385   : > { %v1165_v34 = vrot.slane %v1163_v1, 4  ;;  %v2835_v56 = vshrl.u32 %v6314_v24, 16  ;;  %v2836_v18 = vshrl.u32 %v6308_v62, 16  ;;  %v1160_v7 = vsel %vm4191_vm2, %v1158_v4, %v1159_v22  ;;  %v7885_v22 = vld [vmem:[#allocation135_spill] sm:$0xff] }
 0x386   : > { %v1370_v53 = vpop.permute.xlu2 %1369  ;;  %1433 = vrot.lane.b32.xlu1 %v1157_v61, %s3986_s28  ;;  %v1166_v61 = vrot.slane %v7879_v31, 7  ;;  %v6325_v45 = vpack.i.b16 %v2812_v48, %v2811_v58  ;;  %v1170_v25 = vrot.slane %v7883_v6, 7  ;;  %v7884_v58 = vld [vmem:[#allocation15_spill] sm:$0xff]  ;;  %v1164_v4 = vsel %vm4191_vm2, %v3776_v19, %v1163_v1 }
 0x387   : > { %1431 = vrot.lane.b32.xlu0 %v1153_v12, %s3986_s28  ;;  %v6331_v31 = vpack.i.b16 %v2836_v18, %v2835_v56  ;;  %v2602_v48 = vshrl.u32 %v7884_v58, 16  ;;  %v2650_v18 = vshrl.u32 %v5479_v54, 16  ;;  %v3777_v27 = vrot.slane %v7885_v22, 11  ;;  %v7888_v58 = vld [vmem:[#allocation27_spill] sm:$0xff] }
 0x388   : > { %v6319_v20 = vpop.permute.xlu1 %1355  ;;  %7880 = vst [vmem:[#allocation87_spill] sm:$0xff] %v6325_v45  ;;  %v1167_v0 = vsel %vm4191_vm2, %v1165_v34, %v1166_v61  ;;  %v1904_v56 = vrot.slane %v1370_v53, 4  ;;  %v7887_v61 = vrot.slane %v7851_v36, 7  ;;  %v1145_v59 = vrot.slane %v7888_v58, 7  ;;  %v7891_v36 = vld [vmem:[#allocation44_spill] sm:$0xff] }
 0x389   : > { %v1354_v12 = vpop.permute.xlu0 %1353  ;;  %7881 = vst [vmem:[#allocation90_spill] sm:$0xff] %v6331_v31  ;;  %v2649_v31 = vshrl.u32 %v7890_v14, 16  ;;  %v1172_v19 = vrot.slane %v1170_v25, 4  ;;  %v1171_v53 = vsel %vm4191_vm2, %v3777_v27, %v1170_v25  ;;  %v2697_v14 = vshrl.u32 %v5691_v8, 16 }
 0x38a   : > { %v1144_v34 = vrot.slane %v7887_v61, 4  ;;  %v7892_v61 = vld [vmem:[#allocation34_spill] sm:$0xff]  ;;  %v1905_v58 = vsel %vm1590_vm9, %v1904_v56, %v1354_v12  ;;  %v1954_v27 = vrot.slane %v5412_v13, 4 }
 0x38b   : > { %v2651_v45 = vpack.i.b16 %v2650_v18, %v2649_v31  ;;  %v2606_v51 = vpack.i.b16 %v7892_v61, %v7891_v36  ;;  %v1174_v12 = vsel %vm4191_vm2, %v1172_v19, %v1173_v50  ;;  %v7897_v36 = vld [vmem:[#allocation8_spill] sm:$0xff] }
 0x38c   : > { %1435 = vrot.lane.b32.xlu2 %v1160_v7, %s3986_s28  ;;  %v7886_v7 = vld [vmem:[#allocation31_spill] sm:$0xff]  ;;  %v1146_v31 = vsel %vm4191_vm2, %v1144_v34, %v1145_v59  ;;  %v1932_v61 = vrot.slane %v7897_v36, 4  ;;  %vm3566_vm2 = vcmask 588800  }
 0x38d   : > { %v2601_v6 = vshrl.u32 %v7886_v7, 16  ;;  %v6379_v15 = vunpack.c.l.b16 %v2606_v51 }
 0x38e   : > { %v6339_v21 = vpop.permute.xlu2 %1375  ;;  %1439 = vrot.lane.b32.xlu1 %v1167_v0, %s3986_s28 }
 0x38f   : > { %1437 = vrot.lane.b32.xlu0 %v1164_v4, %s3986_s28  ;;  %v2603_v22 = vpack.i.b16 %v2602_v48, %v2601_v6  ;;  %v1870_v4 = vrot.slane %v6185_v5, 4  ;;  %v7894_v6 = vld [vmem:[#allocation46_spill] sm:$0xff] }
 0x390   : > { %v1362_v0 = vpop.permute.xlu1 %1361 }
 0x391   : > { %v1898_v1 = vrot.slane %v1362_v0, 4  ;;  %v1360_v54 = vpop.permute.xlu0 %1359  ;;  %v2654_v0 = vpack.i.b16 %v5572_v10, %v5569_v39  ;;  %v3044_v48 = vunpack.c.l.b16 %v2603_v22  ;;  %v1871_v8 = vsel %vm1590_vm9, %v1870_v4, %v6214_v30 }
 0x392   : > { %v2374_v7 = vrot.slane %v1360_v54, 4  ;;  %v1909_v39 = vperm.slane %v1905_v58, %v5234_v55  ;;  %v2430_v30 = vrot.slane %v7894_v6, 4  ;;  %v7895_v54 = vld [vmem:[#allocation40_spill] sm:$0xff] }
 0x393   : > { %v1899_v57 = vsel %vm1590_vm9, %v1898_v1, %v6079_v41  ;;  %v2698_v41 = vshrl.u32 %v5688_v28, 16  ;;  %v6381_v50 = vunpack.c.l.b16 %v2654_v0  ;;  %v7893_v28 = vld [vmem:[#allocation37_spill] sm:$0xff]  ;;  %v7898_v0 = vld [vmem:[#allocation42_spill] sm:$0xff] }
 0x394   : > { %v1903_v25 = vperm.slane %v1899_v57, %v5234_v55  ;;  %v2375_v5 = vsel %vm1590_vm9, %v2374_v7, %v6207_v43  ;;  %1441 = vrot.lane.b32.xlu2 %v1171_v53, %s3986_s28  ;;  %v3045_v43 = vunpack.c.l.b16 %v2651_v45  ;;  %v2436_v56 = vrot.slane %v7893_v28, 4  ;;  %v7896_v7 = vld [vmem:[#allocation71_spill] sm:$0xff] }
 0x395   : > { %v2699_v59 = vpack.i.b16 %v2698_v41, %v2697_v14  ;;  %v2379_v19 = vperm.slane %v2375_v5, %v5234_v55  ;;  %v1926_v45 = vrot.slane %v7895_v54, 4  ;;  %v1875_v53 = vperm.slane %v1871_v8, %v5234_v55 }
 0x396   : > { %v1912_v10 = vrot.slane %v1903_v25, 4  ;;  %v1382_v18 = vpop.permute.xlu2 %1381  ;;  %1427 = vrot.lane.b32.xlu1 %v1146_v31, %s3986_s28  ;;  %v3047_v51 = vunpack.c.l.b16 %v7896_v7  ;;  %v1910_v58 = vrot.slane %v1909_v39, 4  ;;  %v3053_v14 = vpack.c.b16 %v3045_v43, %v3044_v48  ;;  %v7899_v48 = vld [vmem:[#allocation53_spill] sm:$0xff] }
 0x397   : > { %1443 = vrot.lane.b32.xlu0 %v1174_v12, %s3986_s28  ;;  %v2458_v31 = vrot.slane %v7898_v0, 4  ;;  %v3046_v5 = vunpack.c.l.b16 %v2699_v59  ;;  %v3077_v41 = vpack.c.b16 %v6381_v50, %v6379_v15  ;;  %v1884_v43 = vrot.slane %v1875_v53, 4  ;;  %s3711_s28 = sshll.u32 %s4094_s19, 4 }
 0x398   : > { %v1913_v34 = vsel %vm1590_vm9, %v1909_v39, %v1912_v10  ;;  %v1368_v1 = vpop.permute.xlu1 %1367  ;;  %v1911_v8 = vsel %vm1590_vm9, %v1910_v58, %v1903_v25  ;;  %v2388_v10 = vrot.slane %v2379_v19, 4  ;;  %v2464_v39 = vrot.slane %v7899_v48, 4 }
 0x399   : > { %v2380_v22 = vrot.slane %v1368_v1, 4  ;;  %v1366_v4 = vpop.permute.xlu0 %1365  ;;  %v3054_v59 = vpack.c.b16 %v3047_v51, %v3046_v5  ;;  %v1933_v7 = vsel %vm1590_vm9, %v1932_v61, %v1382_v18  ;;  %v3048_v61 = vunpack.c.l.b16 %v6241_v60 }
 0x39a   : > { %v1876_v57 = vrot.slane %v1366_v4, 4 }
 0x39b   : > { %v2381_v12 = vsel %vm1590_vm9, %v2380_v22, %v6131_v52  ;;  %v7900_v22 = vld [vmem:[#allocation55_spill] sm:$0xff] }
 0x39c   : > { %v2385_v1 = vperm.slane %v2381_v12, %v5234_v55  ;;  %v1877_v54 = vsel %vm1590_vm9, %v1876_v57, %v6263_v11  ;;  %3058 = vrot.lane.b32.xlu2 %v3053_v14, %s3992_s4  ;;  %v1960_v4 = vrot.slane %v7900_v22, 4  ;;  %v2407_v11 = vperm.slane %v6279_v49, %v5234_v55 }
 0x39d   : > { %v1881_v52 = vperm.slane %v1877_v54, %v5234_v55  ;;  %v1917_v57 = vperm.slane %v1911_v8, %v5283_v42  ;;  %v6424_v49 = vperm.slane %v1913_v34, %v5283_v42  ;;  %v1937_v8 = vperm.slane %v1933_v7, %v5234_v55 }
 0x39e   : > { %v2386_v25 = vrot.slane %v2385_v1, 4  ;;  %v6406_v36 = vsel %vm1590_vm9, %v2385_v1, %v2388_v10  ;;  %v1388_v58 = vpop.permute.xlu2 %1387  ;;  %v7901_v10 = vpack.i.b16 %v6211_v38, %v6164_v9  ;;  %v2416_v9 = vrot.slane %v2407_v11, 4 }
 0x39f   : > { %v1882_v14 = vrot.slane %v1881_v52, 4  ;;  %v1885_v12 = vsel %vm1590_vm9, %v1881_v52, %v1884_v43  ;;  %3060 = vrot.lane.b32.xlu0 %v3054_v59, %s3992_s4  ;;  %v2465_v52 = vsel %vm1590_vm9, %v2464_v39, %v1388_v58  ;;  %v2842_v38 = vshrl.u32 %v1917_v57, 16 }
 0x3a0   : > { %v2387_v51 = vsel %vm1590_vm9, %v2386_v25, %v2379_v19  ;;  %v6415_v5 = vperm.slane %v1885_v12, %v5283_v42  ;;  %v1374_v18 = vpop.permute.xlu1 %1373  ;;  %v6421_v1 = vunpack.c.l.b16 %v7901_v10  ;;  %v3230_v25 = vunpack.c.l.b16 %v6249_v46 }
 0x3a1   : > { %v1883_v54 = vsel %vm1590_vm9, %v1882_v14, %v1875_v53  ;;  %v1927_v19 = vsel %vm1590_vm9, %v1926_v45, %v1374_v18  ;;  %v1372_v48 = vpop.permute.xlu0 %1371  ;;  %v1922_v14 = vrot.slane %v1917_v57, 4  ;;  %v6438_v12 = vperm.slane %v2387_v51, %v5283_v42 }
 0x3a2   : > { %7902 = vst [vmem:[#allocation98_spill] sm:$0xff] %v6421_v1  ;;  %v1889_v43 = vperm.slane %v1883_v54, %v5283_v42  ;;  %v1931_v60 = vperm.slane %v1927_v19, %v5234_v55  ;;  %v2408_v59 = vrot.slane %v1372_v48, 4  ;;  %v2469_v39 = vperm.slane %v2465_v52, %v5234_v55 }
 0x3a3   : > { %v1938_v10 = vrot.slane %v1937_v8, 4  ;;  %v7903_v34 = vpack.i.b16 %v6244_v29, %v6225_v37  ;;  %v2431_v51 = vsel %vm1590_vm9, %v2430_v30, %v6339_v21  ;;  %v1923_v29 = vsel %vm1590_vm9, 0, %v1922_v14 }
 0x3a4   : > { %v1940_v7 = vrot.slane %v1931_v60, 4  ;;  %v2409_v53 = vsel %vm1590_vm9, %v2408_v59, %v6319_v20  ;;  %v2841_v45 = vshrl.u32 %v1889_v43, 16  ;;  %v2840_v18 = vpack.i.b16 %v1917_v57, %v1889_v43 }
 0x3a5   : > { %v2413_v58 = vperm.slane %v2409_v53, %v5234_v55  ;;  %v6448_v20 = vunpack.c.l.b16 %v7903_v34  ;;  %v1894_v57 = vrot.slane %v1889_v43, 4  ;;  %v2470_v37 = vrot.slane %v2469_v39, 4 }
 0x3a6   : > { %v1941_v54 = vsel %vm1590_vm9, %v1937_v8, %v1940_v7  ;;  %v6443_v19 = vpop.permute.xlu2 %1393  ;;  %v2843_v48 = vpack.i.b16 %v2842_v38, %v2841_v45  ;;  %v1939_v8 = vsel %vm1590_vm9, %v1938_v10, %v1931_v60  ;;  %v6458_v38 = vunpack.c.l.b16 %v2840_v18 }
 0x3a7   : > { %7904 = vst [vmem:[#allocation97_spill] sm:$0xff] %v6448_v20  ;;  %v2414_v52 = vrot.slane %v2413_v58, 4  ;;  %v6455_v59 = vsel %vm1590_vm9, %v2413_v58, %v2416_v9  ;;  %v2865_v30 = vshrl.u32 %v6438_v12, 16  ;;  %v6474_v14 = vperm.slane %v1939_v8, %v5283_v42 }
 0x3a8   : > { %v1380_v7 = vpop.permute.xlu1 %1379  ;;  %v3049_v53 = vunpack.c.l.b16 %v2843_v48  ;;  %7905 = vst [vmem:[#allocation100_spill] sm:$0xff] %v6458_v38 }
 0x3a9   : > { %v2415_v34 = vsel %vm1590_vm9, %v2414_v52, %v2407_v11  ;;  %v2459_v21 = vsel %vm1590_vm9, %v2458_v31, %v1380_v7  ;;  %v1378_v6 = vpop.permute.xlu0 %1377  ;;  %v1895_v31 = vsel %vm1590_vm9, 0, %v1894_v57  ;;  %v2398_v11 = vrot.slane %v6438_v12, 4 }
 0x3aa   : > { %v6467_v43 = vperm.slane %v2415_v34, %v5283_v42  ;;  %v2463_v60 = vperm.slane %v2459_v21, %v5234_v55  ;;  %v1955_v9 = vsel %vm1590_vm9, %v1954_v27, %v1378_v6  ;;  %v3055_v45 = vpack.c.b16 %v3049_v53, %v3048_v61 }
 0x3ab   : > { %v2846_v10 = vpack.i.b16 %v1923_v29, %v1895_v31  ;;  %v2435_v27 = vperm.slane %v2431_v51, %v5234_v55  ;;  %v1959_v61 = vperm.slane %v1955_v9, %v5234_v55  ;;  %v2848_v52 = vshrl.u32 %v1923_v29, 16 }
 0x3ac   : > { %v2471_v58 = vsel %vm1590_vm9, %v2470_v37, %v2463_v60  ;;  %v2472_v18 = vrot.slane %v2463_v60, 4  ;;  %3062 = vrot.lane.b32.xlu1 %v3055_v45, %s3992_s4  ;;  %v2866_v13 = vshrl.u32 %v6467_v43, 16  ;;  %v2426_v48 = vrot.slane %v6467_v43, 4 }
 0x3ad   : > { %v6489_v53 = vunpack.c.l.b16 %v2846_v10  ;;  %v2847_v37 = vshrl.u32 %v1895_v31, 16  ;;  %v1950_v34 = vrot.slane %v6474_v14, 4  ;;  %v6493_v21 = vsel %vm1590_vm9, 0, %v2398_v11 }
 0x3ae   : > { %v2473_v8 = vsel %vm1590_vm9, %v2469_v39, %v2472_v18  ;;  %v6487_v57 = vpop.permute.xlu2 %1399  ;;  %v2867_v7 = vpack.i.b16 %v2866_v13, %v2865_v30  ;;  %v7907_v51 = vpack.i.b16 %v6238_v2, %v6254_v35  ;;  %v3096_v29 = vunpack.c.l.b16 %v6265_v33 }
 0x3af   : > { %7906 = vst [vmem:[#allocation93_spill] sm:$0xff] %v6489_v53  ;;  %v6504_v9 = vsel %vm1590_vm9, 0, %v2426_v48  ;;  %v2849_v45 = vpack.i.b16 %v2848_v52, %v2847_v37  ;;  %v2444_v31 = vrot.slane %v2435_v27, 4  ;;  %v6507_v11 = vperm.slane %v2471_v58, %v5283_v42 }
 0x3b0   : > { %v6498_v6 = vunpack.c.l.b16 %v7907_v51  ;;  %v1386_v60 = vpop.permute.xlu1 %1385  ;;  %v3231_v39 = vunpack.c.l.b16 %v2867_v7  ;;  %v2870_v33 = vpack.i.b16 %v6504_v9, %v6493_v21  ;;  %v1968_v18 = vrot.slane %v1959_v61, 4 }
 0x3b1   : > { %v1961_v35 = vsel %vm1590_vm9, %v1960_v4, %v1386_v60  ;;  %v1384_v2 = vpop.permute.xlu0 %1383  ;;  %v6523_v58 = vperm.slane %v1941_v54, %v5283_v42  ;;  %v3097_v52 = vunpack.c.l.b16 %v2849_v45  ;;  %v6529_v7 = vperm.slane %v2473_v8, %v5283_v42 }
 0x3b2   : > { %7908 = vst [vmem:[#allocation96_spill] sm:$0xff] %v6498_v6  ;;  %v1965_v13 = vperm.slane %v1961_v35, %v5234_v55  ;;  %v2437_v10 = vsel %vm1590_vm9, %v2436_v56, %v1384_v2  ;;  %v6520_v48 = vpack.c.b16 %v3231_v39, %v3230_v25  ;;  %v6526_v4 = vunpack.c.l.b16 %v2870_v33 }
 0x3b3   : > { %v2441_v22 = vperm.slane %v2437_v10, %v5234_v55  ;;  %v6537_v46 = vsel %vm1590_vm9, 0, %v1950_v34  ;;  %v2482_v51 = vrot.slane %v6507_v11, 4  ;;  %v6552_v50 = vpack.c.b16 %v3097_v52, %v3096_v29 }
 0x3b4   : > { %7909 = vst [vmem:[#allocation99_spill] sm:$0xff] %v6520_v48  ;;  %v1966_v37 = vrot.slane %v1965_v13, 4  ;;  %v1969_v28 = vsel %vm1590_vm9, %v1965_v13, %v1968_v18  ;;  %3082 = vrot.lane.b32.xlu1 %v3077_v41, %s3993_s5  ;;  %v7912_v45 = vpack.i.b16 %v6196_v3, %v6193_v44  ;;  %v2853_v35 = vshrl.u32 %v6415_v5, 16 }
 0x3b5   : > { %7910 = vst [vmem:[#allocation101_spill] sm:$0xff] %v6526_v4  ;;  %v6540_v56 = vperm.slane %v1969_v28, %v5283_v42  ;;  %v2442_v25 = vrot.slane %v2441_v22, 4  ;;  %v2445_v54 = vsel %vm1590_vm9, %v2441_v22, %v2444_v31  ;;  %v2895_v29 = vshrl.u32 %v6537_v46, 16 }
 0x3b6   : > { %v1967_v60 = vsel %vm1590_vm9, %v1966_v37, %v1959_v61  ;;  %v6548_v39 = vperm.slane %v2445_v54, %v5283_v42  ;;  %v6550_v15 = vpop.permute.xlu2 %1405  ;;  %7911 = vst [vmem:[#allocation102_spill] sm:$0xff] %v6552_v50  ;;  %v6561_v31 = vunpack.c.l.b16 %v7912_v45  ;;  %v2914_v44 = vshrl.u32 %v6507_v11, 16 }
 0x3b7   : > { %v6555_v41 = vperm.slane %v1967_v60, %v5283_v42  ;;  %v2443_v34 = vsel %vm1590_vm9, %v2442_v25, %v2435_v27  ;;  %v1952_v10 = vrot.slane %v6523_v58, 4  ;;  %v6584_v37 = vsel %vm1590_vm9, 0, %v2482_v51 }
 0x3b8   : > { %7913 = vst [vmem:[#allocation105_spill] sm:$0xff] %v6561_v31  ;;  %v6565_v61 = vperm.slane %v2443_v34, %v5283_v42  ;;  %v6567_v2 = vpop.permute.xlu1 %1391  ;;  %v2484_v28 = vrot.slane %v6529_v7, 4  ;;  %v1980_v25 = vrot.slane %v6540_v56, 4  ;;  %v2456_v54 = vrot.slane %v6548_v39, 4 }
 0x3b9   : > { %v6574_v18 = vpop.permute.xlu0 %1389  ;;  %v1978_v3 = vrot.slane %v6555_v41, 4  ;;  %v2902_v34 = vshrl.u32 %v6540_v56, 16  ;;  %v2901_v33 = vshrl.u32 %v6523_v58, 16  ;;  %v7915_v13 = vpack.i.b16 %v6424_v49, %v6415_v5 }
 0x3ba   : > { %v2913_v22 = vshrl.u32 %v6565_v61, 16  ;;  %v2454_v52 = vrot.slane %v6565_v61, 4  ;;  %v2926_v20 = vshrl.u32 %v6529_v7, 16  ;;  %v2397_v48 = vperm.slane %v6406_v36, %v5283_v42 }
 0x3bb   : > { %v6590_v60 = vsel %vm1590_vm9, 0, %v1978_v3  ;;  %v2920_v3 = vshrl.u32 %v6584_v37, 16  ;;  %v6618_v0 = vunpack.c.l.b16 %v7915_v13  ;;  %v6622_v4 = vpack.i.b16 %v2902_v34, %v2901_v33 }
 0x3bc   : > { %v6593_v45 = vpack.i.b16 %v2914_v44, %v2913_v22  ;;  %v6598_v30 = vsel %vm1590_vm9, 0, %v2454_v52  ;;  %v2896_v51 = vshrl.u32 %v6590_v60, 16  ;;  %v6608_v44 = vperm.slane %v6455_v59, %v5283_v42 }
 0x3bd   : > { %v2919_v27 = vshrl.u32 %v6598_v30, 16  ;;  %v6613_v52 = vsel %vm1590_vm9, 0, %v1952_v10  ;;  %v6632_v10 = vsel %vm1590_vm9, 0, %v2456_v54  ;;  %v6635_v13 = vsel %vm1590_vm9, 0, %v2484_v28 }
 0x3be   : > { %v1412_v22 = vpop.permute.xlu2 %1411  ;;  %v6610_v8 = vpack.i.b16 %v2896_v51, %v2895_v29  ;;  %7914 = vst [vmem:[#allocation106_spill] sm:$0xff] %v6613_v52  ;;  %v2925_v29 = vshrl.u32 %v6548_v39, 16  ;;  %v6629_v51 = vsel %vm1590_vm9, 0, %v1980_v25  ;;  %v2907_v34 = vshrl.u32 %v6613_v52, 16 }
 0x3bf   : > { %v2514_v50 = vrot.slane %v1412_v22, 4  ;;  %v6620_v6 = vpack.i.b16 %v2920_v3, %v2919_v27  ;;  %7916 = vst [vmem:[#allocation108_spill] sm:$0xff] %v6632_v10  ;;  %v2871_v3 = vshrl.u32 %v6493_v21, 16  ;;  %v2908_v54 = vshrl.u32 %v6629_v51, 16 }
 0x3c0   : > { %v6625_v59 = vpop.permute.xlu1 %1397  ;;  %v6646_v53 = vpack.i.b16 %v2926_v20, %v2925_v29  ;;  %v2872_v28 = vshrl.u32 %v6504_v9, 16  ;;  %v2931_v33 = vshrl.u32 %v6632_v10, 16  ;;  %v7917_v27 = vpack.i.b16 %v6201_v16, %v6205_v40 }
 0x3c1   : > { %v1396_v22 = vpop.permute.xlu0 %1395  ;;  %v2854_v21 = vshrl.u32 %v6424_v49, 16  ;;  %v2932_v29 = vshrl.u32 %v6635_v13, 16  ;;  %v2876_v36 = vpack.i.b16 %v6608_v44, %v2397_v48  ;;  %v3144_v10 = vunpack.c.l.b16 %v6267_v26 }
 0x3c2   : > { %v6644_v25 = vsel %vm1590_vm9, %v2514_v50, %v1396_v22  ;;  %v6656_v1 = vunpack.c.l.b16 %v7917_v27  ;;  %v6659_v50 = vpack.i.b16 %v2908_v54, %v2907_v34  ;;  %v2873_v20 = vpack.i.b16 %v2872_v28, %v2871_v3 }
 0x3c3   : > { %v1924_v22 = vrot.slane %v6424_v49, 4  ;;  %v2855_v38 = vpack.i.b16 %v2854_v21, %v2853_v35  ;;  %v3278_v40 = vunpack.c.l.b16 %v6270_v17  ;;  %v6668_v52 = vpack.i.b16 %v2932_v29, %v2931_v33 }
 0x3c4   : > { %v3279_v27 = vunpack.c.l.b16 %v2873_v20  ;;  %v3326_v34 = vunpack.c.l.b16 %v6288_v23  ;;  %v6671_v3 = vunpack.c.l.b16 %v2876_v36  ;;  %v2877_v49 = vshrl.u32 %v2397_v48, 16 }
 0x3c5   : > { %v3145_v54 = vunpack.c.l.b16 %v2855_v38  ;;  %v2878_v28 = vshrl.u32 %v6608_v44, 16  ;;  %v1896_v26 = vrot.slane %v6415_v5, 4  ;;  %v1925_v17 = vsel %vm1590_vm9, 0, %v1924_v22 }
 0x3c6   : > { %v1418_v16 = vpop.permute.xlu2 %1417  ;;  %v6676_v35 = vpack.c.b16 %v3279_v27, %v3278_v40  ;;  %v2400_v38 = vrot.slane %v2397_v48, 4  ;;  %v7918_v36 = vpack.i.b16 %v6295_v32, %v6292_v47  ;;  %v2428_v40 = vrot.slane %v6608_v44, 4  ;;  %v7922_v48 = vld [vmem:[#allocation95_spill] sm:$0xff] }
 0x3c7   : > { %v2016_v9 = vrot.slane %v1418_v16, 4  ;;  %v6682_v23 = vpack.c.b16 %v3145_v54, %v3144_v10  ;;  %v2879_v20 = vpack.i.b16 %v2878_v28, %v2877_v49  ;;  %v1897_v29 = vsel %vm1590_vm9, 0, %v1896_v26 }
 0x3c8   : > { %v6674_v31 = vpop.permute.xlu1 %1403  ;;  %v6688_v16 = vunpack.c.l.b16 %v7918_v36  ;;  %v7920_v5 = vpack.i.b16 %v6308_v62, %v6314_v24  ;;  %v2858_v33 = vpack.i.b16 %v1925_v17, %v1897_v29  ;;  %v2401_v10 = vsel %vm1590_vm9, 0, %v2400_v38 }
 0x3c9   : > { %v1402_v21 = vpop.permute.xlu0 %1401  ;;  %v3327_v27 = vunpack.c.l.b16 %v2879_v20  ;;  %v7923_v54 = vpack.i.b16 %v6176_v63, %v7922_v48  ;;  %v2429_v47 = vsel %vm1590_vm9, 0, %v2428_v40  ;;  %v2859_v32 = vshrl.u32 %v1897_v29, 16 }
 0x3ca   : > { %7919 = vst [vmem:[#allocation109_spill] sm:$0xff] %v6688_v16  ;;  %v6694_v22 = vunpack.c.l.b16 %v7920_v5  ;;  %v2860_v28 = vshrl.u32 %v1925_v17, 16  ;;  %v2017_v62 = vsel %vm1590_vm9, %v2016_v9, %v1402_v21  ;;  %v6708_v26 = vunpack.c.l.b16 %v2858_v33  ;;  %v7926_v9 = vld [vmem:[#allocation87_spill] sm:$0xff] }
 0x3cb   : > { %v6700_v49 = vunpack.c.l.b16 %v7923_v54  ;;  %v6706_v24 = vpack.c.b16 %v3327_v27, %v3326_v34  ;;  %v2882_v20 = vpack.i.b16 %v2429_v47, %v2401_v10  ;;  %v2883_v36 = vshrl.u32 %v2401_v10, 16 }
 0x3cc   : > { %7921 = vst [vmem:[#allocation103_spill] sm:$0xff] %v6694_v22  ;;  %v2861_v38 = vpack.i.b16 %v2860_v28, %v2859_v32  ;;  %v2884_v5 = vshrl.u32 %v2429_v47, 16  ;;  %v2864_v63 = vpack.i.b16 %v6467_v43, %v6438_v12  ;;  %v1982_v40 = vrot.slane %v6550_v15, 4  ;;  %v7928_v15 = vld [vmem:[#allocation90_spill] sm:$0xff] }
 0x3cd   : > { %7924 = vst [vmem:[#allocation112_spill] sm:$0xff] %v6700_v49  ;;  %v6717_v48 = vunpack.c.l.b16 %v2882_v20  ;;  %v3192_v34 = vunpack.c.l.b16 %v7926_v9  ;;  %v2021_v21 = vperm.slane %v2017_v62, %v5234_v55  ;;  %v3374_v32 = vunpack.c.l.b16 %v7928_v15 }
 0x3ce   : > { %v6713_v29 = vpop.permute.xlu2 %1423  ;;  %v3193_v27 = vunpack.c.l.b16 %v2861_v38  ;;  %v2885_v10 = vpack.i.b16 %v2884_v5, %v2883_v36  ;;  %v6721_v54 = vunpack.c.l.b16 %v2864_v63  ;;  %v1983_v62 = vsel %vm1590_vm9, %v1982_v40, %v6574_v18 }
 0x3cf   : > { %7925 = vst [vmem:[#allocation104_spill] sm:$0xff] %v6717_v48  ;;  %v2890_v36 = vshrl.u32 %v6555_v41, 16  ;;  %v2022_v5 = vrot.slane %v2021_v21, 4  ;;  %v1987_v18 = vperm.slane %v1983_v62, %v5234_v55  ;;  %v7932_v62 = vpack.i.b16 %v6540_v56, %v6523_v58 }
 0x3d0   : > { %v1410_v33 = vpop.permute.xlu1 %1409  ;;  %7927 = vst [vmem:[#allocation111_spill] sm:$0xff] %v6721_v54  ;;  %v6726_v17 = vpack.c.b16 %v3193_v27, %v3192_v34  ;;  %v3375_v20 = vunpack.c.l.b16 %v2885_v10  ;;  %v2889_v27 = vshrl.u32 %v6474_v14, 16  ;;  %v2519_v58 = vperm.slane %v6644_v25, %v5234_v55 }
 0x3d1   : > { %v2010_v47 = vrot.slane %v1410_v33, 4  ;;  %v1408_v12 = vpop.permute.xlu0 %1407 }
 0x3d2   : > { %v2486_v28 = vrot.slane %v1408_v12, 4  ;;  %7929 = vst [vmem:[#allocation107_spill] sm:$0xff] %v6726_v17  ;;  %v6738_v34 = vpack.c.b16 %v3375_v20, %v3374_v32  ;;  %v6743_v40 = vpack.i.b16 %v2890_v36, %v2889_v27  ;;  %v7931_v20 = vpack.i.b16 %v6555_v41, %v6474_v14 }
 0x3d3   : > { %v2011_v38 = vsel %vm1590_vm9, %v2010_v47, %v6443_v19  ;;  %v6758_v36 = vunpack.c.l.b16 %v7932_v62  ;;  %v2528_v43 = vrot.slane %v2519_v58, 4 }
 0x3d4   : > { %v2015_v63 = vperm.slane %v2011_v38, %v5234_v55  ;;  %v2487_v33 = vsel %vm1590_vm9, %v2486_v28, %v6567_v2  ;;  %7930 = vst [vmem:[#allocation114_spill] sm:$0xff] %v6738_v34 }
 0x3d5   : > { %v2491_v15 = vperm.slane %v2487_v33, %v5234_v55 }
 0x3d6   : > { %v2023_v10 = vsel %vm1590_vm9, %v2022_v5, %v2015_v63  ;;  %v2024_v12 = vrot.slane %v2015_v63, 4  ;;  %v6748_v9 = vpop.permute.xlu2 %1447  ;;  %v6753_v5 = vunpack.c.l.b16 %v7931_v20 }
 0x3d7   : > { %v2029_v47 = vperm.slane %v2023_v10, %v5283_v42  ;;  %v2500_v10 = vrot.slane %v2491_v15, 4 }
 0x3d8   : > { %v2025_v19 = vsel %vm1590_vm9, %v2021_v21, %v2024_v12  ;;  %v1416_v38 = vpop.permute.xlu1 %1415  ;;  %v1996_v21 = vrot.slane %v1987_v18, 4 }
 0x3d9   : > { %v2492_v2 = vrot.slane %v1416_v38, 4  ;;  %v1414_v32 = vpop.permute.xlu0 %1413  ;;  %v2033_v63 = vperm.slane %v2025_v19, %v5283_v42  ;;  %v2034_v41 = vrot.slane %v2029_v47, 4  ;;  %v7933_v19 = vpack.i.b16 %v6590_v60, %v6537_v46 }
 0x3da   : > { %v1988_v28 = vrot.slane %v1414_v32, 4 }
 0x3db   : > { %v2493_v33 = vsel %vm1590_vm9, %v2492_v2, %v6487_v57  ;;  %v6774_v57 = vunpack.c.l.b16 %v7933_v19 }
 0x3dc   : > { %v2497_v12 = vperm.slane %v2493_v33, %v5234_v55  ;;  %v1989_v14 = vsel %vm1590_vm9, %v1988_v28, %v6625_v59  ;;  %v7934_v59 = vpack.i.b16 %v6529_v7, %v6548_v39  ;;  %v3146_v33 = vunpack.c.l.b16 %v6622_v4 }
 0x3dd   : > { %v1993_v56 = vperm.slane %v1989_v14, %v5234_v55  ;;  %v2036_v14 = vrot.slane %v2033_v63, 4 }
 0x3de   : > { %v2498_v2 = vrot.slane %v2497_v12, 4  ;;  %v2501_v32 = vsel %vm1590_vm9, %v2497_v12, %v2500_v10  ;;  %v6781_v28 = vunpack.c.l.b16 %v7934_v59  ;;  %v2035_v10 = vsel %vm1590_vm9, 0, %v2034_v41 }
 0x3df   : > { %v1994_v25 = vrot.slane %v1993_v56, 4  ;;  %v1997_v62 = vsel %vm1590_vm9, %v1993_v56, %v1996_v21  ;;  %v6795_v39 = vperm.slane %v2501_v32, %v5283_v42  ;;  %v2938_v41 = vshrl.u32 %v2029_v47, 16 }
 0x3e0   : > { %v2499_v46 = vsel %vm1590_vm9, %v2498_v2, %v2491_v15  ;;  %v2005_v60 = vperm.slane %v1997_v62, %v5283_v42  ;;  %v6787_v19 = vpop.permute.xlu1 %1421  ;;  %v6799_v62 = vpop.permute.xlu2 %1429  ;;  %v2944_v44 = vshrl.u32 %v2035_v10, 16  ;;  %v2950_v12 = vshrl.u32 %v2033_v63, 16 }
 0x3e1   : > { %v6792_v7 = vperm.slane %v2499_v46, %v5283_v42  ;;  %v1995_v4 = vsel %vm1590_vm9, %v1994_v25, %v1987_v18  ;;  %v1420_v21 = vpop.permute.xlu0 %1419  ;;  %v6802_v38 = vsel %vm1590_vm9, 0, %v2036_v14  ;;  %v2973_v27 = vshrl.u32 %v6795_v39, 16 }
 0x3e2   : > { %v2001_v15 = vperm.slane %v1995_v4, %v5283_v42  ;;  %v2520_v56 = vrot.slane %v1420_v21, 4  ;;  %v2948_v2 = vpack.i.b16 %v2033_v63, %v2005_v60  ;;  %v2949_v59 = vshrl.u32 %v2005_v60, 16 }
 0x3e3   : > { %v2510_v63 = vrot.slane %v6792_v7, 4 }
 0x3e4   : > { %v2521_v32 = vsel %vm1590_vm9, %v2520_v56, %v6674_v31  ;;  %v2937_v46 = vshrl.u32 %v2001_v15, 16  ;;  %v2006_v20 = vrot.slane %v2001_v15, 4  ;;  %v2936_v18 = vpack.i.b16 %v2029_v47, %v2001_v15 }
 0x3e5   : > { %v2525_v25 = vperm.slane %v2521_v32, %v5234_v55  ;;  %v6807_v4 = vunpack.c.l.b16 %v2948_v2  ;;  %v2951_v21 = vpack.i.b16 %v2950_v12, %v2949_v59 }
 0x3e6   : > { %v2939_v49 = vpack.i.b16 %v2938_v41, %v2937_v46  ;;  %v2007_v54 = vsel %vm1590_vm9, 0, %v2006_v20  ;;  %v6812_v14 = vunpack.c.l.b16 %v2936_v18  ;;  %v7935_v46 = vunpack.c.l.b16 %v6743_v40 }
 0x3e7   : > { %v2526_v34 = vrot.slane %v2525_v25, 4  ;;  %v2529_v31 = vsel %vm1590_vm9, %v2525_v25, %v2528_v43  ;;  %v2942_v56 = vpack.i.b16 %v2035_v10, %v2007_v54  ;;  %v2943_v17 = vshrl.u32 %v2007_v54, 16 }
 0x3e8   : > { %v2537_v47 = vperm.slane %v2529_v31, %v5283_v42  ;;  %v6816_v15 = vpop.permute.xlu1 %1445  ;;  %v3051_v2 = vunpack.c.l.b16 %v2939_v49  ;;  %v2008_v10 = vrot.slane %v2005_v60, 4  ;;  %v3147_v25 = vunpack.c.l.b16 %v2951_v21 }
 0x3e9   : > { %v2527_v59 = vsel %vm1590_vm9, %v2526_v34, %v2519_v58  ;;  %v6823_v41 = vpop.permute.xlu0 %1425  ;;  %v6825_v32 = vunpack.c.l.b16 %v2942_v56  ;;  %v2945_v43 = vpack.i.b16 %v2944_v44, %v2943_v17  ;;  %v2961_v31 = vshrl.u32 %v6792_v7, 16  ;;  %v6842_v56 = vpop.permute.xlu2 %1435 }
 0x3ea   : > { %v6828_v54 = vperm.slane %v2527_v59, %v5283_v42  ;;  %v3056_v49 = vpack.c.b16 %v3051_v2, %v7935_v46  ;;  %v2972_v18 = vpack.i.b16 %v2537_v47, %v6795_v39  ;;  %v2974_v20 = vshrl.u32 %v2537_v47, 16 }
 0x3eb   : > { %v3099_v58 = vunpack.c.l.b16 %v2945_v43  ;;  %v2511_v17 = vsel %vm1590_vm9, 0, %v2510_v63  ;;  %v7936_v21 = vunpack.c.l.b16 %v6610_v8  ;;  %v6848_v59 = vpack.c.b16 %v3147_v25, %v3146_v33 }
 0x3ec   : > { %3064 = vrot.lane.b32.xlu2 %v3056_v49, %s3992_s4  ;;  %v2962_v44 = vshrl.u32 %v6828_v54, 16  ;;  %v2538_v60 = vrot.slane %v6828_v54, 4  ;;  %v6840_v40 = vunpack.c.l.b16 %v2972_v18  ;;  %v2975_v43 = vpack.i.b16 %v2974_v20, %v2973_v27 }
 0x3ed   : > { %v6846_v2 = vpack.c.b16 %v3099_v58, %v7936_v21  ;;  %v2009_v46 = vsel %vm1590_vm9, 0, %v2008_v10  ;;  %v2512_v18 = vrot.slane %v6795_v39, 4  ;;  %v2967_v22 = vshrl.u32 %v2511_v17, 16 }
 0x3ee   : > { %v2963_v49 = vpack.i.b16 %v2962_v44, %v2961_v31  ;;  %v2539_v12 = vsel %vm1590_vm9, 0, %v2538_v60  ;;  %v3329_v16 = vunpack.c.l.b16 %v2975_v43  ;;  %v2954_v33 = vpack.i.b16 %v6802_v38, %v2009_v46 }
 0x3ef   : > { %v2966_v34 = vpack.i.b16 %v2539_v12, %v2511_v17  ;;  %v2968_v48 = vshrl.u32 %v2539_v12, 16  ;;  %v2540_v27 = vrot.slane %v2537_v47, 4  ;;  %v2955_v20 = vshrl.u32 %v2009_v46, 16  ;;  %v7940_v47 = vld [vmem:[#allocation106_spill] sm:$0xff] }
 0x3f0   : > { %v6855_v8 = vpop.permute.xlu1 %1451  ;;  %v3233_v58 = vunpack.c.l.b16 %v2963_v49  ;;  %v7937_v25 = vpack.i.b16 %v6584_v37, %v6598_v30  ;;  %v3280_v17 = vunpack.c.l.b16 %v6620_v6  ;;  %v7938_v12 = vunpack.c.l.b16 %v6593_v45 }
 0x3f1   : > { %v1450_v10 = vpop.permute.xlu0 %1449  ;;  %v6863_v44 = vunpack.c.l.b16 %v2966_v34  ;;  %v2969_v39 = vpack.i.b16 %v2968_v48, %v2967_v22  ;;  %v7939_v21 = vunpack.c.l.b16 %v6646_v53  ;;  %v7941_v46 = vpack.i.b16 %v6629_v51, %v7940_v47 }
 0x3f2   : > { %v6861_v31 = vunpack.c.l.b16 %v7937_v25  ;;  %v6868_v60 = vpack.c.b16 %v3233_v58, %v7938_v12  ;;  %v2956_v30 = vshrl.u32 %v6802_v38, 16  ;;  %v6882_v6 = vunpack.c.l.b16 %v2954_v33  ;;  %v7942_v33 = vld [vmem:[#allocation108_spill] sm:$0xff] }
 0x3f3   : > { %v6872_v43 = vpack.c.b16 %v3329_v16, %v7939_v21  ;;  %v6877_v49 = vunpack.c.l.b16 %v7941_v46  ;;  %v3281_v22 = vunpack.c.l.b16 %v2969_v39  ;;  %v2513_v45 = vsel %vm1590_vm9, 0, %v2512_v18  ;;  %v1442_v21 = vpop.permute.xlu2 %1441 }
 0x3f4   : > { %v2541_v48 = vsel %vm1590_vm9, 0, %v2540_v27  ;;  %v2957_v53 = vpack.i.b16 %v2956_v30, %v2955_v20  ;;  %v3194_v58 = vunpack.c.l.b16 %v6659_v50  ;;  %v2979_v25 = vshrl.u32 %v2513_v45, 16 }
 0x3f5   : > { %v6886_v16 = vpack.c.b16 %v3281_v22, %v3280_v17  ;;  %v2978_v34 = vpack.i.b16 %v2541_v48, %v2513_v45  ;;  %v2980_v12 = vshrl.u32 %v2541_v48, 16  ;;  %v2072_v39 = vrot.slane %v1450_v10, 4 }
 0x3f6   : > { %v3195_v38 = vunpack.c.l.b16 %v2957_v53  ;;  %v7943_v47 = vpack.i.b16 %v6635_v13, %v7942_v33  ;;  %v2960_v30 = vpack.i.b16 %v6828_v54, %v6792_v7  ;;  %v3376_v45 = vunpack.c.l.b16 %v6668_v52 }
 0x3f7   : > { %v6896_v27 = vunpack.c.l.b16 %v2978_v34  ;;  %v2981_v46 = vpack.i.b16 %v2980_v12, %v2979_v25  ;;  %v7944_v13 = vpack.i.b16 %v6507_v11, %v6565_v61  ;;  %v2044_v53 = vrot.slane %v6816_v15, 4 }
 0x3f8   : > { %v6894_v18 = vunpack.c.l.b16 %v7943_v47  ;;  %v1434_v20 = vpop.permute.xlu1 %1433  ;;  %v6898_v17 = vpack.c.b16 %v3195_v38, %v3194_v58  ;;  %v2066_v34 = vrot.slane %v1442_v21, 4  ;;  %v6912_v38 = vunpack.c.l.b16 %v2960_v30 }
 0x3f9   : > { %v2073_v50 = vsel %vm1590_vm9, %v2072_v39, %v1434_v20  ;;  %v1432_v22 = vpop.permute.xlu0 %1431  ;;  %v6909_v48 = vunpack.c.l.b16 %v7944_v13  ;;  %v3377_v58 = vunpack.c.l.b16 %v2981_v46  ;;  %v2548_v52 = vrot.slane %v6748_v9, 4 }
 0x3fa   : > { %v2077_v7 = vperm.slane %v2073_v50, %v5234_v55  ;;  %v2045_v11 = vsel %vm1590_vm9, %v2044_v53, %v6799_v62  ;;  %v2067_v61 = vsel %vm1590_vm9, %v2066_v34, %v6823_v41  ;;  %v2576_v46 = vrot.slane %v6855_v8, 4 }
 0x3fb   : > { %v6915_v54 = vpack.c.b16 %v3377_v58, %v3376_v45  ;;  %v2549_v12 = vsel %vm1590_vm9, %v2548_v52, %v1432_v22  ;;  %v2049_v39 = vperm.slane %v2045_v11, %v5234_v55  ;;  %v2071_v33 = vperm.slane %v2067_v61, %v5234_v55 }
 0x3fc   : > { %v2078_v15 = vrot.slane %v2077_v7, 4  ;;  %v2553_v9 = vperm.slane %v2549_v12, %v5234_v55  ;;  %v2577_v53 = vsel %vm1590_vm9, %v2576_v46, %v6842_v56 }
 0x3fd   : > { %v2050_v45 = vrot.slane %v2049_v39, 4  ;;  %v2581_v11 = vperm.slane %v2577_v53, %v5234_v55 }
 0x3fe   : > { %v2079_v62 = vsel %vm1590_vm9, %v2078_v15, %v2071_v33  ;;  %v2554_v34 = vrot.slane %v2553_v9, 4 }
 0x3ff   : > { %v6939_v8 = vperm.slane %v2079_v62, %v5283_v42  ;;  %v2582_v62 = vrot.slane %v2581_v11, 4 }
 0x400   : > { %v1440_v21 = vpop.permute.xlu1 %1439 }
 0x401   : > { %v2542_v47 = vrot.slane %v1440_v21, 4  ;;  %v1438_v20 = vpop.permute.xlu0 %1437  ;;  %v2986_v12 = vshrl.u32 %v6939_v8, 16 }
 0x402   : > { %v2038_v30 = vrot.slane %v1438_v20, 4  ;;  %v2090_v20 = vrot.slane %v6939_v8, 4 }
 0x403   : > { %v2543_v41 = vsel %vm1590_vm9, %v2542_v47, %v6713_v29 }
 0x404   : > { %v2547_v50 = vperm.slane %v2543_v41, %v5234_v55  ;;  %v2039_v22 = vsel %vm1590_vm9, %v2038_v30, %v6787_v19 }
 0x405   : > { %v2043_v13 = vperm.slane %v2039_v22, %v5234_v55 }
 0x406   : > { %v2555_v52 = vsel %vm1590_vm9, %v2554_v34, %v2547_v50 }
 0x407   : > { %v2051_v58 = vsel %vm1590_vm9, %v2050_v45, %v2043_v13  ;;  %v6951_v21 = vperm.slane %v2555_v52, %v5283_v42  ;;  %v2052_v41 = vrot.slane %v2043_v13, 4 }
 0x408   : > { %v6944_v29 = vperm.slane %v2051_v58, %v5283_v42  ;;  %v1428_v47 = vpop.permute.xlu1 %1427  ;;  %v2091_v58 = vsel %vm1590_vm9, 0, %v2090_v20  ;;  %v2556_v20 = vrot.slane %v2547_v50, 4 }
 0x409   : > { %v1444_v19 = vpop.permute.xlu0 %1443  ;;  %v2566_v52 = vrot.slane %v6951_v21, 4  ;;  %v2992_v51 = vshrl.u32 %v2091_v58, 16 }
 0x40a   : > { %v2570_v61 = vrot.slane %v1444_v19, 4  ;;  %v2985_v15 = vshrl.u32 %v6944_v29, 16  ;;  %v2062_v56 = vrot.slane %v6944_v29, 4 }
 0x40c   : > { %v2571_v46 = vsel %vm1590_vm9, %v2570_v61, %v1428_v47  ;;  %v2987_v30 = vpack.i.b16 %v2986_v12, %v2985_v15  ;;  %v2063_v45 = vsel %vm1590_vm9, 0, %v2062_v56  ;;  %v2080_v61 = vrot.slane %v2071_v33, 4 }
 0x40d   : > { %v2575_v22 = vperm.slane %v2571_v46, %v5234_v55  ;;  %v2990_v10 = vpack.i.b16 %v2091_v58, %v2063_v45  ;;  %v2053_v15 = vsel %vm1590_vm9, %v2049_v39, %v2052_v41  ;;  %v3009_v55 = vshrl.u32 %v6951_v21, 16 }
 0x40e   : > { %v3052_v53 = vunpack.c.l.b16 %v2987_v30  ;;  %v2081_v47 = vsel %vm1590_vm9, %v2077_v7, %v2080_v61  ;;  %v2567_v46 = vsel %vm1590_vm9, 0, %v2566_v52  ;;  %v2557_v7 = vsel %vm1590_vm9, %v2553_v9, %v2556_v20 }
 0x40f   : > { %v2583_v34 = vsel %vm1590_vm9, %v2582_v62, %v2575_v22  ;;  %v2584_v13 = vrot.slane %v2575_v22, 4  ;;  %v3076_v30 = vunpack.c.l.b16 %v2990_v10  ;;  %v3015_v63 = vshrl.u32 %v2567_v46, 16 }
 0x410   : > { %v6961_v19 = vperm.slane %v2583_v34, %v5283_v42  ;;  %v3057_v25 = vpack.c.b16 %v3052_v53, %v3052_v53  ;;  %v2991_v53 = vshrl.u32 %v2063_v45, 16  ;;  %v2089_v37 = vperm.slane %v2081_v47, %v5283_v42 }
 0x411   : > { %v2585_v22 = vsel %vm1590_vm9, %v2581_v11, %v2584_v13  ;;  %v3081_v52 = vpack.c.b16 %v3076_v30, %v3076_v30  ;;  %v2565_v9 = vperm.slane %v2557_v7, %v5283_v42  ;;  %v2984_v58 = vpack.i.b16 %v6939_v8, %v6944_v29  ;;  %v7945_v30 = vld [vmem:[#allocation100_spill] sm:$0xff] }
 0x412   : > { %3066 = vrot.lane.b32.xlu0 %v3057_v25, %s3992_s4  ;;  %v3010_v12 = vshrl.u32 %v6961_v19, 16  ;;  %v2594_v56 = vrot.slane %v6961_v19, 4  ;;  %v2061_v25 = vperm.slane %v2053_v15, %v5283_v42  ;;  %v2993_v61 = vpack.i.b16 %v2992_v51, %v2991_v53 }
 0x413   : > { %v3008_v11 = vpack.i.b16 %v6961_v19, %v6951_v21  ;;  %v8006_v21 = vld [vmem:[#allocation17_spill] sm:$0xff] }
 0x414   : > { %v3011_v62 = vpack.i.b16 %v3010_v12, %v3009_v55  ;;  %v2595_v33 = vsel %vm1590_vm9, 0, %v2594_v56  ;;  %v2996_v45 = vpack.i.b16 %v2089_v37, %v2061_v25  ;;  %v2593_v56 = vperm.slane %v2585_v22, %v5283_v42 }
 0x415   : > { %v3014_v39 = vpack.i.b16 %v2595_v33, %v2567_v46  ;;  %v3016_v41 = vshrl.u32 %v2595_v33, 16  ;;  %v3100_v51 = vunpack.c.l.b16 %v2993_v61  ;;  %v2997_v15 = vshrl.u32 %v2061_v25, 16 }
 0x416   : > { %v3234_v34 = vunpack.c.l.b16 %v3011_v62  ;;  %v3124_v13 = vunpack.c.l.b16 %v2996_v45  ;;  %v3022_v47 = vshrl.u32 %v2593_v56, 16  ;;  %v2998_v46 = vshrl.u32 %v2089_v37, 16  ;;  %v7946_v62 = vld [vmem:[#allocation98_spill] sm:$0xff] }
 0x417   : > { %v3258_v50 = vunpack.c.l.b16 %v3014_v39  ;;  %v3017_v55 = vpack.i.b16 %v3016_v41, %v3015_v63  ;;  %v7947_v33 = vpack.c.b16 %v7945_v30, %v7946_v62  ;;  %v3021_v39 = vshrl.u32 %v2565_v9, 16 }
 0x418   : > { %v3239_v10 = vpack.c.b16 %v3234_v34, %v3234_v34  ;;  %v3105_v41 = vpack.c.b16 %v3100_v51, %v3100_v51  ;;  %v3020_v34 = vpack.i.b16 %v2593_v56, %v2565_v9  ;;  %v2999_v7 = vpack.i.b16 %v2998_v46, %v2997_v15 }
 0x419   : > { %v3263_v12 = vpack.c.b16 %v3258_v50, %v3258_v50  ;;  %v3282_v63 = vunpack.c.l.b16 %v3017_v55  ;;  %v3129_v50 = vpack.c.b16 %v3124_v13, %v3124_v13  ;;  %v2596_v61 = vrot.slane %v2593_v56, 4 }
 0x41a   : > { %3090 = vrot.lane.b32.xlu0 %v3081_v52, %s3993_s5  ;;  %3248 = vrot.lane.b32.xlu2 %v3239_v10, %s3992_s4  ;;  %v3023_v52 = vpack.i.b16 %v3022_v47, %v3021_v39  ;;  %v2064_v10 = vrot.slane %v2061_v25, 4  ;;  %v2092_v55 = vrot.slane %v2089_v37, 4  ;;  %v3148_v45 = vunpack.c.l.b16 %v2999_v7 }
 0x41b   : > { %3272 = vrot.lane.b32.xlu1 %v3263_v12, %s3993_s5  ;;  %v3287_v22 = vpack.c.b16 %v3282_v63, %v3282_v63  ;;  %v3306_v12 = vunpack.c.l.b16 %v3020_v34  ;;  %v2597_v15 = vsel %vm1590_vm9, 0, %v2596_v61 }
 0x41c   : > { %v3330_v51 = vunpack.c.l.b16 %v3023_v52  ;;  %v2065_v63 = vsel %vm1590_vm9, 0, %v2064_v10  ;;  %v2093_v25 = vsel %vm1590_vm9, 0, %v2092_v55  ;;  %v3153_v47 = vpack.c.b16 %v3148_v45, %v3148_v45  ;;  %v7013_v45 = vpop.permute.xlu2 %3058 }
 0x41d   : > { %v3311_v13 = vpack.c.b16 %v3306_v12, %v3306_v12  ;;  %v3002_v46 = vpack.i.b16 %v2093_v25, %v2065_v63  ;;  %v3004_v39 = vshrl.u32 %v2093_v25, 16  ;;  %v7948_v55 = vpack.c.b16 %v6825_v32, %v6774_v57 }
 0x41e   : > { %v3063_v20 = vpop.permute.xlu1 %3062  ;;  %v3335_v56 = vpack.c.b16 %v3330_v51, %v3330_v51  ;;  %v7949_v12 = vpack.c.b16 %v6863_v44, %v6861_v31  ;;  %v7950_v32 = vpack.c.b16 %v6812_v14, %v6753_v5  ;;  %v7951_v31 = vpack.c.b16 %v6807_v4, %v6758_v36  ;;  %v7954_v5 = vld [vmem:[#allocation93_spill] sm:$0xff]  ;;  %v7959_v4 = vld [vmem:[#allocation96_spill] sm:$0xff] }
 0x41f   : > { %v6988_v53 = vsel %vm3394_vm10, %v7947_v33, %v3063_v20  ;;  %v2568_v20 = vrot.slane %v2565_v9, 4  ;;  %v3172_v37 = vunpack.c.l.b16 %v3002_v46  ;;  %v3003_v9 = vshrl.u32 %v2065_v63, 16  ;;  %v7955_v14 = vld [vmem:[#allocation97_spill] sm:$0xff]  ;;  %v7964_v63 = vld [vmem:[#allocation63_spill] sm:$0xff] }
 0x420   : > { %v7952_v44 = vpack.c.b16 %v6840_v40, %v6781_v28  ;;  %v7957_v36 = vpack.c.b16 %v6882_v6, %v6877_v49  ;;  %v7958_v28 = vld [vmem:[#allocation101_spill] sm:$0xff]  ;;  %v7963_v49 = vld [vmem:[#allocation60_spill] sm:$0xff] }
 0x421   : > { %v2569_v30 = vsel %vm1590_vm9, 0, %v2568_v20  ;;  %v7960_v40 = vpack.c.b16 %v7958_v28, %v7959_v4  ;;  %v2722_v6 = vshrl.u32 %v7963_v49, 16  ;;  %v7985_v28 = vld [vmem:[#allocation85_spill] sm:$0xff] }
 0x422   : > { %3114 = vrot.lane.b32.xlu2 %v3105_v41, %s3994_s6  ;;  %3296 = vrot.lane.b32.xlu0 %v3287_v22, %s3994_s6  ;;  %v3026_v62 = vpack.i.b16 %v2597_v15, %v2569_v30  ;;  %v3177_v41 = vpack.c.b16 %v3172_v37, %v3172_v37  ;;  %v3005_v22 = vpack.i.b16 %v3004_v39, %v3003_v9  ;;  %v3027_v52 = vshrl.u32 %v2569_v30, 16  ;;  %v7970_v37 = vld [vmem:[#allocation66_spill] sm:$0xff] }
 0x423   : > { %3138 = vrot.lane.b32.xlu1 %v3129_v50, %s3995_s7  ;;  %v3028_v50 = vshrl.u32 %v2597_v15, 16  ;;  %v2721_v15 = vshrl.u32 %v7964_v63, 16  ;;  %v2230_v30 = vrot.slane %v7964_v63, 4  ;;  %v3277_v4 = vunpack.c.l.b16 %v7985_v28 }
 0x424   : > { %v3354_v33 = vunpack.c.l.b16 %v3026_v62  ;;  %v3196_v7 = vunpack.c.l.b16 %v3005_v22  ;;  %v7969_v62 = vld [vmem:[#allocation82_spill] sm:$0xff]  ;;  %v7972_v22 = vld [vmem:[#allocation72_spill] sm:$0xff] }
 0x425   : > { %v3029_v61 = vpack.i.b16 %v3028_v50, %v3027_v52  ;;  %v2723_v25 = vpack.i.b16 %v2722_v6, %v2721_v15  ;;  %v7971_v9 = vpack.i.b16 %v7969_v62, %v7970_v37  ;;  %v7993_v62 = vld [vmem:[#allocation80_spill] sm:$0xff] }
 0x426   : > { %v3359_v34 = vpack.c.b16 %v3354_v33, %v3354_v33  ;;  %v3201_v10 = vpack.c.b16 %v3196_v7, %v3196_v7  ;;  %v7975_v7 = vld [vmem:[#allocation109_spill] sm:$0xff] }
 0x427   : > { %v3228_v46 = vunpack.c.l.b16 %v2723_v25  ;;  %v3253_v33 = vunpack.c.l.b16 %v7971_v9  ;;  %v7976_v50 = vpack.c.b16 %v6708_v26, %v7975_v7  ;;  %v7989_v25 = vld [vmem:[#allocation59_spill] sm:$0xff] }
 0x42a   : > { %3320 = vrot.lane.b32.xlu2 %v3311_v13, %s3995_s7  ;;  %3162 = vrot.lane.b32.xlu0 %v3153_v47, %s3996_s8  ;;  %v7968_v13 = vld [vmem:[#allocation74_spill] sm:$0xff]  ;;  %v2258_v47 = vrot.slane %v7963_v49, 4  ;;  %v7987_v49 = vld [vmem:[#allocation56_spill] sm:$0xff] }
 0x42b   : > { %3344 = vrot.lane.b32.xlu1 %v3335_v56, %s3996_s8  ;;  %v2673_v6 = vshrl.u32 %v7987_v49, 16 }
 0x432   : > { %3186 = vrot.lane.b32.xlu2 %v3177_v41, %s3997_s9  ;;  %3246 = vrot.lane.b32.xlu0 %v6868_v60, %s3992_s4  ;;  %v3378_v60 = vunpack.c.l.b16 %v3029_v61 }
 0x433   : > { %3368 = vrot.lane.b32.xlu1 %v3359_v34, %s3997_s9  ;;  %v7973_v34 = vld [vmem:[#allocation69_spill] sm:$0xff] }
 0x434   : > { %v3383_v20 = vpack.c.b16 %v3378_v60, %v3378_v60  ;;  %v7978_v60 = vld [vmem:[#allocation104_spill] sm:$0xff] }
 0x43a   : > { %3088 = vrot.lane.b32.xlu2 %v7948_v55, %s3993_s5  ;;  %3210 = vrot.lane.b32.xlu0 %v3201_v10, %s3998_s10  ;;  %v7977_v55 = vld [vmem:[#allocation67_spill] sm:$0xff] }
 0x43b   : > { %3270 = vrot.lane.b32.xlu1 %v7949_v12, %s3993_s5  ;;  %v2248_v12 = vrot.slane %v7977_v55, 4 }
 0x442   : > { %3392 = vrot.lane.b32.xlu2 %v3383_v20, %s3998_s10  ;;  %3112 = vrot.lane.b32.xlu0 %v6846_v2, %s3994_s6  ;;  %v7953_v2 = vld [vmem:[#allocation99_spill] sm:$0xff] }
 0x443   : > { %3294 = vrot.lane.b32.xlu1 %v6886_v16, %s3994_s6  ;;  %v7956_v16 = vpack.c.b16 %v7954_v5, %v7955_v14  ;;  %v7979_v20 = vld [vmem:[#allocation103_spill] sm:$0xff] }
 0x444   : > { %v7984_v14 = vld [vmem:[#allocation107_spill] sm:$0xff] }
 0x446   : > { %v3065_v57 = vpop.permute.xlu2 %3064 }
 0x447   : > { %v7024_v51 = vsel %vm3394_vm10, %v7950_v32, %v3065_v57  ;;  %v7980_v57 = vpack.c.b16 %v7978_v60, %v7979_v20  ;;  %v7981_v32 = vld [vmem:[#allocation89_spill] sm:$0xff] }
 0x44a   : > { %3136 = vrot.lane.b32.xlu2 %v7951_v31, %s3995_s7  ;;  %3318 = vrot.lane.b32.xlu0 %v7952_v44, %s3995_s7  ;;  %v7982_v31 = vld [vmem:[#allocation68_spill] sm:$0xff] }
 0x44b   : > { %3160 = vrot.lane.b32.xlu1 %v6848_v59, %s3996_s8  ;;  %v7961_v59 = vpack.c.b16 %v6896_v27, %v6894_v18  ;;  %v7965_v18 = vld [vmem:[#allocation105_spill] sm:$0xff]  ;;  %v2220_v44 = vrot.slane %v7982_v31, 4 }
 0x44c   : > { %v7966_v27 = vpack.c.b16 %v6618_v0, %v7965_v18  ;;  %v2231_v0 = vsel %vm1590_vm9, 0, %v2230_v30  ;;  %v7988_v18 = vld [vmem:[#allocation19_spill] sm:$0xff] }
 0x44d   : > { %v2727_v61 = vshrl.u32 %v2231_v0, 16  ;;  %v2146_v7 = vrot.slane %v7988_v18, 4 }
 0x44f   : > { %v7149_v31 = vsel %vm1590_vm9, 0, %v2146_v7 }
 0x452   : > { %3244 = vrot.lane.b32.xlu2 %v7953_v2, %s3992_s4  ;;  %3342 = vrot.lane.b32.xlu0 %v6872_v43, %s3996_s8  ;;  %v7962_v43 = vld [vmem:[#allocation102_spill] sm:$0xff]  ;;  %v7983_v2 = vld [vmem:[#allocation65_spill] sm:$0xff] }
 0x453   : > { %3086 = vrot.lane.b32.xlu1 %v7956_v16, %s3993_s5  ;;  %v2249_v5 = vsel %vm1590_vm9, %v7983_v2, %v2248_v12 }
 0x454   : > { %v2257_v63 = vperm.slane %v2249_v5, %v5283_v42 }
 0x456   : > { %v2734_v12 = vshrl.u32 %v2257_v63, 16 }
 0x45a   : > { %3184 = vrot.lane.b32.xlu2 %v7957_v36, %s3997_s9  ;;  %3268 = vrot.lane.b32.xlu0 %v7960_v40, %s3993_s5  ;;  %v7986_v40 = vld [vmem:[#allocation57_spill] sm:$0xff] }
 0x45b   : > { %3366 = vrot.lane.b32.xlu1 %v7961_v59, %s3997_s9  ;;  %v2221_v59 = vsel %vm1590_vm9, %v7986_v40, %v2220_v44 }
 0x462   : > { %3110 = vrot.lane.b32.xlu2 %v7962_v43, %s3994_s6  ;;  %3208 = vrot.lane.b32.xlu0 %v6898_v17, %s3998_s10  ;;  %v7967_v17 = vpack.c.b16 %v6671_v3, %v6656_v1  ;;  %v7121_v43 = vpop.permute.xlu1 %3082 }
 0x463   : > { %3292 = vrot.lane.b32.xlu1 %v6676_v35, %s3994_s6  ;;  %v3229_v35 = vunpack.c.l.b16 %v7968_v13  ;;  %v2229_v13 = vperm.slane %v2221_v59, %v5283_v42  ;;  %v2260_v59 = vrot.slane %v2257_v63, 4 }
 0x465   : > { %v3236_v56 = vpack.c.b16 %v3229_v35, %v3228_v46 }
 0x46a   : > { %3390 = vrot.lane.b32.xlu2 %v6915_v54, %s3998_s10  ;;  %3134 = vrot.lane.b32.xlu0 %v7966_v27, %s3995_s7  ;;  %v2259_v54 = vsel %vm1590_vm9, 0, %v2258_v47  ;;  %v2626_v27 = vshrl.u32 %v7988_v18, 16  ;;  %v7990_v47 = vld [vmem:[#allocation20_spill] sm:$0xff] }
 0x46b   : > { %3316 = vrot.lane.b32.xlu1 %v7967_v17, %s3995_s7  ;;  %v2726_v1 = vpack.i.b16 %v2259_v54, %v2231_v0  ;;  %v2728_v10 = vshrl.u32 %v2259_v54, 16  ;;  %v2674_v17 = vshrl.u32 %v7989_v25, 16  ;;  %v2625_v46 = vshrl.u32 %v7990_v47, 16 }
 0x46c   : > { %v2732_v54 = vpack.i.b16 %v2257_v63, %v2229_v13  ;;  %v2174_v0 = vrot.slane %v7987_v49, 4  ;;  %v2118_v60 = vrot.slane %v7990_v47, 4  ;;  %v3220_v63 = vunpack.c.l.b16 %v3008_v11  ;;  %v8007_v11 = vld [vmem:[#allocation39_spill] sm:$0xff] }
 0x46d   : > { %v3252_v39 = vunpack.c.l.b16 %v2726_v1  ;;  %v2729_v26 = vpack.i.b16 %v2728_v10, %v2727_v61  ;;  %v2675_v30 = vpack.i.b16 %v2674_v17, %v2673_v6  ;;  %v7992_v1 = vld [vmem:[#allocation83_spill] sm:$0xff]  ;;  %v2627_v9 = vpack.i.b16 %v2626_v27, %v2625_v46 }
 0x46e   : > { %v7994_v37 = vpack.c.b16 %v7992_v1, %v7993_v62  ;;  %v3300_v55 = vunpack.c.l.b16 %v2732_v54  ;;  %v2175_v20 = vsel %vm1590_vm9, 0, %v2174_v0  ;;  %v2232_v17 = vrot.slane %v2229_v13, 4  ;;  %v8001_v62 = vld [vmem:[#allocation43_spill] sm:$0xff] }
 0x46f   : > { %v3260_v41 = vpack.c.b16 %v3253_v33, %v3252_v39  ;;  %v3276_v15 = vunpack.c.l.b16 %v2729_v26  ;;  %v3227_v61 = vunpack.c.l.b16 %v2675_v30  ;;  %v2733_v26 = vshrl.u32 %v2229_v13, 16  ;;  %v8000_v30 = vld [vmem:[#allocation41_spill] sm:$0xff]  ;;  %v8002_v13 = vld [vmem:[#allocation88_spill] sm:$0xff] }
 0x470   : > { %v2261_v46 = vsel %vm1590_vm9, 0, %v2260_v59  ;;  %v2233_v1 = vsel %vm1590_vm9, 0, %v2232_v17  ;;  %v2679_v7 = vshrl.u32 %v2175_v20, 16  ;;  %v8012_v59 = vld [vmem:[#allocation50_spill] sm:$0xff] }
 0x471   : > { %v3284_v35 = vpack.c.b16 %v3277_v4, %v3276_v15  ;;  %v2735_v28 = vpack.i.b16 %v2734_v12, %v2733_v26  ;;  %v2119_v4 = vsel %vm1590_vm9, 0, %v2118_v60  ;;  %v7999_v15 = vld [vmem:[#allocation79_spill] sm:$0xff]  ;;  %v2740_v17 = vshrl.u32 %v2261_v46, 16 }
 0x472   : > { %3158 = vrot.lane.b32.xlu2 %v6682_v23, %s3996_s8  ;;  %3242 = vrot.lane.b32.xlu0 %v3236_v56, %s3992_s4  ;;  %v7974_v23 = vpack.c.b16 %v7972_v22, %v7973_v34  ;;  %v7991_v56 = vld [vmem:[#allocation114_spill] sm:$0xff]  ;;  %v7996_v22 = vld [vmem:[#allocation76_spill] sm:$0xff]  ;;  %v2630_v40 = vpack.i.b16 %v7149_v31, %v2119_v4  ;;  %v3325_v18 = vunpack.c.l.b16 %v7999_v15 }
 0x473   : > { %3340 = vrot.lane.b32.xlu1 %v6706_v24, %s3996_s8  ;;  %v7098_v24 = vpop.permute.xlu0 %3060 }
 0x474   : > { %v7084_v3 = vpop.permute.xlu2 %3248  ;;  %v3250_v47 = vunpack.c.l.b16 %v2630_v40 }
 0x47a   : > { %3084 = vrot.lane.b32.xlu2 %v7974_v23, %s3993_s5  ;;  %3182 = vrot.lane.b32.xlu0 %v7976_v50, %s3997_s9  ;;  %v2202_v50 = vrot.slane %v7989_v25, 4 }
 0x47b   : > { %3266 = vrot.lane.b32.xlu1 %v3260_v41, %s3993_s5  ;;  %v7995_v41 = vld [vmem:[#allocation77_spill] sm:$0xff] }
 0x47c   : > { %v7100_v52 = vpop.permute.xlu2 %3114  ;;  %v7997_v34 = vpack.i.b16 %v7995_v41, %v7996_v22  ;;  %v2203_v44 = vsel %vm1590_vm9, 0, %v2202_v50  ;;  %v2738_v22 = vpack.i.b16 %v2261_v46, %v2233_v1  ;;  %v8014_v46 = vld [vmem:[#allocation61_spill] sm:$0xff] }
 0x47d   : > { %v2678_v5 = vpack.i.b16 %v2203_v44, %v2175_v20  ;;  %v2680_v40 = vshrl.u32 %v2203_v44, 16 }
 0x47e   : > { %v3301_v23 = vunpack.c.l.b16 %v7997_v34  ;;  %v8005_v34 = vld [vmem:[#allocation52_spill] sm:$0xff] }
 0x47f   : > { %v3251_v25 = vunpack.c.l.b16 %v2678_v5  ;;  %v3225_v5 = vpack.c.b16 %v3220_v63, %v3220_v63 }
 0x481   : > { %v3259_v0 = vpack.c.b16 %v3251_v25, %v3250_v47  ;;  %v2632_v25 = vshrl.u32 %v7149_v31, 16 }
 0x482   : > { %3364 = vrot.lane.b32.xlu2 %v7980_v57, %s3997_s9  ;;  %3108 = vrot.lane.b32.xlu0 %v7981_v32, %s3994_s6  ;;  %v3226_v57 = vunpack.c.l.b16 %v2627_v9  ;;  %v3308_v32 = vpack.c.b16 %v3301_v23, %v3300_v55  ;;  %v8003_v9 = vld [vmem:[#allocation81_spill] sm:$0xff]  ;;  %v2192_v23 = vrot.slane %v8005_v34, 4 }
 0x483   : > { %3206 = vrot.lane.b32.xlu1 %v7984_v14, %s3998_s10  ;;  %v7998_v14 = vld [vmem:[#allocation86_spill] sm:$0xff]  ;;  %v8004_v41 = vpack.c.b16 %v8002_v13, %v8003_v9 }
 0x484   : > { %v7114_v16 = vpop.permute.xlu0 %3066  ;;  %v7116_v36 = vpop.permute.xlu2 %3320  ;;  %v3235_v2 = vpack.c.b16 %v3227_v61, %v3226_v57  ;;  %v8008_v61 = vld [vmem:[#allocation12_spill] sm:$0xff]  ;;  %v8009_v57 = vld [vmem:[#allocation78_spill] sm:$0xff] }
 0x485   : > { %v2164_v55 = vrot.slane %v8008_v61, 4 }
 0x487   : > { %v2165_v15 = vsel %vm1590_vm9, %v8012_v59, %v2164_v55 }
 0x488   : > { %v2173_v44 = vperm.slane %v2165_v15, %v5283_v42 }
 0x48a   : > { %3290 = vrot.lane.b32.xlu2 %v3284_v35, %s3994_s6  ;;  %3388 = vrot.lane.b32.xlu0 %v7991_v56, %s3998_s10  ;;  %v3324_v35 = vunpack.c.l.b16 %v2735_v28  ;;  %v2108_v56 = vrot.slane %v8000_v30, 4  ;;  %v2631_v28 = vshrl.u32 %v2119_v4, 16  ;;  %v3494_v30 = vsel %vm3394_vm10, %v3225_v5, %v7084_v3 }
 0x48b   : > { %3132 = vrot.lane.b32.xlu1 %v7994_v37, %s3995_s7  ;;  %v2136_v37 = vrot.slane %v8001_v62, 4 }
 0x48c   : > { %v7137_v33 = vpop.permute.xlu0 %3090  ;;  %v7139_v39 = vpop.permute.xlu2 %3186  ;;  %v3332_v54 = vpack.c.b16 %v3325_v18, %v3324_v35  ;;  %v2109_v19 = vsel %vm1590_vm9, %v8006_v21, %v2108_v56  ;;  %v3348_v18 = vunpack.c.l.b16 %v2738_v22  ;;  %v8013_v35 = vld [vmem:[#allocation9_spill] sm:$0xff]  ;;  %v2681_v56 = vpack.i.b16 %v2680_v40, %v2679_v7 }
 0x48d   : > { %v3273_v10 = vpop.permute.xlu1 %3272  ;;  %v2137_v50 = vsel %vm1590_vm9, %v8007_v11, %v2136_v37  ;;  %v2193_v47 = vsel %vm1590_vm9, %v8013_v35, %v2192_v23  ;;  %v2633_v3 = vpack.i.b16 %v2632_v25, %v2631_v28  ;;  %v2685_v7 = vshrl.u32 %v2173_v44, 16  ;;  %v8018_v28 = vld [vmem:[#allocation16_spill] sm:$0xff] }
 0x48e   : > { %v3504_v8 = vsel %vm3410_vm11, %v3494_v30, %v3273_v10  ;;  %v2145_v31 = vperm.slane %v2137_v50, %v5283_v42  ;;  %v2201_v62 = vperm.slane %v2193_v47, %v5283_v42  ;;  %v8020_v47 = vld [vmem:[#allocation111_spill] sm:$0xff]  ;;  %v8021_v30 = vld [vmem:[#allocation112_spill] sm:$0xff] }
 0x48f   : > { %v3274_v21 = vunpack.c.l.b16 %v2633_v3 }
 0x490   : > { %v2684_v50 = vpack.i.b16 %v2201_v62, %v2173_v44  ;;  %v2686_v61 = vshrl.u32 %v2201_v62, 16  ;;  %v2148_v59 = vrot.slane %v2145_v31, 4  ;;  %v2204_v15 = vrot.slane %v2201_v62, 4 }
 0x492   : > { %3314 = vrot.lane.b32.xlu2 %v3308_v32, %s3995_s7  ;;  %3156 = vrot.lane.b32.xlu0 %v7998_v14, %s3996_s8  ;;  %v8010_v32 = vld [vmem:[#allocation75_spill] sm:$0xff]  ;;  %v3038_v14 = vunpack.c.l.b16 %v2984_v58  ;;  %v2739_v58 = vshrl.u32 %v2233_v1, 16  ;;  %v3275_v1 = vunpack.c.l.b16 %v2681_v56  ;;  %v8022_v56 = vpack.c.b16 %v8020_v47, %v8021_v30 }
 0x493   : > { %3240 = vrot.lane.b32.xlu1 %v3235_v2, %s3992_s4  ;;  %v8011_v26 = vpack.i.b16 %v8009_v57, %v8010_v32  ;;  %v2205_v3 = vsel %vm1590_vm9, 0, %v2204_v15  ;;  %s204_s4 = scalar_lea.vmem [#allocation5], %s3711_s28 }
 0x494   : > { %v7158_v49 = vpop.permute.xlu2 %3088  ;;  %v3297_v6 = vpop.permute.xlu0 %3296  ;;  %v3043_v4 = vpack.c.b16 %v3038_v14, %v3038_v14  ;;  %v2741_v63 = vpack.i.b16 %v2740_v17, %v2739_v58  ;;  %v3283_v32 = vpack.c.b16 %v3275_v1, %v3274_v21  ;;  %v2687_v14 = vpack.i.b16 %v2686_v61, %v2685_v7 }
 0x495   : > { %v7161_v27 = vpop.permute.xlu1 %3138  ;;  %v3349_v2 = vunpack.c.l.b16 %v8011_v26  ;;  %v3299_v17 = vunpack.c.l.b16 %v2684_v50  ;;  %v3418_v15 = vsel %vm3410_vm11, %v7024_v51, %v7158_v49 }
 0x496   : > { %v3409_v10 = vsel %vm3394_vm10, %v3043_v4, %v7114_v16  ;;  %v8016_v16 = vld [vmem:[#allocation92_spill] sm:$0xff] }
 0x497   : > { %v3356_v29 = vpack.c.b16 %v3349_v2, %v3348_v18  ;;  %v3420_v37 = vsel %vm3410_vm11, %v3409_v10, %v7137_v33  ;;  %v3373_v22 = vunpack.c.l.b16 %v8016_v16  ;;  %v3372_v33 = vunpack.c.l.b16 %v2741_v63 }
 0x499   : > { %v3380_v26 = vpack.c.b16 %v3373_v22, %v3372_v33 }
 0x49a   : > { %3338 = vrot.lane.b32.xlu2 %v3332_v54, %s3996_s8  ;;  %3180 = vrot.lane.b32.xlu0 %v8004_v41, %s3997_s9  ;;  %v3514_v54 = vsel %vm3421_vm12, %v3504_v8, %v3297_v6  ;;  %v2117_v6 = vperm.slane %v2109_v19, %v5283_v42  ;;  %v2638_v19 = vshrl.u32 %v2145_v31, 16 }
 0x49b   : > { %3264 = vrot.lane.b32.xlu1 %v3259_v0, %s3993_s5  ;;  %v8015_v0 = vld [vmem:[#allocation84_spill] sm:$0xff]  ;;  %v3524_v13 = vsel %vm3432_vm13, %v3514_v54, %v7116_v36  ;;  %v3431_v36 = vsel %vm3421_vm12, %v3420_v37, %v7100_v52  ;;  %s3619_s5 = sshll.u32 %s204_s4, 4  ;;  %s3620_s5 = int_to_ptr.vmem [resolvable:$true] %s3619_s5 }
 0x49c   : > { %v3393_v12 = vpop.permute.xlu2 %3392  ;;  %v3163_v60 = vpop.permute.xlu0 %3162  ;;  %v3442_v55 = vsel %vm3432_vm13, %v3431_v36, %v7161_v27  ;;  %v2637_v5 = vshrl.u32 %v2117_v6, 16  ;;  %v2636_v52 = vpack.i.b16 %v2145_v31, %v2117_v6  ;;  %v2120_v35 = vrot.slane %v2117_v6, 4  ;;  %v8023_v6 = vld [vmem:[#allocation58_spill] sm:$0xff]  ;;  %v8024_v36 = vld [vmem:[#allocation51_spill] sm:$0xff] }
 0x49d   : > { %v3345_v20 = vpop.permute.xlu1 %3344  ;;  %v3453_v2 = vsel %vm3443_vm14, %v3442_v55, %v3163_v60  ;;  %v8027_v55 = vld [vmem:[#allocation64_spill] sm:$0xff] }
 0x49e   : > { %v3534_v34 = vsel %vm3443_vm14, %v3524_v13, %v3345_v20  ;;  %v2176_v20 = vrot.slane %v2173_v44, 4  ;;  %v2639_v27 = vpack.i.b16 %v2638_v19, %v2637_v5  ;;  %v3464_v60 = vsel %vm3454_vm0, %v3453_v2, %v7139_v39 }
 0x49f   : > { %v3323_v44 = vunpack.c.l.b16 %v2687_v14  ;;  %v3298_v31 = vunpack.c.l.b16 %v2636_v52  ;;  %v2149_v39 = vsel %vm1590_vm9, 0, %v2148_v59  ;;  %v2121_v1 = vsel %vm1590_vm9, 0, %v2120_v35 }
 0x4a0   : > { %v2177_v4 = vsel %vm1590_vm9, 0, %v2176_v20  ;;  %v2642_v62 = vpack.i.b16 %v2149_v39, %v2121_v1  ;;  %v2644_v7 = vshrl.u32 %v2149_v39, 16  ;;  %v2643_v33 = vshrl.u32 %v2121_v1, 16 }
 0x4a1   : > { %v3307_v63 = vpack.c.b16 %v3299_v17, %v3298_v31  ;;  %v2690_v10 = vpack.i.b16 %v2205_v3, %v2177_v4  ;;  %v2691_v22 = vshrl.u32 %v2177_v4, 16 }
 0x4a2   : > { %3362 = vrot.lane.b32.xlu2 %v3356_v29, %s3997_s9  ;;  %3106 = vrot.lane.b32.xlu0 %v8014_v46, %s3994_s6  ;;  %v3322_v46 = vunpack.c.l.b16 %v2639_v27  ;;  %v2645_v61 = vpack.i.b16 %v2644_v7, %v2643_v33 }
 0x4a3   : > { %3204 = vrot.lane.b32.xlu1 %v8015_v0, %s3998_s10  ;;  %v3347_v16 = vunpack.c.l.b16 %v2690_v10 }
 0x4a4   : > { %v7212_v9 = vpop.permute.xlu2 %3136  ;;  %v7214_v41 = vpop.permute.xlu0 %3246  ;;  %v3331_v0 = vpack.c.b16 %v3323_v44, %v3322_v46  ;;  %v3370_v5 = vunpack.c.l.b16 %v2645_v61 }
 0x4a5   : > { %v3369_v23 = vpop.permute.xlu1 %3368 }
 0x4a6   : > { %v3544_v42 = vsel %vm3454_vm0, %v3534_v34, %v3369_v23  ;;  %v3346_v23 = vunpack.c.l.b16 %v2642_v62 }
 0x4a7   : > { %v3558_v11 = vsel %vm3465_vm15, %v3544_v42, %v3393_v12  ;;  %v8017_v12 = vld [vmem:[#allocation45_spill] sm:$0xff]  ;;  %v2692_v42 = vshrl.u32 %v2205_v3, 16 }
 0x4a8   : > { %v3573_v57 = vsel %vm3570_vm1, %v3558_v11, 0  ;;  %v8019_v40 = vpack.c.b16 %v8017_v12, %v8018_v28  ;;  %v3355_v21 = vpack.c.b16 %v3347_v16, %v3346_v23  ;;  %v8025_v11 = vld [vmem:[#allocation48_spill] sm:$0xff]  ;;  %v8028_v28 = vpack.c.b16 %v6912_v38, %v6909_v48 }
 0x4a9   : > { %3591 = vmatpush.bf16.msra.mxu1 %v3573_v57  ;;  %v2693_v19 = vpack.i.b16 %v2692_v42, %v2691_v22  ;;  %v8026_v50 = vpack.c.b16 %v8024_v36, %v8025_v11 }
 0x4aa   : > { %3288 = vrot.lane.b32.xlu2 %v3283_v32, %s3994_s6  ;;  %3386 = vrot.lane.b32.xlu0 %v3380_v26, %s3998_s10  ;;  %s3621_s6 = sshll.u32 %s3617_s30, 4  ;;  %s3622_s6 = int_to_ptr.hbm [resolvable:$true] %s3621_s6 }
 0x4ab   : > { %3130 = vrot.lane.b32.xlu1 %v8019_v40, %s3995_s7  ;;  %v3371_v26 = vunpack.c.l.b16 %v2693_v19  ;;  %v3491_v40 = vsel %vm3394_vm10, %v8028_v28, %v7214_v41  ;;  %s3914_s15 = sshra.s32 %s3622_s6, 4  ;;  %s3915_s15 = int_to_ptr.hbm [resolvable:$true] %s3914_s15 }
 0x4ac   : > { %v3245_v18 = vpop.permute.xlu2 %3244  ;;  %v3211_v25 = vpop.permute.xlu0 %3210  ;;  %p3921_p7 = scmp.lt.s32.totalorder %s3915_s15, %s7383_s3 }
 0x4ad   : > { %v7238_v8 = vsel %vm3394_vm10, %v8022_v56, %v3245_v18  ;;  %v3271_v29 = vpop.permute.xlu1 %3270  ;;  %v3479_v58 = vsel %vm3465_vm15, %v3464_v60, %v3211_v25  ;;  %v3379_v14 = vpack.c.b16 %v3371_v26, %v3370_v5 }
 0x4ae   : > { %v3571_v54 = vsel %vm3570_vm1, %v3479_v58, 0  ;;  %v3502_v27 = vsel %vm3410_vm11, %v3491_v40, %v3271_v29 }
 0x4af   : > { %3578 = vmatpush.bf16.msra.mxu0 %v3571_v54 }
 0x4b2   : > { %3312 = vrot.lane.b32.xlu2 %v3307_v63, %s3995_s7  ;;  %3154 = vrot.lane.b32.xlu0 %v8023_v6, %s3996_s8  ;;  %s3604_s7 = scalar_lea.sflag [#allocation4], %s4094_s19 }
 0x4b3   : > { %3336 = vrot.lane.b32.xlu1 %v3331_v0, %s3996_s8  ;;  %s3916_s8 = scalar_lea.hbm %s3915_s15, 16 }
 0x4b4   : > { %v3185_v37 = vpop.permute.xlu2 %3184  ;;  %v3113_v13 = vpop.permute.xlu0 %3112  ;;  %p3917_p4 = scmp.ne.s32.totalorder %s3915_s15, %s3916_s8  ;;  %p3922_p8 = scmp.lt.s32.totalorder %s3920_s11, %s3916_s8 }
 0x4b5   : > { %v3295_v34 = vpop.permute.xlu1 %3294  ;;  %v3429_v17 = vsel %vm3421_vm12, %v3418_v15, %v3113_v13 }
 0x4b6   : > { %v3512_v59 = vsel %vm3421_vm12, %v3502_v27, %v3295_v34  ;;  %v3440_v41 = vsel %vm3432_vm13, %v3429_v17, %v7212_v9  ;;  %p3918_p5 = pnand %p3917_p4, %p4071_p9  ;;  %p3923_p10 = por %p3922_p8, %p3921_p7 }
 0x4b8   : > { %p3919_p6 = pneg %p3918_p5 }
 0x4ba   : > { %3178 = vrot.lane.b32.xlu2 %v8026_v50, %s3997_s9  ;;  %3360 = vrot.lane.b32.xlu0 %v3355_v21, %s3997_s9  ;;  %p3924_p13 = pnand %p3923_p10, %p3919_p6 }
 0x4bb   : > { %3202 = vrot.lane.b32.xlu1 %v8027_v55, %s3998_s10 }
 0x4bc   : > { %v3111_v57 = vpop.permute.xlu2 %3110  ;;  %v3319_v32 = vpop.permute.xlu0 %3318 }
 0x4bd   : > { %v3161_v2 = vpop.permute.xlu1 %3160  ;;  %v3522_v18 = vsel %vm3432_vm13, %v3512_v59, %v3319_v32  ;;  %v8030_v32 = vld [vmem:[#allocation70_spill] sm:$0xff]  ;;  %v3999_v59 = vmov 0  }
 0x4be   : > { %v3451_v30 = vsel %vm3443_vm14, %v3440_v41, %v3161_v2  ;;  %3869 = vset.pattern.permute.xlu0 %v3999_v59 }
 0x4bf   : > { %v3462_v56 = vsel %vm3454_vm0, %v3451_v30, %v3185_v37 }
 0x4c2   : > { %3384 = vrot.lane.b32.xlu2 %v3379_v14, %s3998_s10 }
 0x4c4   : > { %v3391_v20 = vpop.permute.xlu2 %3390  ;;  %v3343_v52 = vpop.permute.xlu0 %3342 }
 0x4c5   : > { %v3087_v12 = vpop.permute.xlu1 %3086  ;;  %v3532_v35 = vsel %vm3443_vm14, %v3522_v18, %v3343_v52  ;;  %v8032_v52 = vld [vmem:[#allocation94_spill] sm:$0xff] }
 0x4c6   : > { %v3416_v9 = vsel %vm3410_vm11, %v6988_v53, %v3087_v12  ;;  %v8033_v12 = vld [vmem:[#allocation91_spill] sm:$0xff] }
 0x4c7   : > { %v3427_v10 = vsel %vm3421_vm12, %v3416_v9, %v3111_v57  ;;  %v8029_v57 = vld [vmem:[#allocation73_spill] sm:$0xff]  ;;  %v8034_v28 = vpack.c.b16 %v8032_v52, %v8033_v12 }
 0x4c8   : > { %v8031_v26 = vpack.c.b16 %v8029_v57, %v8030_v32 }
 0x4ca   : > { %v3400_v2 = vsel %vm3394_vm10, %v8031_v26, %v7098_v24 }
 0x4cc   : > { %v3159_v25 = vpop.permute.xlu2 %3158  ;;  %v3269_v60 = vpop.permute.xlu0 %3268 }
 0x4cd   : > { %v3367_v47 = vpop.permute.xlu1 %3366  ;;  %v3500_v16 = vsel %vm3410_vm11, %v7238_v8, %v3269_v60 }
 0x4ce   : > { %v3542_v48 = vsel %vm3454_vm0, %v3532_v35, %v3367_v47 }
 0x4cf   : > { %v3555_v38 = vsel %vm3465_vm15, %v3542_v48, %v3391_v20  ;;  %v3560_v20 = vld [vmem:[%s7382_s2] sm:$0xff] }
 0x4d0   : > { %3592 = vmatpush.bf16.msra.mxu1 %v3555_v38  ;;  %3563 = vperm.xlu0 %3869, %v3560_v20  }
 0x4d4   : > { %v3085_v51 = vpop.permute.xlu2 %3084  ;;  %v3209_v49 = vpop.permute.xlu0 %3208 }
 0x4d5   : > { %v3293_v29 = vpop.permute.xlu1 %3292  ;;  %v3476_v58 = vsel %vm3465_vm15, %v3462_v56, %v3209_v49  ;;  %v3414_v5 = vsel %vm3410_vm11, %v3400_v2, %v3085_v51 }
 0x4d6   : > { %3579 = vmatpush.bf16.msra.mxu0 %v3476_v58  ;;  %v3510_v34 = vsel %vm3421_vm12, %v3500_v16, %v3293_v29  ;;  %v8035_v29 = vld [vmem:[#allocation54_spill] sm:$0xff] }
 0x4d7   : > { %v8036_v58 = vld [vmem:[#allocation62_spill] sm:$0xff] }
 0x4dc   : > { %v3135_v44 = vpop.permute.xlu0 %3134  ;;  %v3365_v4 = vpop.permute.xlu2 %3364 }
 0x4dd   : > { %v3317_v54 = vpop.permute.xlu1 %3316  ;;  %v3438_v0 = vsel %vm3432_vm13, %v3427_v10, %v3135_v44  ;;  %v8037_v44 = vpack.c.b16 %v8035_v29, %v8036_v58 }
 0x4de   : > { %v3449_v6 = vsel %vm3443_vm14, %v3438_v0, %v3159_v25  ;;  %v3520_v53 = vsel %vm3432_vm13, %v3510_v34, %v3317_v54 }
 0x4e4   : > { %v3243_v31 = vpop.permute.xlu0 %3242  ;;  %v3291_v39 = vpop.permute.xlu2 %3290 }
 0x4e5   : > { %v3341_v46 = vpop.permute.xlu1 %3340  ;;  %v3485_v40 = vsel %vm3394_vm10, %v8034_v28, %v3243_v31 }
 0x4e6   : > { %v3530_v23 = vsel %vm3443_vm14, %v3520_v53, %v3341_v46 }
 0x4e7   : > { %v3540_v21 = vsel %vm3454_vm0, %v3530_v23, %v3365_v4 }
 0x4ec   : > { %v3183_v3 = vpop.permute.xlu0 %3182  ;;  %v3315_v1 = vpop.permute.xlu2 %3314 }
 0x4ed   : > { %v3267_v63 = vpop.permute.xlu1 %3266  ;;  %v3460_v37 = vsel %vm3454_vm0, %v3449_v6, %v3183_v3  ;;  %v8039_v3 = vld [vmem:[#allocation47_spill] sm:$0xff] }
 0x4ee   : > { %v3498_v15 = vsel %vm3410_vm11, %v3485_v40, %v3267_v63 }
 0x4ef   : > { %v3508_v35 = vsel %vm3421_vm12, %v3498_v15, %v3291_v39  ;;  %v8038_v39 = vld [vmem:[#allocation49_spill] sm:$0xff] }
 0x4f0   : > { %v3518_v48 = vsel %vm3432_vm13, %v3508_v35, %v3315_v1  ;;  %v8040_v9 = vpack.c.b16 %v8038_v39, %v8039_v3 }
 0x4f2   : > { %v3397_v63 = vsel %vm3394_vm10, %v8040_v9, %v7013_v45 }
 0x4f3   : > { %v3412_v10 = vsel %vm3410_vm11, %v3397_v63, %v7121_v43 }
 0x4f4   : > { %v3109_v62 = vpop.permute.xlu0 %3108  ;;  %v3339_v7 = vpop.permute.xlu2 %3338 }
 0x4f5   : > { %v3207_v13 = vpop.permute.xlu1 %3206  ;;  %v3425_v14 = vsel %vm3421_vm12, %v3414_v5, %v3109_v62  ;;  %v3528_v38 = vsel %vm3443_vm14, %v3518_v48, %v3339_v7  ;;  %v3559_v7 = vld [vmem:[%s7381_s1] sm:$0xf] }
 0x4f6   : > { %v3473_v22 = vsel %vm3465_vm15, %v3460_v37, %v3207_v13 }
 0x4f7   : > { %3580 = vmatpush.bf16.msra.mxu0 %v3473_v22 }
 0x4fc   : > { %v3389_v42 = vpop.permute.xlu0 %3388  ;;  %v3363_v11 = vpop.permute.xlu2 %3362 }
 0x4fd   : > { %v3133_v33 = vpop.permute.xlu1 %3132  ;;  %v3552_v19 = vsel %vm3465_vm15, %v3540_v21, %v3389_v42  ;;  %v3538_v41 = vsel %vm3454_vm0, %v3528_v38, %v3363_v11 }
 0x4fe   : > { %3593 = vmatpush.bf16.msra.mxu1 %v3552_v19  ;;  %v3436_v27 = vsel %vm3432_vm13, %v3425_v14, %v3133_v33 }
 0x504   : > { %v3157_v36 = vpop.permute.xlu0 %3156  ;;  %v3289_v55 = vpop.permute.xlu2 %3288 }
 0x505   : > { %v3241_v8 = vpop.permute.xlu1 %3240  ;;  %v3447_v24 = vsel %vm3443_vm14, %v3436_v27, %v3157_v36 }
 0x506   : > { %v3482_v4 = vsel %vm3394_vm10, %v8037_v44, %v3241_v8 }
 0x50c   : > { %v3181_v50 = vpop.permute.xlu0 %3180  ;;  %v3313_v47 = vpop.permute.xlu2 %3312 }
 0x50d   : > { %v3265_v61 = vpop.permute.xlu1 %3264  ;;  %v3458_v25 = vsel %vm3454_vm0, %v3447_v24, %v3181_v50 }
 0x50e   : > { %v3496_v31 = vsel %vm3410_vm11, %v3482_v4, %v3265_v61 }
 0x50f   : > { %v3506_v0 = vsel %vm3421_vm12, %v3496_v31, %v3289_v55 }
 0x510   : > { %v3516_v37 = vsel %vm3432_vm13, %v3506_v0, %v3313_v47 }
 0x514   : > { %v3107_v18 = vpop.permute.xlu0 %3106  ;;  %v3179_v56 = vpop.permute.xlu2 %3178 }
 0x515   : > { %v3205_v60 = vpop.permute.xlu1 %3204  ;;  %v3423_v1 = vsel %vm3421_vm12, %v3412_v10, %v3107_v18 }
 0x516   : > { %v3470_v17 = vsel %vm3465_vm15, %v3458_v25, %v3205_v60 }
 0x517   : > { %3581 = vmatpush.bf16.msra.mxu0 %v3470_v17 }
 0x51c   : > { %v3387_v30 = vpop.permute.xlu0 %3386  ;;  %v3385_v22 = vpop.permute.xlu2 %3384 }
 0x51d   : > { %v3131_v51 = vpop.permute.xlu1 %3130  ;;  %v3549_v49 = vsel %vm3465_vm15, %v3538_v41, %v3387_v30 }
 0x51e   : > { %3594 = vmatpush.bf16.msra.mxu1 %v3549_v49  ;;  %v3434_v6 = vsel %vm3432_vm13, %v3423_v1, %v3131_v51 }
 0x524   : > { %v3155_v54 = vpop.permute.xlu0 %3154 }
 0x525   : > { %v3337_v46 = vpop.permute.xlu1 %3336  ;;  %v3445_v62 = vsel %vm3443_vm14, %v3434_v6, %v3155_v54 }
 0x526   : > { %v3526_v13 = vsel %vm3443_vm14, %v3516_v37, %v3337_v46  ;;  %v3456_v43 = vsel %vm3454_vm0, %v3445_v62, %v3179_v56 }
 0x52c   : > { %v3361_v16 = vpop.permute.xlu0 %3360 }
 0x52d   : > { %v3536_v45 = vsel %vm3454_vm0, %v3526_v13, %v3361_v16  ;;  %v3203_v34 = vpop.permute.xlu1 %3202 }
 0x52e   : > { %v3467_v53 = vsel %vm3465_vm15, %v3456_v43, %v3203_v34  ;;  %v3546_v23 = vsel %vm3465_vm15, %v3536_v45, %v3385_v22 }
 0x52f   : > { %3582 = vmatpush.bf16.msra.mxu0 %v3467_v53  ;;  %3595 = vmatpush.bf16.msra.mxu1 %v3546_v23 }
 0x532   : > { %3780 = vmatmul.msk.bf16.vlgmr.msra.gmra.mxu0 %vm3566_vm2, %v3559_v7  ;;  %3781 = vmatmul.msk.bf16.vlgmr.msra.gmra.mxu1 %vm3566_vm2, %v3559_v7 }
 0x542   : > { %v3564_v42 = vpop.permute.xlu0 %3563 }
 0x5af   : > { %v3584_v21 = vpop.f32.mrf.mxu0  ;;  %v3597_v33 = vpop.f32.mrf.mxu1 }
 0x5b0   : > { %v3585_v19 = vadd.f32 %v3584_v21, %v3564_v42  ;;  %v3598_v36 = vadd.f32 %v3597_v33, %v3564_v42 }
 0x5b2   : > { %3601 = vst [vmem:[%s204_s4] sm:$0xff] %v3585_v19 }
 0x5b3   : > { %3602 = vst [vmem:[%s204_s4 + $0x8] sm:$0xff] %v3598_v36 }
 0x5b4   : > { %3927 = shalt.err (!%p3924_p13)
}
 0x5b5   : > { %3793 = dma.vmem_to_hbm [thread:$0]  (%p4071_p9), %s3620_s5, 256, %s3622_s6, %s3604_s7  }
 0x5b7   : > { %v3586_v11 = vpop.f32.mrf.mxu0  ;;  %v3599_v8 = vpop.f32.mrf.mxu1 }
 0x5b8 PF: > { %s3633_s19 = sand.u32 1, %s3962_s12   ;;  %p3800_p0 = pnand %p3708_p12, %p4078_p11 }
 0x5b9   : > { %s3634_s22 = scalar_lea.sflag [#allocation4], %s3633_s19 }
 0x5ba   : > { %p3801_p1 = pneg %p3800_p0 }
 0x5bc   : > { %3957 = dma.done.wait (%p3801_p1), %s3634_s22, 256  }
 0x5bd   : > { %3959 = vsyncadd (%p3801_p1), %s3634_s22, 4294967040  ;;  %s19_s17 = sadd.s32 1, %s3982_s17   ;;  %s8041_s12 = smov %s3966_s13 }
 0x5be   : > { %p16_p2 = scmp.ge.s32.totalorder %s19_s17, 4   ;;  %s8042_s13 = smov %s3970_s14 }
 0x5bf   : > { %s8043_s14 = smov %s4076_s26  ;;  %s8044_s15 = smov %s3978_s16 }
 0x5c0   : > { %s8045_s16 = smov %s8047_s20  ;;  %18 = sbr.rel (!%p16_p2) target bundleno = 6 (0x6), region = 78 }
 0x5c5   :  { %3640 = vsyncpa [#allocation3], 1 }
 0x5c6   :  { %3642 = vsyncpa [#allocation3 + $0x1], 1 }
 0x5c7   :  { %3643 = vsyncpa [#allocation4], 1 }
 0x5c8   :  { %3645 = vsyncpa [#allocation4 + $0x1], 1 }

</bundles_post_ra>
